<compile_context>
chip_gen: v5e
topology: v5e:2x2
jax: 0.10.0
libtpu: 0.0.40
codegen_flags: <defaults>
</compile_context>

<pallas_src>
import jax
import jax.numpy as jnp
from jax.experimental import pallas as pl
from jax.experimental.pallas import tpu as pltpu

# ---------------- tiny ViT config (stand-in for DINO vit_base, patch 8) --------------
IMG = 32            # stand-in for 224
PATCH = 8           # DINO patch size
IN_CH = 3
DIM = 256           # stand-in for 768 (multiple of 128 -> lane-dense)
HEADS = 2           # stand-in for 12  (HEAD_DIM = 128 -> all head slices vreg-aligned)
DEPTH = 2           # stand-in for 12
MLP_HIDDEN = 4 * DIM
HEAD_DIM = DIM // HEADS
N_PATCH = (IMG // PATCH) ** 2
N_TOK = N_PATCH + 1
N_TOK_PAD = ((N_TOK + 7) // 8) * 8        # 17 -> 24 : sublane-aligned token tile
EPS = 1e-6

IMAGENET_MEAN = (0.485, 0.456, 0.406)
IMAGENET_STD = (0.229, 0.224, 0.225)

VMEM_LIMIT_BYTES = 64 * 1024 * 1024


# ---------------- kernel helpers -------------------------------------------------------
def _layernorm(x, g, b):
    mu = jnp.mean(x, axis=-1, keepdims=True)
    var = jnp.mean((x - mu) ** 2, axis=-1, keepdims=True)
    return (x - mu) * jax.lax.rsqrt(var + EPS) * g + b


def _make_kernel(with_patch_out):
    """Build the per-grid-step (= per transformer block) kernel body."""

    def kernel(patches_ref, mean_ref, inv_std_ref, pmask_ref, clspos_ref, kbias_ref,
               patch_w_ref, patch_b_ref,
               ln1g_ref, ln1b_ref, qkvw_ref, qkvb_ref,
               projw_ref, projb_ref, ln2g_ref, ln2b_ref,
               fc1w_ref, fc1b_ref, fc2w_ref, fc2b_ref,
               lng_ref, lnb_ref, *rest):
        if with_patch_out:
            out_ref, k_out_ref, x_ref, attn_ref = rest
        else:
            out_ref, x_ref, attn_ref = rest
            k_out_ref = None

        d = pl.program_id(0)
        last = pl.num_programs(0) - 1

        # ---- first grid step only: patch embed (ImageNet Normalize folded in) + CLS/pos
        @pl.when(d == 0)
        def _():
            xin = (patches_ref[...] - mean_ref[...]) * inv_std_ref[...]
            emb = jnp.dot(xin.astype(jnp.bfloat16), patch_w_ref[...],
                          preferred_element_type=jnp.float32) + patch_b_ref[...]
            # zero the CLS slot / pad rows of the patch projection, add CLS token + pos
            x_ref[...] = emb * pmask_ref[...] + clspos_ref[...]

        # ---- one transformer block per grid step (x persists in VMEM scratch) ----------
        x = x_ref[...]                                             # f32 (N_TOK_PAD, DIM)

        h = _layernorm(x, ln1g_ref[...], ln1b_ref[...]).astype(jnp.bfloat16)
        qkv = jnp.dot(h, qkvw_ref[...],
                      preferred_element_type=jnp.float32) + qkvb_ref[...]
        q = qkv[:, 0 * DIM:1 * DIM]
        k = qkv[:, 1 * DIM:2 * DIM]
        v = qkv[:, 2 * DIM:3 * DIM]

        if with_patch_out:
            # 'patch' feature hook: K part of the last block's qkv output
            @pl.when(d == last)
            def _():
                k_out_ref[...] = k

        scale = jnp.float32(HEAD_DIM ** -0.5)
        for hd in range(HEADS):
            lo = hd * HEAD_DIM
            q_h = (q[:, lo:lo + HEAD_DIM] * scale).astype(jnp.bfloat16)   # scale folded in
            k_h = k[:, lo:lo + HEAD_DIM].astype(jnp.bfloat16)
            v_h = v[:, lo:lo + HEAD_DIM].astype(jnp.bfloat16)
            s = jax.lax.dot_general(q_h, k_h, (((1,), (1,)), ((), ())),
                                    preferred_element_type=jnp.float32)
            s = s + kbias_ref[...]                     # additive row mask: 0 / -1e30 (pad)
            s = s - jnp.max(s, axis=-1, keepdims=True)
            e = jnp.exp(s)
            inv = pl.reciprocal(jnp.sum(e, axis=-1, keepdims=True), approx=True)
            p = (e * inv).astype(jnp.bfloat16)
            # write head output straight into its lane-aligned scratch slice (no concat)
            attn_ref[:, lo:lo + HEAD_DIM] = jnp.dot(p, v_h,
                                                    preferred_element_type=jnp.float32)

        attn = jnp.dot(attn_ref[...].astype(jnp.bfloat16), projw_ref[...],
                       preferred_element_type=jnp.float32) + projb_ref[...]
        x = x + attn

        h2 = _layernorm(x, ln2g_ref[...], ln2b_ref[...]).astype(jnp.bfloat16)
        m = jnp.dot(h2, fc1w_ref[...],
                    preferred_element_type=jnp.float32) + fc1b_ref[...]
        # TODO(synk): PyTorch nn.GELU is exact (erf); tanh approximation used (<1e-3 diff).
        m = jax.nn.gelu(m, approximate=True).astype(jnp.bfloat16)
        m = jnp.dot(m, fc2w_ref[...],
                    preferred_element_type=jnp.float32) + fc2b_ref[...]
        x = x + m

        x_ref[...] = x

        # ---- last grid step only: final LayerNorm (CLS feature is row 0) ---------------
        @pl.when(d == last)
        def _():
            out_ref[...] = _layernorm(x, lng_ref[...], lnb_ref[...])

    return kernel


# ---------------- BlockSpec plumbing ----------------------------------------------------
def _resident_spec(arr):
    """Full-array block, same index every grid step (stays resident in VMEM)."""
    shape = tuple(arr.shape)
    n = len(shape)
    return pl.BlockSpec(shape, lambda d, n=n: (0,) * n)


def _perblock_spec(arr):
    """Stacked (DEPTH, ...) weight: one block per grid step, leading dim squeezed."""
    shape = tuple(arr.shape)
    n = len(shape) - 1
    return pl.BlockSpec((None,) + shape[1:], lambda d, n=n: (d,) + (0,) * n)


# ---------------- parameters -----------------------------------------------------------
def init_params(key):
    def nrm(k, shape, scale=0.02, dtype=jnp.bfloat16):
        return (scale * jax.random.normal(k, shape, dtype=jnp.float32)).astype(dtype)

    k_patch, k_cls, k_pos, k_blocks = jax.random.split(key, 4)
    params = {
        "patch_w": nrm(k_patch, (IN_CH * PATCH * PATCH, DIM)),               # bf16
        "patch_b": jnp.zeros((1, DIM), jnp.float32),
        "cls_token": nrm(k_cls, (1, DIM), dtype=jnp.float32),
        "pos_embed": nrm(k_pos, (N_TOK, DIM), dtype=jnp.float32),
        "ln_g": jnp.ones((1, DIM), jnp.float32),
        "ln_b": jnp.zeros((1, DIM), jnp.float32),
    }
    qkv_w, proj_w, fc1_w, fc2_w = [], [], [], []
    for d in range(DEPTH):
        bk = jax.random.split(jax.random.fold_in(k_blocks, d), 4)
        qkv_w.append(nrm(bk[0], (DIM, 3 * DIM)))
        proj_w.append(nrm(bk[1], (DIM, DIM)))
        fc1_w.append(nrm(bk[2], (DIM, MLP_HIDDEN)))
        fc2_w.append(nrm(bk[3], (MLP_HIDDEN, DIM)))
    params["blocks"] = {
        "ln1_g": jnp.ones((DEPTH, 1, DIM), jnp.float32),
        "ln1_b": jnp.zeros((DEPTH, 1, DIM), jnp.float32),
        "qkv_w": jnp.stack(qkv_w),                                           # bf16
        "qkv_b": jnp.zeros((DEPTH, 1, 3 * DIM), jnp.float32),
        "proj_w": jnp.stack(proj_w),                                         # bf16
        "proj_b": jnp.zeros((DEPTH, 1, DIM), jnp.float32),
        "ln2_g": jnp.ones((DEPTH, 1, DIM), jnp.float32),
        "ln2_b": jnp.zeros((DEPTH, 1, DIM), jnp.float32),
        "fc1_w": jnp.stack(fc1_w),                                           # bf16
        "fc1_b": jnp.zeros((DEPTH, 1, MLP_HIDDEN), jnp.float32),
        "fc2_w": jnp.stack(fc2_w),                                           # bf16
        "fc2_b": jnp.zeros((DEPTH, 1, DIM), jnp.float32),
    }
    return params


# ---------------- forward (patchify glue in JAX, everything else in one kernel) --------
def dino_forward(image, params, feat_type="cls"):
    """image: [C, H, W] float32 in [0,1] (ToTensor layout).  Batch of 1 implied."""
    C, H, W = image.shape
    gh, gw = H // PATCH, W // PATCH
    n_patch = gh * gw

    # patchify (C,H,W) -> (N_patch, C*P*P), then pad to the sublane-aligned token tile:
    # row 0 = CLS slot (zeros), rows 1..N_patch = patches, rows N_TOK.. = padding (zeros)
    patches = image.reshape(C, gh, PATCH, gw, PATCH)
    patches = patches.transpose(1, 3, 0, 2, 4).reshape(n_patch, C * PATCH * PATCH)
    patches_pad = jnp.zeros((N_TOK_PAD, C * PATCH * PATCH), jnp.float32)
    patches_pad = patches_pad.at[1:1 + n_patch].set(patches)

    mean_vec = jnp.repeat(jnp.asarray(IMAGENET_MEAN, jnp.float32), PATCH * PATCH)[None, :]
    inv_std_vec = 1.0 / jnp.repeat(jnp.asarray(IMAGENET_STD, jnp.float32), PATCH * PATCH)[None, :]

    # CLS token + positional embedding, laid out per padded token row
    cls_pos = jnp.zeros((N_TOK_PAD, DIM), jnp.float32)
    cls_pos = cls_pos.at[0:1].set(params["cls_token"] + params["pos_embed"][0:1])
    cls_pos = cls_pos.at[1:N_TOK].set(params["pos_embed"][1:])

    # 1 for real patch rows (1..N_TOK-1), 0 for the CLS slot and padding rows
    row_ids = jnp.arange(N_TOK_PAD, dtype=jnp.int32)[:, None]
    pmask = ((row_ids >= 1) & (row_ids < N_TOK)).astype(jnp.float32)          # (N_TOK_PAD, 1)

    # additive key bias row: 0 for real tokens, -1e30 for padded key columns
    col_ids = jnp.arange(N_TOK_PAD, dtype=jnp.int32)[None, :]
    key_bias = jnp.where(col_ids < N_TOK, 0.0, -1e30).astype(jnp.float32)     # (1, N_TOK_PAD)

    blk = params["blocks"]
    resident = [patches_pad, mean_vec, inv_std_vec, pmask, cls_pos, key_bias,
                params["patch_w"], params["patch_b"]]
    perblock = [blk["ln1_g"], blk["ln1_b"], blk["qkv_w"], blk["qkv_b"],
                blk["proj_w"], blk["proj_b"], blk["ln2_g"], blk["ln2_b"],
                blk["fc1_w"], blk["fc1_b"], blk["fc2_w"], blk["fc2_b"]]
    tail = [params["ln_g"], params["ln_b"]]
    inputs = resident + perblock + tail

    in_specs = ([_resident_spec(a) for a in resident]
                + [_perblock_spec(a) for a in perblock]
                + [_resident_spec(a) for a in tail])

    with_patch_out = (feat_type == "patch")
    if with_patch_out:
        out_shapes = (jax.ShapeDtypeStruct((N_TOK_PAD, DIM), jnp.float32),   # final LN out
                      jax.ShapeDtypeStruct((N_TOK_PAD, DIM), jnp.float32))   # K of last blk
        out_specs = (pl.BlockSpec((N_TOK_PAD, DIM), lambda d: (0, 0)),
                     pl.BlockSpec((N_TOK_PAD, DIM), lambda d: (0, 0)))
    else:
        out_shapes = jax.ShapeDtypeStruct((N_TOK_PAD, DIM), jnp.float32)
        out_specs = pl.BlockSpec((N_TOK_PAD, DIM), lambda d: (0, 0))

    result = pl.pallas_call(
        _make_kernel(with_patch_out),
        grid=(DEPTH,),
        in_specs=in_specs,
        out_specs=out_specs,
        out_shape=out_shapes,
        scratch_shapes=[pltpu.VMEM((N_TOK_PAD, DIM), jnp.float32),   # residual stream x
                        pltpu.VMEM((N_TOK_PAD, DIM), jnp.float32)],  # attention head outs
        compiler_params=pltpu.CompilerParams(
            dimension_semantics=("arbitrary",),
            vmem_limit_bytes=VMEM_LIMIT_BYTES),
    )(*inputs)

    if feat_type == "cls":
        return result[0:1, :]                          # [1, DIM]  (CLS feature)
    elif feat_type == "patch":
        _, k_last = result
        return k_last[1:N_TOK, :][None, :, :]          # [1, N_TOK-1, DIM]  (K, CLS dropped)
    else:
        raise ValueError(feat_type)


# ---------------- main ------------------------------------------------------------------
if __name__ == "__main__":
    key = jax.random.PRNGKey(0)
    k_img, k_par = jax.random.split(key)

    # one image, CHW, values in [0,1] like torchvision ToTensor output
    image = jax.random.uniform(k_img, (IN_CH, IMG, IMG), dtype=jnp.float32)
    params = init_params(k_par)

    feats_cls = dino_forward(image, params, feat_type="cls")
    feats_patch = dino_forward(image, params, feat_type="patch")
    jax.block_until_ready((feats_cls, feats_patch))

    assert feats_cls.shape == (1, DIM)
    assert feats_patch.shape == (1, N_TOK - 1, DIM)
    assert bool(jnp.all(jnp.isfinite(feats_cls))) and bool(jnp.all(jnp.isfinite(feats_patch)))
    print("KERNEL_OK")
</pallas_src>

<mosaic_0001>
module attributes {stable_mosaic.version = 11 : i64} {
  func.func @kernel(%arg0: i32, %arg1: memref<24x192xf32, #tpu.memory_space<vmem>>, %arg2: memref<1x192xf32, #tpu.memory_space<vmem>>, %arg3: memref<1x192xf32, #tpu.memory_space<vmem>>, %arg4: memref<24x1xf32, #tpu.memory_space<vmem>>, %arg5: memref<24x256xf32, #tpu.memory_space<vmem>>, %arg6: memref<1x24xf32, #tpu.memory_space<vmem>>, %arg7: memref<192x256xbf16, #tpu.memory_space<vmem>>, %arg8: memref<1x256xf32, #tpu.memory_space<vmem>>, %arg9: memref<1x1x256xf32, #tpu.memory_space<vmem>>, %arg10: memref<1x1x256xf32, #tpu.memory_space<vmem>>, %arg11: memref<1x256x768xbf16, #tpu.memory_space<vmem>>, %arg12: memref<1x1x768xf32, #tpu.memory_space<vmem>>, %arg13: memref<1x256x256xbf16, #tpu.memory_space<vmem>>, %arg14: memref<1x1x256xf32, #tpu.memory_space<vmem>>, %arg15: memref<1x1x256xf32, #tpu.memory_space<vmem>>, %arg16: memref<1x1x256xf32, #tpu.memory_space<vmem>>, %arg17: memref<1x256x1024xbf16, #tpu.memory_space<vmem>>, %arg18: memref<1x1x1024xf32, #tpu.memory_space<vmem>>, %arg19: memref<1x1024x256xbf16, #tpu.memory_space<vmem>>, %arg20: memref<1x1x256xf32, #tpu.memory_space<vmem>>, %arg21: memref<1x256xf32, #tpu.memory_space<vmem>>, %arg22: memref<1x256xf32, #tpu.memory_space<vmem>>, %arg23: memref<24x256xf32, #tpu.memory_space<vmem>>, %arg24: memref<24x256xf32, #tpu.memory_space<vmem>>, %arg25: memref<24x256xf32, #tpu.memory_space<vmem>>) attributes {dimension_semantics = [#tpu.dimension_semantics<arbitrary>], iteration_bounds = array<i64: 2>, scalar_prefetch = 0 : i64, scratch_operands = 2 : i64, tpu.core_type = #tpu.core_type<tc>, window_params = [{pipeline_mode = #tpu.pipeline_mode<synchronous>, transform_indices = @transform_0, window_bounds = array<i64: 24, 192>}, {pipeline_mode = #tpu.pipeline_mode<synchronous>, transform_indices = @transform_1, window_bounds = array<i64: 1, 192>}, {pipeline_mode = #tpu.pipeline_mode<synchronous>, transform_indices = @transform_2, window_bounds = array<i64: 1, 192>}, {pipeline_mode = #tpu.pipeline_mode<synchronous>, transform_indices = @transform_3, window_bounds = array<i64: 24, 1>}, {pipeline_mode = #tpu.pipeline_mode<synchronous>, transform_indices = @transform_4, window_bounds = array<i64: 24, 256>}, {pipeline_mode = #tpu.pipeline_mode<synchronous>, transform_indices = @transform_5, window_bounds = array<i64: 1, 24>}, {pipeline_mode = #tpu.pipeline_mode<synchronous>, transform_indices = @transform_6, window_bounds = array<i64: 192, 256>}, {pipeline_mode = #tpu.pipeline_mode<synchronous>, transform_indices = @transform_7, window_bounds = array<i64: 1, 256>}, {transform_indices = @transform_8, window_bounds = array<i64: 1, 1, 256>}, {transform_indices = @transform_9, window_bounds = array<i64: 1, 1, 256>}, {transform_indices = @transform_10, window_bounds = array<i64: 1, 256, 768>}, {transform_indices = @transform_11, window_bounds = array<i64: 1, 1, 768>}, {transform_indices = @transform_12, window_bounds = array<i64: 1, 256, 256>}, {transform_indices = @transform_13, window_bounds = array<i64: 1, 1, 256>}, {transform_indices = @transform_14, window_bounds = array<i64: 1, 1, 256>}, {transform_indices = @transform_15, window_bounds = array<i64: 1, 1, 256>}, {transform_indices = @transform_16, window_bounds = array<i64: 1, 256, 1024>}, {transform_indices = @transform_17, window_bounds = array<i64: 1, 1, 1024>}, {transform_indices = @transform_18, window_bounds = array<i64: 1, 1024, 256>}, {transform_indices = @transform_19, window_bounds = array<i64: 1, 1, 256>}, {pipeline_mode = #tpu.pipeline_mode<synchronous>, transform_indices = @transform_20, window_bounds = array<i64: 1, 256>}, {pipeline_mode = #tpu.pipeline_mode<synchronous>, transform_indices = @transform_21, window_bounds = array<i64: 1, 256>}, {pipeline_mode = #tpu.pipeline_mode<synchronous>, transform_indices = @transform_22, window_bounds = array<i64: 24, 256>}]} {
    %c0_i32 = arith.constant 0 : i32
    %0 = arith.cmpi eq, %arg0, %c0_i32 : i32
    %1 = arith.extui %0 : i1 to i32
    %c0_i32_0 = arith.constant 0 : i32
    %2 = arith.cmpi ne, %1, %c0_i32_0 : i32
    scf.if %2 {
      %c0_77 = arith.constant 0 : index
      %c0_78 = arith.constant 0 : index
      %161 = vector.load %arg1[%c0_77, %c0_78] : memref<24x192xf32, #tpu.memory_space<vmem>>, vector<24x192xf32>
      %c0_79 = arith.constant 0 : index
      %c0_80 = arith.constant 0 : index
      %162 = vector.load %arg2[%c0_79, %c0_80] : memref<1x192xf32, #tpu.memory_space<vmem>>, vector<1x192xf32>
      %163 = vector.broadcast %162 : vector<1x192xf32> to vector<24x192xf32>
      %164 = arith.subf %161, %163 : vector<24x192xf32>
      %c0_81 = arith.constant 0 : index
      %c0_82 = arith.constant 0 : index
      %165 = vector.load %arg3[%c0_81, %c0_82] : memref<1x192xf32, #tpu.memory_space<vmem>>, vector<1x192xf32>
      %166 = vector.broadcast %165 : vector<1x192xf32> to vector<24x192xf32>
      %167 = arith.mulf %164, %166 : vector<24x192xf32>
      %168 = arith.truncf %167 : vector<24x192xf32> to vector<24x192xbf16>
      %c0_83 = arith.constant 0 : index
      %c0_84 = arith.constant 0 : index
      %169 = vector.load %arg7[%c0_83, %c0_84] : memref<192x256xbf16, #tpu.memory_space<vmem>>, vector<192x256xbf16>
      %cst_85 = arith.constant dense<0.000000e+00> : vector<24x256xf32>
      %170 = tpu.matmul %168, %169, %cst_85 {dimension_numbers = #tpu.dot_dimension_numbers<[1], [0], [0], [1], [0, 0, 1, 1], [], []>} : vector<24x192xbf16>, vector<192x256xbf16>, vector<24x256xf32> -> vector<24x256xf32>
      %c0_86 = arith.constant 0 : index
      %c0_87 = arith.constant 0 : index
      %171 = vector.load %arg8[%c0_86, %c0_87] : memref<1x256xf32, #tpu.memory_space<vmem>>, vector<1x256xf32>
      %172 = vector.broadcast %171 : vector<1x256xf32> to vector<24x256xf32>
      %173 = arith.addf %170, %172 : vector<24x256xf32>
      %c0_88 = arith.constant 0 : index
      %c0_89 = arith.constant 0 : index
      %174 = vector.load %arg4[%c0_88, %c0_89] : memref<24x1xf32, #tpu.memory_space<vmem>>, vector<24x1xf32>
      %175 = vector.broadcast %174 : vector<24x1xf32> to vector<24x256xf32>
      %176 = arith.mulf %173, %175 : vector<24x256xf32>
      %c0_90 = arith.constant 0 : index
      %c0_91 = arith.constant 0 : index
      %177 = vector.load %arg5[%c0_90, %c0_91] : memref<24x256xf32, #tpu.memory_space<vmem>>, vector<24x256xf32>
      %178 = arith.addf %176, %177 : vector<24x256xf32>
      %c0_92 = arith.constant 0 : index
      %c0_93 = arith.constant 0 : index
      %179 = vector.load %arg24[%c0_92, %c0_93] : memref<24x256xf32, #tpu.memory_space<vmem>>, vector<24x256xf32>
      tpu.vector_store %arg24[%c0_92, %c0_93], %178 {strides = array<i32>} : memref<24x256xf32, #tpu.memory_space<vmem>>, vector<24x256xf32>,
    } else {
    }
    %c0 = arith.constant 0 : index
    %c0_1 = arith.constant 0 : index
    %3 = vector.load %arg24[%c0, %c0_1] : memref<24x256xf32, #tpu.memory_space<vmem>>, vector<24x256xf32>
    %c0_2 = arith.constant 0 : index
    %c0_3 = arith.constant 0 : index
    %c0_4 = arith.constant 0 : index
    %4 = vector.load %arg9[%c0_2, %c0_3, %c0_4] : memref<1x1x256xf32, #tpu.memory_space<vmem>>, vector<1x1x256xf32>
    %5 = vector.shape_cast %4 : vector<1x1x256xf32> to vector<1x256xf32>
    %c0_5 = arith.constant 0 : index
    %c0_6 = arith.constant 0 : index
    %c0_7 = arith.constant 0 : index
    %6 = vector.load %arg10[%c0_5, %c0_6, %c0_7] : memref<1x1x256xf32, #tpu.memory_space<vmem>>, vector<1x1x256xf32>
    %7 = vector.shape_cast %6 : vector<1x1x256xf32> to vector<1x256xf32>
    %cst = arith.constant dense<0.000000e+00> : vector<24xf32>
    %8 = vector.multi_reduction <add>, %3, %cst [1] : vector<24x256xf32> to vector<24xf32>
    %9 = vector.shape_cast %8 : vector<24xf32> to vector<24x1xf32>
    %cst_8 = arith.constant 2.560000e+02 : f32
    %10 = vector.broadcast %cst_8 : f32 to vector<24x1xf32>
    %11 = arith.divf %9, %10 : vector<24x1xf32>
    %12 = vector.broadcast %11 : vector<24x1xf32> to vector<24x256xf32>
    %13 = arith.subf %3, %12 : vector<24x256xf32>
    %14 = arith.mulf %13, %13 : vector<24x256xf32>
    %cst_9 = arith.constant dense<0.000000e+00> : vector<24xf32>
    %15 = vector.multi_reduction <add>, %14, %cst_9 [1] : vector<24x256xf32> to vector<24xf32>
    %16 = vector.shape_cast %15 : vector<24xf32> to vector<24x1xf32>
    %cst_10 = arith.constant 2.560000e+02 : f32
    %17 = vector.broadcast %cst_10 : f32 to vector<24x1xf32>
    %18 = arith.divf %16, %17 : vector<24x1xf32>
    %19 = vector.broadcast %11 : vector<24x1xf32> to vector<24x256xf32>
    %20 = arith.subf %3, %19 : vector<24x256xf32>
    %cst_11 = arith.constant 9.99999997E-7 : f32
    %21 = vector.broadcast %cst_11 : f32 to vector<24x1xf32>
    %22 = arith.addf %18, %21 : vector<24x1xf32>
    %23 = math.rsqrt %22 : vector<24x1xf32>
    %24 = vector.broadcast %23 : vector<24x1xf32> to vector<24x256xf32>
    %25 = arith.mulf %20, %24 : vector<24x256xf32>
    %26 = vector.broadcast %5 : vector<1x256xf32> to vector<24x256xf32>
    %27 = arith.mulf %25, %26 : vector<24x256xf32>
    %28 = vector.broadcast %7 : vector<1x256xf32> to vector<24x256xf32>
    %29 = arith.addf %27, %28 : vector<24x256xf32>
    %30 = arith.truncf %29 : vector<24x256xf32> to vector<24x256xbf16>
    %c0_12 = arith.constant 0 : index
    %c0_13 = arith.constant 0 : index
    %c0_14 = arith.constant 0 : index
    %31 = vector.load %arg11[%c0_12, %c0_13, %c0_14] : memref<1x256x768xbf16, #tpu.memory_space<vmem>>, vector<1x256x768xbf16>
    %32 = vector.shape_cast %31 : vector<1x256x768xbf16> to vector<256x768xbf16>
    %cst_15 = arith.constant dense<0.000000e+00> : vector<24x768xf32>
    %33 = tpu.matmul %30, %32, %cst_15 {dimension_numbers = #tpu.dot_dimension_numbers<[1], [0], [0], [1], [0, 0, 1, 1], [], []>} : vector<24x256xbf16>, vector<256x768xbf16>, vector<24x768xf32> -> vector<24x768xf32>
    %c0_16 = arith.constant 0 : index
    %c0_17 = arith.constant 0 : index
    %c0_18 = arith.constant 0 : index
    %34 = vector.load %arg12[%c0_16, %c0_17, %c0_18] : memref<1x1x768xf32, #tpu.memory_space<vmem>>, vector<1x1x768xf32>
    %35 = vector.shape_cast %34 : vector<1x1x768xf32> to vector<1x768xf32>
    %36 = vector.broadcast %35 : vector<1x768xf32> to vector<24x768xf32>
    %37 = arith.addf %33, %36 : vector<24x768xf32>
    %38 = vector.extract_strided_slice %37 {offsets = [0, 0], sizes = [24, 256], strides = [1, 1]} : vector<24x768xf32> to vector<24x256xf32>
    %39 = vector.extract_strided_slice %37 {offsets = [0, 256], sizes = [24, 256], strides = [1, 1]} : vector<24x768xf32> to vector<24x256xf32>
    %40 = vector.extract_strided_slice %37 {offsets = [0, 512], sizes = [24, 256], strides = [1, 1]} : vector<24x768xf32> to vector<24x256xf32>
    %41 = vector.extract_strided_slice %38 {offsets = [0, 0], sizes = [24, 128], strides = [1, 1]} : vector<24x256xf32> to vector<24x128xf32>
    %cst_19 = arith.constant 0.0883883461 : f32
    %42 = vector.broadcast %cst_19 : f32 to vector<24x128xf32>
    %43 = arith.mulf %41, %42 : vector<24x128xf32>
    %44 = arith.truncf %43 : vector<24x128xf32> to vector<24x128xbf16>
    %45 = vector.extract_strided_slice %39 {offsets = [0, 0], sizes = [24, 128], strides = [1, 1]} : vector<24x256xf32> to vector<24x128xf32>
    %46 = arith.truncf %45 : vector<24x128xf32> to vector<24x128xbf16>
    %47 = vector.extract_strided_slice %40 {offsets = [0, 0], sizes = [24, 128], strides = [1, 1]} : vector<24x256xf32> to vector<24x128xf32>
    %48 = arith.truncf %47 : vector<24x128xf32> to vector<24x128xbf16>
    %cst_20 = arith.constant dense<0.000000e+00> : vector<24x24xf32>
    %49 = tpu.matmul %44, %46, %cst_20 {dimension_numbers = #tpu.dot_dimension_numbers<[1], [1], [0], [0], [0, 0, 1, 0], [], []>} : vector<24x128xbf16>, vector<24x128xbf16>, vector<24x24xf32> -> vector<24x24xf32>
    %c0_21 = arith.constant 0 : index
    %c0_22 = arith.constant 0 : index
    %50 = vector.load %arg6[%c0_21, %c0_22] : memref<1x24xf32, #tpu.memory_space<vmem>>, vector<1x24xf32>
    %51 = vector.broadcast %50 : vector<1x24xf32> to vector<24x24xf32>
    %52 = arith.addf %49, %51 : vector<24x24xf32>
    %cst_23 = arith.constant dense<0xFF800000> : vector<24xf32>
    %53 = vector.multi_reduction <maximumf>, %52, %cst_23 [1] : vector<24x24xf32> to vector<24xf32>
    %54 = vector.shape_cast %53 : vector<24xf32> to vector<24x1xf32>
    %55 = vector.broadcast %54 : vector<24x1xf32> to vector<24x24xf32>
    %56 = arith.subf %52, %55 : vector<24x24xf32>
    %57 = math.exp %56 : vector<24x24xf32>
    %cst_24 = arith.constant dense<0.000000e+00> : vector<24xf32>
    %58 = vector.multi_reduction <add>, %57, %cst_24 [1] : vector<24x24xf32> to vector<24xf32>
    %59 = vector.shape_cast %58 : vector<24xf32> to vector<24x1xf32>
    %60 = tpu.reciprocal %59 {approx = true} : vector<24x1xf32> -> vector<24x1xf32>
    %61 = vector.broadcast %60 : vector<24x1xf32> to vector<24x24xf32>
    %62 = arith.mulf %57, %61 : vector<24x24xf32>
    %63 = arith.truncf %62 : vector<24x24xf32> to vector<24x24xbf16>
    %cst_25 = arith.constant dense<0.000000e+00> : vector<24x128xf32>
    %64 = tpu.matmul %63, %48, %cst_25 {dimension_numbers = #tpu.dot_dimension_numbers<[1], [0], [0], [1], [0, 0, 1, 1], [], []>} : vector<24x24xbf16>, vector<24x128xbf16>, vector<24x128xf32> -> vector<24x128xf32>
    %c0_26 = arith.constant 0 : index
    %c0_27 = arith.constant 0 : index
    %65 = vector.load %arg25[%c0_26, %c0_27] : memref<24x256xf32, #tpu.memory_space<vmem>>, vector<24x128xf32>
    tpu.vector_store %arg25[%c0_26, %c0_27], %64 {strides = array<i32>} : memref<24x256xf32, #tpu.memory_space<vmem>>, vector<24x128xf32>,
    %66 = vector.extract_strided_slice %38 {offsets = [0, 128], sizes = [24, 128], strides = [1, 1]} : vector<24x256xf32> to vector<24x128xf32>
    %cst_28 = arith.constant 0.0883883461 : f32
    %67 = vector.broadcast %cst_28 : f32 to vector<24x128xf32>
    %68 = arith.mulf %66, %67 : vector<24x128xf32>
    %69 = arith.truncf %68 : vector<24x128xf32> to vector<24x128xbf16>
    %70 = vector.extract_strided_slice %39 {offsets = [0, 128], sizes = [24, 128], strides = [1, 1]} : vector<24x256xf32> to vector<24x128xf32>
    %71 = arith.truncf %70 : vector<24x128xf32> to vector<24x128xbf16>
    %72 = vector.extract_strided_slice %40 {offsets = [0, 128], sizes = [24, 128], strides = [1, 1]} : vector<24x256xf32> to vector<24x128xf32>
    %73 = arith.truncf %72 : vector<24x128xf32> to vector<24x128xbf16>
    %cst_29 = arith.constant dense<0.000000e+00> : vector<24x24xf32>
    %74 = tpu.matmul %69, %71, %cst_29 {dimension_numbers = #tpu.dot_dimension_numbers<[1], [1], [0], [0], [0, 0, 1, 0], [], []>} : vector<24x128xbf16>, vector<24x128xbf16>, vector<24x24xf32> -> vector<24x24xf32>
    %c0_30 = arith.constant 0 : index
    %c0_31 = arith.constant 0 : index
    %75 = vector.load %arg6[%c0_30, %c0_31] : memref<1x24xf32, #tpu.memory_space<vmem>>, vector<1x24xf32>
    %76 = vector.broadcast %75 : vector<1x24xf32> to vector<24x24xf32>
    %77 = arith.addf %74, %76 : vector<24x24xf32>
    %cst_32 = arith.constant dense<0xFF800000> : vector<24xf32>
    %78 = vector.multi_reduction <maximumf>, %77, %cst_32 [1] : vector<24x24xf32> to vector<24xf32>
    %79 = vector.shape_cast %78 : vector<24xf32> to vector<24x1xf32>
    %80 = vector.broadcast %79 : vector<24x1xf32> to vector<24x24xf32>
    %81 = arith.subf %77, %80 : vector<24x24xf32>
    %82 = math.exp %81 : vector<24x24xf32>
    %cst_33 = arith.constant dense<0.000000e+00> : vector<24xf32>
    %83 = vector.multi_reduction <add>, %82, %cst_33 [1] : vector<24x24xf32> to vector<24xf32>
    %84 = vector.shape_cast %83 : vector<24xf32> to vector<24x1xf32>
    %85 = tpu.reciprocal %84 {approx = true} : vector<24x1xf32> -> vector<24x1xf32>
    %86 = vector.broadcast %85 : vector<24x1xf32> to vector<24x24xf32>
    %87 = arith.mulf %82, %86 : vector<24x24xf32>
    %88 = arith.truncf %87 : vector<24x24xf32> to vector<24x24xbf16>
    %cst_34 = arith.constant dense<0.000000e+00> : vector<24x128xf32>
    %89 = tpu.matmul %88, %73, %cst_34 {dimension_numbers = #tpu.dot_dimension_numbers<[1], [0], [0], [1], [0, 0, 1, 1], [], []>} : vector<24x24xbf16>, vector<24x128xbf16>, vector<24x128xf32> -> vector<24x128xf32>
    %c0_35 = arith.constant 0 : index
    %c128 = arith.constant 128 : index
    %90 = vector.load %arg25[%c0_35, %c128] : memref<24x256xf32, #tpu.memory_space<vmem>>, vector<24x128xf32>
    tpu.vector_store %arg25[%c0_35, %c128], %89 {strides = array<i32>} : memref<24x256xf32, #tpu.memory_space<vmem>>, vector<24x128xf32>,
    %c0_36 = arith.constant 0 : index
    %c0_37 = arith.constant 0 : index
    %91 = vector.load %arg25[%c0_36, %c0_37] : memref<24x256xf32, #tpu.memory_space<vmem>>, vector<24x256xf32>
    %92 = arith.truncf %91 : vector<24x256xf32> to vector<24x256xbf16>
    %c0_38 = arith.constant 0 : index
    %c0_39 = arith.constant 0 : index
    %c0_40 = arith.constant 0 : index
    %93 = vector.load %arg13[%c0_38, %c0_39, %c0_40] : memref<1x256x256xbf16, #tpu.memory_space<vmem>>, vector<1x256x256xbf16>
    %94 = vector.shape_cast %93 : vector<1x256x256xbf16> to vector<256x256xbf16>
    %cst_41 = arith.constant dense<0.000000e+00> : vector<24x256xf32>
    %95 = tpu.matmul %92, %94, %cst_41 {dimension_numbers = #tpu.dot_dimension_numbers<[1], [0], [0], [1], [0, 0, 1, 1], [], []>} : vector<24x256xbf16>, vector<256x256xbf16>, vector<24x256xf32> -> vector<24x256xf32>
    %c0_42 = arith.constant 0 : index
    %c0_43 = arith.constant 0 : index
    %c0_44 = arith.constant 0 : index
    %96 = vector.load %arg14[%c0_42, %c0_43, %c0_44] : memref<1x1x256xf32, #tpu.memory_space<vmem>>, vector<1x1x256xf32>
    %97 = vector.shape_cast %96 : vector<1x1x256xf32> to vector<1x256xf32>
    %98 = vector.broadcast %97 : vector<1x256xf32> to vector<24x256xf32>
    %99 = arith.addf %95, %98 : vector<24x256xf32>
    %100 = arith.addf %3, %99 : vector<24x256xf32>
    %c0_45 = arith.constant 0 : index
    %c0_46 = arith.constant 0 : index
    %c0_47 = arith.constant 0 : index
    %101 = vector.load %arg15[%c0_45, %c0_46, %c0_47] : memref<1x1x256xf32, #tpu.memory_space<vmem>>, vector<1x1x256xf32>
    %102 = vector.shape_cast %101 : vector<1x1x256xf32> to vector<1x256xf32>
    %c0_48 = arith.constant 0 : index
    %c0_49 = arith.constant 0 : index
    %c0_50 = arith.constant 0 : index
    %103 = vector.load %arg16[%c0_48, %c0_49, %c0_50] : memref<1x1x256xf32, #tpu.memory_space<vmem>>, vector<1x1x256xf32>
    %104 = vector.shape_cast %103 : vector<1x1x256xf32> to vector<1x256xf32>
    %cst_51 = arith.constant dense<0.000000e+00> : vector<24xf32>
    %105 = vector.multi_reduction <add>, %100, %cst_51 [1] : vector<24x256xf32> to vector<24xf32>
    %106 = vector.shape_cast %105 : vector<24xf32> to vector<24x1xf32>
    %cst_52 = arith.constant 2.560000e+02 : f32
    %107 = vector.broadcast %cst_52 : f32 to vector<24x1xf32>
    %108 = arith.divf %106, %107 : vector<24x1xf32>
    %109 = vector.broadcast %108 : vector<24x1xf32> to vector<24x256xf32>
    %110 = arith.subf %100, %109 : vector<24x256xf32>
    %111 = arith.mulf %110, %110 : vector<24x256xf32>
    %cst_53 = arith.constant dense<0.000000e+00> : vector<24xf32>
    %112 = vector.multi_reduction <add>, %111, %cst_53 [1] : vector<24x256xf32> to vector<24xf32>
    %113 = vector.shape_cast %112 : vector<24xf32> to vector<24x1xf32>
    %cst_54 = arith.constant 2.560000e+02 : f32
    %114 = vector.broadcast %cst_54 : f32 to vector<24x1xf32>
    %115 = arith.divf %113, %114 : vector<24x1xf32>
    %116 = vector.broadcast %108 : vector<24x1xf32> to vector<24x256xf32>
    %117 = arith.subf %100, %116 : vector<24x256xf32>
    %cst_55 = arith.constant 9.99999997E-7 : f32
    %118 = vector.broadcast %cst_55 : f32 to vector<24x1xf32>
    %119 = arith.addf %115, %118 : vector<24x1xf32>
    %120 = math.rsqrt %119 : vector<24x1xf32>
    %121 = vector.broadcast %120 : vector<24x1xf32> to vector<24x256xf32>
    %122 = arith.mulf %117, %121 : vector<24x256xf32>
    %123 = vector.broadcast %102 : vector<1x256xf32> to vector<24x256xf32>
    %124 = arith.mulf %122, %123 : vector<24x256xf32>
    %125 = vector.broadcast %104 : vector<1x256xf32> to vector<24x256xf32>
    %126 = arith.addf %124, %125 : vector<24x256xf32>
    %127 = arith.truncf %126 : vector<24x256xf32> to vector<24x256xbf16>
    %c0_56 = arith.constant 0 : index
    %c0_57 = arith.constant 0 : index
    %c0_58 = arith.constant 0 : index
    %128 = vector.load %arg17[%c0_56, %c0_57, %c0_58] : memref<1x256x1024xbf16, #tpu.memory_space<vmem>>, vector<1x256x1024xbf16>
    %129 = vector.shape_cast %128 : vector<1x256x1024xbf16> to vector<256x1024xbf16>
    %cst_59 = arith.constant dense<0.000000e+00> : vector<24x1024xf32>
    %130 = tpu.matmul %127, %129, %cst_59 {dimension_numbers = #tpu.dot_dimension_numbers<[1], [0], [0], [1], [0, 0, 1, 1], [], []>} : vector<24x256xbf16>, vector<256x1024xbf16>, vector<24x1024xf32> -> vector<24x1024xf32>
    %c0_60 = arith.constant 0 : index
    %c0_61 = arith.constant 0 : index
    %c0_62 = arith.constant 0 : index
    %131 = vector.load %arg18[%c0_60, %c0_61, %c0_62] : memref<1x1x1024xf32, #tpu.memory_space<vmem>>, vector<1x1x1024xf32>
    %132 = vector.shape_cast %131 : vector<1x1x1024xf32> to vector<1x1024xf32>
    %133 = vector.broadcast %132 : vector<1x1024xf32> to vector<24x1024xf32>
    %134 = arith.addf %130, %133 : vector<24x1024xf32>
    %135 = arith.mulf %134, %134 : vector<24x1024xf32>
    %136 = arith.mulf %134, %135 : vector<24x1024xf32>
    %cst_63 = arith.constant 4.471500e-02 : f32
    %137 = vector.broadcast %cst_63 : f32 to vector<24x1024xf32>
    %138 = arith.mulf %137, %136 : vector<24x1024xf32>
    %139 = arith.addf %134, %138 : vector<24x1024xf32>
    %cst_64 = arith.constant 0.797884583 : f32
    %140 = vector.broadcast %cst_64 : f32 to vector<24x1024xf32>
    %141 = arith.mulf %140, %139 : vector<24x1024xf32>
    %142 = math.tanh %141 : vector<24x1024xf32>
    %cst_65 = arith.constant 1.000000e+00 : f32
    %143 = vector.broadcast %cst_65 : f32 to vector<24x1024xf32>
    %144 = arith.addf %143, %142 : vector<24x1024xf32>
    %cst_66 = arith.constant 5.000000e-01 : f32
    %145 = vector.broadcast %cst_66 : f32 to vector<24x1024xf32>
    %146 = arith.mulf %145, %144 : vector<24x1024xf32>
    %147 = arith.mulf %134, %146 : vector<24x1024xf32>
    %148 = arith.truncf %147 : vector<24x1024xf32> to vector<24x1024xbf16>
    %c0_67 = arith.constant 0 : index
    %c0_68 = arith.constant 0 : index
    %c0_69 = arith.constant 0 : index
    %149 = vector.load %arg19[%c0_67, %c0_68, %c0_69] : memref<1x1024x256xbf16, #tpu.memory_space<vmem>>, vector<1x1024x256xbf16>
    %150 = vector.shape_cast %149 : vector<1x1024x256xbf16> to vector<1024x256xbf16>
    %cst_70 = arith.constant dense<0.000000e+00> : vector<24x256xf32>
    %151 = tpu.matmul %148, %150, %cst_70 {dimension_numbers = #tpu.dot_dimension_numbers<[1], [0], [0], [1], [0, 0, 1, 1], [], []>} : vector<24x1024xbf16>, vector<1024x256xbf16>, vector<24x256xf32> -> vector<24x256xf32>
    %c0_71 = arith.constant 0 : index
    %c0_72 = arith.constant 0 : index
    %c0_73 = arith.constant 0 : index
    %152 = vector.load %arg20[%c0_71, %c0_72, %c0_73] : memref<1x1x256xf32, #tpu.memory_space<vmem>>, vector<1x1x256xf32>
    %153 = vector.shape_cast %152 : vector<1x1x256xf32> to vector<1x256xf32>
    %154 = vector.broadcast %153 : vector<1x256xf32> to vector<24x256xf32>
    %155 = arith.addf %151, %154 : vector<24x256xf32>
    %156 = arith.addf %100, %155 : vector<24x256xf32>
    %c0_74 = arith.constant 0 : index
    %c0_75 = arith.constant 0 : index
    %157 = vector.load %arg24[%c0_74, %c0_75] : memref<24x256xf32, #tpu.memory_space<vmem>>, vector<24x256xf32>
    tpu.vector_store %arg24[%c0_74, %c0_75], %156 {strides = array<i32>} : memref<24x256xf32, #tpu.memory_space<vmem>>, vector<24x256xf32>,
    %c1_i32 = arith.constant 1 : i32
    %158 = arith.cmpi eq, %arg0, %c1_i32 : i32
    %159 = arith.extui %158 : i1 to i32
    %c0_i32_76 = arith.constant 0 : i32
    %160 = arith.cmpi ne, %159, %c0_i32_76 : i32
    scf.if %160 {
      %c0_77 = arith.constant 0 : index
      %c0_78 = arith.constant 0 : index
      %161 = vector.load %arg21[%c0_77, %c0_78] : memref<1x256xf32, #tpu.memory_space<vmem>>, vector<1x256xf32>
      %c0_79 = arith.constant 0 : index
      %c0_80 = arith.constant 0 : index
      %162 = vector.load %arg22[%c0_79, %c0_80] : memref<1x256xf32, #tpu.memory_space<vmem>>, vector<1x256xf32>
      %cst_81 = arith.constant dense<0.000000e+00> : vector<24xf32>
      %163 = vector.multi_reduction <add>, %156, %cst_81 [1] : vector<24x256xf32> to vector<24xf32>
      %164 = vector.shape_cast %163 : vector<24xf32> to vector<24x1xf32>
      %cst_82 = arith.constant 2.560000e+02 : f32
      %165 = vector.broadcast %cst_82 : f32 to vector<24x1xf32>
      %166 = arith.divf %164, %165 : vector<24x1xf32>
      %167 = vector.broadcast %166 : vector<24x1xf32> to vector<24x256xf32>
      %168 = arith.subf %156, %167 : vector<24x256xf32>
      %169 = arith.mulf %168, %168 : vector<24x256xf32>
      %cst_83 = arith.constant dense<0.000000e+00> : vector<24xf32>
      %170 = vector.multi_reduction <add>, %169, %cst_83 [1] : vector<24x256xf32> to vector<24xf32>
      %171 = vector.shape_cast %170 : vector<24xf32> to vector<24x1xf32>
      %cst_84 = arith.constant 2.560000e+02 : f32
      %172 = vector.broadcast %cst_84 : f32 to vector<24x1xf32>
      %173 = arith.divf %171, %172 : vector<24x1xf32>
      %174 = vector.broadcast %166 : vector<24x1xf32> to vector<24x256xf32>
      %175 = arith.subf %156, %174 : vector<24x256xf32>
      %cst_85 = arith.constant 9.99999997E-7 : f32
      %176 = vector.broadcast %cst_85 : f32 to vector<24x1xf32>
      %177 = arith.addf %173, %176 : vector<24x1xf32>
      %178 = math.rsqrt %177 : vector<24x1xf32>
      %179 = vector.broadcast %178 : vector<24x1xf32> to vector<24x256xf32>
      %180 = arith.mulf %175, %179 : vector<24x256xf32>
      %181 = vector.broadcast %161 : vector<1x256xf32> to vector<24x256xf32>
      %182 = arith.mulf %180, %181 : vector<24x256xf32>
      %183 = vector.broadcast %162 : vector<1x256xf32> to vector<24x256xf32>
      %184 = arith.addf %182, %183 : vector<24x256xf32>
      %c0_86 = arith.constant 0 : index
      %c0_87 = arith.constant 0 : index
      %185 = vector.load %arg23[%c0_86, %c0_87] : memref<24x256xf32, #tpu.memory_space<vmem>>, vector<24x256xf32>
      tpu.vector_store %arg23[%c0_86, %c0_87], %184 {strides = array<i32>} : memref<24x256xf32, #tpu.memory_space<vmem>>, vector<24x256xf32>,
    } else {
    }
    return
  }
  func.func @transform_0(%arg0: i32) -> (i32, i32) {
    %c0_i32 = arith.constant 0 : i32
    %c0_i32_0 = arith.constant 0 : i32
    %c0_i32_1 = arith.constant 0 : i32
    return %c0_i32, %c0_i32_0 : i32, i32
  }
  func.func @transform_1(%arg0: i32) -> (i32, i32) {
    %c0_i32 = arith.constant 0 : i32
    %c0_i32_0 = arith.constant 0 : i32
    %c0_i32_1 = arith.constant 0 : i32
    return %c0_i32, %c0_i32_0 : i32, i32
  }
  func.func @transform_2(%arg0: i32) -> (i32, i32) {
    %c0_i32 = arith.constant 0 : i32
    %c0_i32_0 = arith.constant 0 : i32
    %c0_i32_1 = arith.constant 0 : i32
    return %c0_i32, %c0_i32_0 : i32, i32
  }
  func.func @transform_3(%arg0: i32) -> (i32, i32) {
    %c0_i32 = arith.constant 0 : i32
    %c0_i32_0 = arith.constant 0 : i32
    %c0_i32_1 = arith.constant 0 : i32
    return %c0_i32, %c0_i32_0 : i32, i32
  }
  func.func @transform_4(%arg0: i32) -> (i32, i32) {
    %c0_i32 = arith.constant 0 : i32
    %c0_i32_0 = arith.constant 0 : i32
    %c0_i32_1 = arith.constant 0 : i32
    return %c0_i32, %c0_i32_0 : i32, i32
  }
  func.func @transform_5(%arg0: i32) -> (i32, i32) {
    %c0_i32 = arith.constant 0 : i32
    %c0_i32_0 = arith.constant 0 : i32
    %c0_i32_1 = arith.constant 0 : i32
    return %c0_i32, %c0_i32_0 : i32, i32
  }
  func.func @transform_6(%arg0: i32) -> (i32, i32) {
    %c0_i32 = arith.constant 0 : i32
    %c0_i32_0 = arith.constant 0 : i32
    %c0_i32_1 = arith.constant 0 : i32
    return %c0_i32, %c0_i32_0 : i32, i32
  }
  func.func @transform_7(%arg0: i32) -> (i32, i32) {
    %c0_i32 = arith.constant 0 : i32
    %c0_i32_0 = arith.constant 0 : i32
    %c0_i32_1 = arith.constant 0 : i32
    return %c0_i32, %c0_i32_0 : i32, i32
  }
  func.func @transform_8(%arg0: i32) -> (i32, i32, i32) {
    %c0_i32 = arith.constant 0 : i32
    %c0_i32_0 = arith.constant 0 : i32
    %c0_i32_1 = arith.constant 0 : i32
    return %arg0, %c0_i32, %c0_i32_0 : i32, i32, i32
  }
  func.func @transform_9(%arg0: i32) -> (i32, i32, i32) {
    %c0_i32 = arith.constant 0 : i32
    %c0_i32_0 = arith.constant 0 : i32
    %c0_i32_1 = arith.constant 0 : i32
    return %arg0, %c0_i32, %c0_i32_0 : i32, i32, i32
  }
  func.func @transform_10(%arg0: i32) -> (i32, i32, i32) {
    %c0_i32 = arith.constant 0 : i32
    %c0_i32_0 = arith.constant 0 : i32
    %c0_i32_1 = arith.constant 0 : i32
    return %arg0, %c0_i32, %c0_i32_0 : i32, i32, i32
  }
  func.func @transform_11(%arg0: i32) -> (i32, i32, i32) {
    %c0_i32 = arith.constant 0 : i32
    %c0_i32_0 = arith.constant 0 : i32
    %c0_i32_1 = arith.constant 0 : i32
    return %arg0, %c0_i32, %c0_i32_0 : i32, i32, i32
  }
  func.func @transform_12(%arg0: i32) -> (i32, i32, i32) {
    %c0_i32 = arith.constant 0 : i32
    %c0_i32_0 = arith.constant 0 : i32
    %c0_i32_1 = arith.constant 0 : i32
    return %arg0, %c0_i32, %c0_i32_0 : i32, i32, i32
  }
  func.func @transform_13(%arg0: i32) -> (i32, i32, i32) {
    %c0_i32 = arith.constant 0 : i32
    %c0_i32_0 = arith.constant 0 : i32
    %c0_i32_1 = arith.constant 0 : i32
    return %arg0, %c0_i32, %c0_i32_0 : i32, i32, i32
  }
  func.func @transform_14(%arg0: i32) -> (i32, i32, i32) {
    %c0_i32 = arith.constant 0 : i32
    %c0_i32_0 = arith.constant 0 : i32
    %c0_i32_1 = arith.constant 0 : i32
    return %arg0, %c0_i32, %c0_i32_0 : i32, i32, i32
  }
  func.func @transform_15(%arg0: i32) -> (i32, i32, i32) {
    %c0_i32 = arith.constant 0 : i32
    %c0_i32_0 = arith.constant 0 : i32
    %c0_i32_1 = arith.constant 0 : i32
    return %arg0, %c0_i32, %c0_i32_0 : i32, i32, i32
  }
  func.func @transform_16(%arg0: i32) -> (i32, i32, i32) {
    %c0_i32 = arith.constant 0 : i32
    %c0_i32_0 = arith.constant 0 : i32
    %c0_i32_1 = arith.constant 0 : i32
    return %arg0, %c0_i32, %c0_i32_0 : i32, i32, i32
  }
  func.func @transform_17(%arg0: i32) -> (i32, i32, i32) {
    %c0_i32 = arith.constant 0 : i32
    %c0_i32_0 = arith.constant 0 : i32
    %c0_i32_1 = arith.constant 0 : i32
    return %arg0, %c0_i32, %c0_i32_0 : i32, i32, i32
  }
  func.func @transform_18(%arg0: i32) -> (i32, i32, i32) {
    %c0_i32 = arith.constant 0 : i32
    %c0_i32_0 = arith.constant 0 : i32
    %c0_i32_1 = arith.constant 0 : i32
    return %arg0, %c0_i32, %c0_i32_0 : i32, i32, i32
  }
  func.func @transform_19(%arg0: i32) -> (i32, i32, i32) {
    %c0_i32 = arith.constant 0 : i32
    %c0_i32_0 = arith.constant 0 : i32
    %c0_i32_1 = arith.constant 0 : i32
    return %arg0, %c0_i32, %c0_i32_0 : i32, i32, i32
  }
  func.func @transform_20(%arg0: i32) -> (i32, i32) {
    %c0_i32 = arith.constant 0 : i32
    %c0_i32_0 = arith.constant 0 : i32
    %c0_i32_1 = arith.constant 0 : i32
    return %c0_i32, %c0_i32_0 : i32, i32
  }
  func.func @transform_21(%arg0: i32) -> (i32, i32) {
    %c0_i32 = arith.constant 0 : i32
    %c0_i32_0 = arith.constant 0 : i32
    %c0_i32_1 = arith.constant 0 : i32
    return %c0_i32, %c0_i32_0 : i32, i32
  }
  func.func @transform_22(%arg0: i32) -> (i32, i32) {
    %c0_i32 = arith.constant 0 : i32
    %c0_i32_0 = arith.constant 0 : i32
    %c0_i32_1 = arith.constant 0 : i32
    return %c0_i32, %c0_i32_0 : i32, i32
  }
}

</mosaic_0001>

<bundles_post_ra>
// kernel: tpu_custom_call.1
= control target key start
LH: loop header
LB: loop body
LE: loop exit
PB: predicated region body
PF: predicated region fallthrough
CT: control target
= control target key end

     0   :  { %s10402_s0 = inlined_call_operand.hbm [shape: f32[24,192], index: 0, kind: input, shape index: {}]   ;;  %s10403_s1 = inlined_call_operand.hbm [shape: f32[1,192], index: 1, kind: input, shape index: {}]   ;;  %s10404_s2 = inlined_call_operand.hbm [shape: f32[1,192], index: 2, kind: input, shape index: {}]   ;;  %s10405_s3 = inlined_call_operand.vmem [shape: f32[24,1], index: 3, kind: input, shape index: {}]   ;;  %s10406_s4 = inlined_call_operand.hbm [shape: f32[24,256], index: 4, kind: input, shape index: {}]   ;;  %s10407_s5 = inlined_call_operand.vmem [shape: f32[1,24], index: 5, kind: input, shape index: {}]   ;;  %s10408_s6 = inlined_call_operand.hbm [shape: bf16[192,256], index: 6, kind: input, shape index: {}]   ;;  %s10409_s7 = inlined_call_operand.hbm [shape: f32[1,256], index: 7, kind: input, shape index: {}]   ;;  %s10410_s8 = inlined_call_operand.vmem [shape: f32[2,1,256], index: 8, kind: input, shape index: {}]   ;;  %s10411_s9 = inlined_call_operand.vmem [shape: f32[2,1,256], index: 9, kind: input, shape index: {}]   ;;  %s10412_s10 = inlined_call_operand.hbm [shape: bf16[2,256,768], index: 10, kind: input, shape index: {}]   ;;  %s10413_s11 = inlined_call_operand.hbm [shape: f32[2,1,768], index: 11, kind: input, shape index: {}]   ;;  %s10414_s12 = inlined_call_operand.hbm [shape: bf16[2,256,256], index: 12, kind: input, shape index: {}]   ;;  %s10415_s13 = inlined_call_operand.vmem [shape: f32[2,1,256], index: 13, kind: input, shape index: {}]   ;;  %s10416_s14 = inlined_call_operand.vmem [shape: f32[2,1,256], index: 14, kind: input, shape index: {}]   ;;  %s10417_s15 = inlined_call_operand.vmem [shape: f32[2,1,256], index: 15, kind: input, shape index: {}]   ;;  %s10418_s16 = inlined_call_operand.hbm [shape: bf16[2,256,1024], index: 16, kind: input, shape index: {}]   ;;  %s10419_s17 = inlined_call_operand.vmem [shape: f32[2,1,1024], index: 17, kind: input, shape index: {}]   ;;  %s10420_s18 = inlined_call_operand.hbm [shape: bf16[2,1024,256], index: 18, kind: input, shape index: {}]   ;;  %s10421_s19 = inlined_call_operand.vmem [shape: f32[2,1,256], index: 19, kind: input, shape index: {}]   ;;  %s10422_s20 = inlined_call_operand.vmem [shape: f32[1,256], index: 20, kind: input, shape index: {}]   ;;  %s10423_s21 = inlined_call_operand.hbm [shape: f32[1,256], index: 21, kind: input, shape index: {}]   ;;  %s10424_s22 = inlined_call_operand.hbm [shape: f32[24,256], index: 22, kind: output, shape index: {}]  }
   0x1   :  { %10441 = sst [smem:[#allocation35_spill]] %s10402_s0 }
   0x2   :  { %10442 = sst [smem:[#allocation36_spill]] %s10403_s1 }
   0x3   :  { %10443 = sst [smem:[#allocation37_spill]] %s10404_s2 }
   0x4   :  { %10444 = sst [smem:[#allocation38_spill]] %s10405_s3 }
   0x5   :  { %10445 = sst [smem:[#allocation39_spill]] %s10406_s4 }
   0x6   :  { %10446 = sst [smem:[#allocation40_spill]] %s10407_s5 }
   0x7   :  { %10447 = sst [smem:[#allocation41_spill]] %s10408_s6 }
   0x8   :  { %10448 = sst [smem:[#allocation42_spill]] %s10409_s7 }
   0x9   :  { %10449 = sst [smem:[#allocation43_spill]] %s10410_s8 }
   0xa   :  { %10450 = sst [smem:[#allocation44_spill]] %s10411_s9 }
   0xb   :  { %10451 = sst [smem:[#allocation45_spill]] %s10412_s10 }
   0xc   :  { %10452 = sst [smem:[#allocation46_spill]] %s10413_s11 }
   0xd   :  { %10453 = sst [smem:[#allocation47_spill]] %s10414_s12 }
   0xe   :  { %10454 = sst [smem:[#allocation48_spill]] %s10415_s13 }
   0xf   :  { %10455 = sst [smem:[#allocation49_spill]] %s10416_s14 }
  0x10   :  { %10456 = sst [smem:[#allocation50_spill]] %s10417_s15 }
  0x11   :  { %10457 = sst [smem:[#allocation51_spill]] %s10418_s16 }
  0x12   :  { %10458 = sst [smem:[#allocation52_spill]] %s10419_s17 }
  0x13   :  { %10459 = sst [smem:[#allocation53_spill]] %s10420_s18 }
  0x14   :  { %10460 = sst [smem:[#allocation54_spill]] %s10421_s19 }
  0x15   :  { %10461 = sst [smem:[#allocation55_spill]] %s10422_s20 }
  0x16   :  { %10462 = sst [smem:[#allocation56_spill]] %s10424_s22 }
  0x17   :  { %27 = vsyncpa [#allocation5], 0 }
  0x18   :  { %28 = vsyncpa [#allocation8], 0 }
  0x19   :  { %29 = vsyncpa [#allocation11], 0 }
  0x1a   :  { %30 = vsyncpa [#allocation14], 0 }
  0x1b   :  { %31 = vsyncpa [#allocation6], 0  ;;  %s8599_s3 = smov 0   ;;  %s8601_s28 = smov 0  }
  0x1c   :  { %s8603_s29 = smov 0   ;;  %s8605_s30 = smov 0  }
  0x1d LB: > { %10463 = sst [smem:[#allocation29_spill]] %s8454_s28  ;;  %s8621_s5 = sadd.s32 4294967295, %s8462_s30   ;;  %s8462_s30 = sphi %s8605_s30, %s10511_s30   ;;  %s8458_s29 = sphi %s8603_s29, %s10514_s29   ;;  %s8454_s28 = sphi %s8601_s28, %s10513_s28   ;;  %s8450_s3 = sphi %s8599_s3, %s10512_s3  }
  0x1e   : > { %10464 = sst [smem:[#allocation30_spill]] %s8458_s29  ;;  %p5665_p0 = scmp.ge.s32.totalorder %s8462_s30, 1 }
  0x1f   : > { %s10465_s23 = sld [smem:[#allocation35_spill]]  ;;  %p278_p1 = scmp.eq.s32.totalorder %s8621_s5, 0 }
  0x20   : > { %10466 = sst [smem:[#allocation31_spill]] %s8621_s5  ;;  %p585_p2 = scmp.lt.s32.totalorder %s8462_s30, 3 }
  0x21   : > { %p5666_p3 = scmp.ne.s32.totalorder %s8621_s5, 0  ;;  %s8464_s6 = smov [#allocation4]  }
  0x22   : > { %p8627_p4 = pnand %p5665_p0, %p585_p2  ;;  %s598_s25 = sshll.u32 %s8464_s6, 4  ;;  %s599_s25 = int_to_ptr.vmem [resolvable:$true] %s598_s25 }
  0x23   : > { %s10427_s2 = smov 256   ;;  %s10428_s27 = smov 16  }
  0x24   : > { %p7807_p5 = pneg %p8627_p4  ;;  %s8645_s4 = sadd.s32 1, %s8462_s30  }
  0x25   : > { %s596_s1 = sshll.u32 %s10465_s23, 4  ;;  %10469 = sst [smem:[#allocation32_spill]] %s8645_s4  ;;  %s597_s1 = int_to_ptr.hbm [resolvable:$true] %s596_s1 }
  0x26   : > { %p8635_p6 = pnand %p7807_p5, %p278_p1  ;;  %s261_s0 = ssub.s32 %s8462_s30, %s8645_s4 }
  0x27   : > { %s264_s23 = sadd.s32 1, %s8458_s29  ;;  %p262_p7 = scmp.eq.s32.totalorder %s261_s0, 0 }
  0x28   : > { %7810 = dma.hbm_to_vmem [thread:$0]  (!%p8635_p6), %s597_s1, 768, %s599_s25, [#allocation5], %s10427_s2, %s10427_s2, %s10428_s27  }
  0x29   : > { %p271_p8 = scmp.ne.s32.totalorder %s8458_s29, %s8454_s28  ;;  %p272_p9 = scmp.eq.s32.totalorder %s8462_s30, 0 }
  0x2a   : > { %p277_p10 = scmp.ne.s32.totalorder %s8454_s28, %s8450_s3  ;;  %p7852_p13 = scmp.lt.s32.totalorder %s8462_s30, 2 }
  0x2b   : > { %s8655_s6 = scalar_select %p262_p7, %s8458_s29, %s264_s23  }
  0x2c   : > { %p273_p11 = por %p272_p9, %p271_p8  ;;  %p8659_p12 = por %p278_p1, %p277_p10 }
  0x2d   : > { %10470 = sst [smem:[#allocation33_spill]] %s8655_s6  ;;  %s711_s1 = sand.u32 1, %s8462_s30  }
  0x2e   : > { %s10471_s22 = scalar_select %p8659_p12, 1, 0 }
  0x2f   : > { %s8666_s25 = sand.u32 1, %s8458_s29   ;;  %p8669_p0 = pnand %p7852_p13, %p273_p11 }
  0x30   : > { %10472 = sst [smem:[#allocation34_spill]] %s10471_s22  ;;  %s7759_s2 = smul.u32 768, %s8666_s25 }
  0x31   : > { %s7760_s3 = smul.u32 768, %s8462_s30  ;;  %s10474_s10 = sld [smem:[#allocation45_spill]] }
  0x32   : > { %s715_s4 = scalar_lea.vmem [#allocation15], %s7759_s2  ;;  %s8677_s17 = scalar_lea.sflag [#allocation5], %s711_s1 }
  0x33   : > { %s723_s20 = sshll.u32 %s715_s4, 4  ;;  %p8681_p5 = pneg %p8669_p0  ;;  %s724_s20 = int_to_ptr.vmem [resolvable:$true] %s723_s20 }
  0x37   : > { %s720_s6 = scalar_lea.hbm %s10474_s10, %s7760_s3 }
  0x38   : > { %s721_s19 = sshll.u32 %s720_s6, 4  ;;  %s8053_s6 = scalar_lea.hbm %s10474_s10, 1536  ;;  %s722_s19 = int_to_ptr.hbm [resolvable:$true] %s721_s19 }
  0x39   : > { %s8046_s29 = sshra.s32 %s722_s19, 4  ;;  %s8047_s29 = int_to_ptr.hbm [resolvable:$true] %s8046_s29 }
  0x3a   : > { %s8048_s15 = scalar_lea.hbm %s8047_s29, 768  ;;  %p8054_p9 = scmp.lt.s32.totalorder %s8047_s29, %s10474_s10 }
  0x3b   : > { %p8049_p2 = scmp.ne.s32.totalorder %s8047_s29, %s8048_s15  ;;  %p8055_p10 = scmp.lt.s32.totalorder %s8053_s6, %s8048_s15 }
  0x3d   : > { %p8051_p7 = pnand %p8681_p5, %p8049_p2  ;;  %p8056_p11 = por %p8055_p10, %p8054_p9 }
  0x3f   : > { %p8052_p8 = pneg %p8051_p7 }
  0x41   : > { %p8057_p13 = pnand %p8056_p11, %p8052_p8 }
  0x43   : > { %8060 = shalt.err (!%p8057_p13)
}
  0x44   : > { %s8467_s0 = smov 384   ;;  %s8468_s23 = smov 24  }
  0x45   : > { %7832 = dma.hbm_to_vmem [thread:$0]  (!%p8669_p0), %s722_s19, 12288, %s724_s20, %s8677_s17, %s8467_s0, %s8467_s0, %s8468_s23  }
  0x46   : > { %s7761_s13 = smul.u32 6, %s8666_s25  ;;  %s10476_s4 = sld [smem:[#allocation36_spill]] }
  0x47   : > { %s7762_s3 = smul.u32 6, %s8462_s30  ;;  %s10477_s11 = sld [smem:[#allocation46_spill]] }
  0x48   : > { %s737_s1 = scalar_lea.vmem [#allocation16], %s7761_s13  ;;  %s8469_s28 = smov [#allocation7]  }
  0x49   : > { %s745_s10 = sshll.u32 %s737_s1, 4  ;;  %s613_s5 = sshll.u32 %s8469_s28, 4  ;;  %s746_s10 = int_to_ptr.vmem [resolvable:$true] %s745_s10  ;;  %s614_s5 = int_to_ptr.vmem [resolvable:$true] %s613_s5 }
  0x4c   : > { %s611_s8 = sshll.u32 %s10476_s4, 4  ;;  %s612_s8 = int_to_ptr.hbm [resolvable:$true] %s611_s8 }
  0x4d   : > { %s741_s6 = scalar_lea.hbm %s10477_s11, %s7762_s3  ;;  %s8083_s23 = scalar_lea.hbm %s10477_s11, 12 }
  0x4e   : > { %s743_s22 = sshll.u32 %s741_s6, 4  ;;  %s744_s22 = int_to_ptr.hbm [resolvable:$true] %s743_s22 }
  0x4f   : > { %s8076_s19 = sshra.s32 %s744_s22, 4  ;;  %s8077_s19 = int_to_ptr.hbm [resolvable:$true] %s8076_s19 }
  0x50   : > { %s8078_s20 = scalar_lea.hbm %s8077_s19, 6  ;;  %p8084_p9 = scmp.lt.s32.totalorder %s8077_s19, %s10477_s11 }
  0x51   : > { %p8079_p2 = scmp.ne.s32.totalorder %s8077_s19, %s8078_s20  ;;  %p8085_p10 = scmp.lt.s32.totalorder %s8083_s23, %s8078_s20 }
  0x53   : > { %p8081_p7 = pnand %p8079_p2, %p8681_p5  ;;  %p8086_p11 = por %p8085_p10, %p8084_p9 }
  0x55   : > { %p8082_p8 = pneg %p8081_p7 }
  0x57   : > { %p8087_p13 = pnand %p8086_p11, %p8082_p8 }
  0x59   : > { %8090 = shalt.err (!%p8087_p13)
}
  0x5a   : > { %7835 = dma.hbm_to_vmem [thread:$0]  (!%p8669_p0), %s744_s22, 96, %s746_s10, %s8677_s17  }
  0x5b   : > { %7813 = dma.hbm_to_vmem [thread:$0]  (!%p8635_p6), %s612_s8, 32, %s614_s5, [#allocation8]  }
  0x5c   : > { %s5675_s13 = sshll.u32 %s8666_s25, 8  ;;  %s7348_s28 = sshll.u32 %s8462_s30, 8 }
  0x5d   : > { %s10478_s12 = sld [smem:[#allocation47_spill]]  ;;  %s756_s6 = scalar_lea.vmem [#allocation17], %s5675_s13 }
  0x5e   : > { %s764_s1 = sshll.u32 %s756_s6, 4  ;;  %s10479_s0 = sld [smem:[#allocation37_spill]]  ;;  %s765_s1 = int_to_ptr.vmem [resolvable:$true] %s764_s1 }
  0x63   : > { %s761_s29 = scalar_lea.hbm %s10478_s12, %s7348_s28  ;;  %s8143_s2 = scalar_lea.hbm %s10478_s12, 512 }
  0x64   : > { %s762_s19 = sshll.u32 %s761_s29, 4  ;;  %s623_s23 = sshll.u32 %s10479_s0, 4  ;;  %s763_s19 = int_to_ptr.hbm [resolvable:$true] %s762_s19  ;;  %s624_s23 = int_to_ptr.hbm [resolvable:$true] %s623_s23 }
  0x65   : > { %s8136_s10 = sshra.s32 %s763_s19, 4  ;;  %s8137_s10 = int_to_ptr.hbm [resolvable:$true] %s8136_s10 }
  0x66   : > { %s8138_s22 = scalar_lea.hbm %s8137_s10, 256  ;;  %p8144_p9 = scmp.lt.s32.totalorder %s8137_s10, %s10478_s12 }
  0x67   : > { %p8139_p2 = scmp.ne.s32.totalorder %s8137_s10, %s8138_s22  ;;  %p8145_p10 = scmp.lt.s32.totalorder %s8143_s2, %s8138_s22 }
  0x69   : > { %p8141_p7 = pnand %p8139_p2, %p8681_p5  ;;  %p8146_p11 = por %p8145_p10, %p8144_p9 }
  0x6b   : > { %p8142_p8 = pneg %p8141_p7 }
  0x6d   : > { %p8147_p13 = pnand %p8146_p11, %p8142_p8 }
  0x6f   : > { %8150 = shalt.err (!%p8147_p13)
}
  0x70   : > { %s10437_s28 = smov 128   ;;  %s10439_s3 = smov 8  }
  0x71   : > { %7838 = dma.hbm_to_vmem [thread:$0]  (!%p8669_p0), %s763_s19, 4096, %s765_s1, %s8677_s17, %s10437_s28, %s10437_s28, %s10439_s3  }
  0x72   : > { %s8472_s15 = smov [#allocation9]   ;;  %s10480_s9 = sld [smem:[#allocation39_spill]] }
  0x73   : > { %s625_s29 = sshll.u32 %s8472_s15, 4  ;;  %s5678_s10 = sshll.u32 %s8666_s25, 10  ;;  %s626_s29 = int_to_ptr.vmem [resolvable:$true] %s625_s29 }
  0x74   : > { %7816 = dma.hbm_to_vmem [thread:$0]  (!%p8635_p6), %s624_s23, 32, %s626_s29, [#allocation8]  }
  0x75   : > { %s8473_s22 = smov [#allocation10]   ;;  %s7349_s5 = sshll.u32 %s8462_s30, 10 }
  0x76   : > { %s639_s8 = sshll.u32 %s8473_s22, 4  ;;  %s10481_s2 = smov 16   ;;  %s640_s8 = int_to_ptr.vmem [resolvable:$true] %s639_s8 }
  0x77   : > { %s10482_s1 = smov 256   ;;  %s10483_s16 = sld [smem:[#allocation51_spill]] }
  0x78   : > { %s637_s0 = sshll.u32 %s10480_s9, 4  ;;  %s799_s15 = scalar_lea.vmem [#allocation18], %s5678_s10  ;;  %s638_s0 = int_to_ptr.hbm [resolvable:$true] %s637_s0 }
  0x79   : > { %7819 = dma.hbm_to_vmem [thread:$0]  (!%p8635_p6), %s638_s0, 768, %s640_s8, [#allocation11], %s10482_s1, %s10482_s1, %s10481_s2  }
  0x7a   : > { %s807_s6 = sshll.u32 %s799_s15, 4  ;;  %s10484_s9 = sld [smem:[#allocation41_spill]]  ;;  %s808_s6 = int_to_ptr.vmem [resolvable:$true] %s807_s6 }
  0x7d   : > { %s804_s13 = scalar_lea.hbm %s10483_s16, %s7349_s5  ;;  %s8233_s2 = scalar_lea.hbm %s10483_s16, 2048 }
  0x7e   : > { %s805_s23 = sshll.u32 %s804_s13, 4  ;;  %s806_s23 = int_to_ptr.hbm [resolvable:$true] %s805_s23 }
  0x7f   : > { %s8226_s28 = sshra.s32 %s806_s23, 4  ;;  %s8227_s28 = int_to_ptr.hbm [resolvable:$true] %s8226_s28 }
  0x80   : > { %s654_s22 = sshll.u32 %s10484_s9, 4  ;;  %s8228_s3 = scalar_lea.hbm %s8227_s28, 1024  ;;  %s655_s22 = int_to_ptr.hbm [resolvable:$true] %s654_s22 }
  0x81   : > { %p8229_p2 = scmp.ne.s32.totalorder %s8227_s28, %s8228_s3  ;;  %p8234_p9 = scmp.lt.s32.totalorder %s8227_s28, %s10483_s16 }
  0x82   : > { %p8235_p10 = scmp.lt.s32.totalorder %s8233_s2, %s8228_s3 }
  0x83   : > { %p8231_p7 = pnand %p8229_p2, %p8681_p5 }
  0x84   : > { %p8236_p11 = por %p8235_p10, %p8234_p9 }
  0x85   : > { %p8232_p8 = pneg %p8231_p7 }
  0x87   : > { %p8237_p13 = pnand %p8236_p11, %p8232_p8 }
  0x89   : > { %8240 = shalt.err (!%p8237_p13)
}
  0x8a   : > { %s8474_s4 = smov 512   ;;  %s8475_s13 = smov 32  }
  0x8b   : > { %7841 = dma.hbm_to_vmem [thread:$0]  (!%p8669_p0), %s806_s23, 16384, %s808_s6, %s8677_s17, %s8474_s4, %s8474_s4, %s8475_s13  }
  0x8c   : > { %s8476_s15 = smov [#allocation12]   ;;  %s10485_s7 = sld [smem:[#allocation42_spill]] }
  0x8d   : > { %s656_s29 = sshll.u32 %s8476_s15, 4  ;;  %s10486_s3 = smov 8   ;;  %s657_s29 = int_to_ptr.vmem [resolvable:$true] %s656_s29 }
  0x8e   : > { %s10487_s0 = smov 128   ;;  %s684_s6 = sshll.u32 %s10423_s21, 4  ;;  %s685_s6 = int_to_ptr.hbm [resolvable:$true] %s684_s6 }
  0x8f   : > { %7822 = dma.hbm_to_vmem [thread:$0]  (!%p8635_p6), %s655_s22, 3072, %s657_s29, [#allocation11], %s10487_s0, %s10487_s0, %s10486_s3  }
  0x90   : > { %s8477_s23 = smov [#allocation13]   ;;  %s8478_s19 = smov [#allocation20]  }
  0x91   : > { %s671_s1 = sshll.u32 %s8477_s23, 4  ;;  %s686_s4 = sshll.u32 %s8478_s19, 4  ;;  %s672_s1 = int_to_ptr.vmem [resolvable:$true] %s671_s1  ;;  %s687_s4 = int_to_ptr.vmem [resolvable:$true] %s686_s4 }
  0x92   : > { %s669_s28 = sshll.u32 %s10485_s7, 4  ;;  %s10488_s18 = sld [smem:[#allocation53_spill]]  ;;  %s670_s28 = int_to_ptr.hbm [resolvable:$true] %s669_s28 }
  0x93   : > { %7825 = dma.hbm_to_vmem [thread:$0]  (!%p8635_p6), %s670_s28, 32, %s672_s1, [#allocation14]  }
  0x94   : > { %7828 = dma.hbm_to_vmem [thread:$0]  (!%p8635_p6), %s685_s6, 32, %s687_s4, [#allocation8]  }
  0x95   : > { %s828_s29 = scalar_lea.vmem [#allocation19], %s5678_s10 }
  0x96   : > { %s836_s9 = sshll.u32 %s828_s29, 4  ;;  %s837_s9 = int_to_ptr.vmem [resolvable:$true] %s836_s9 }
  0x98   : > { %s833_s20 = scalar_lea.hbm %s10488_s18, %s7349_s5  ;;  %s8353_s23 = scalar_lea.hbm %s10488_s18, 2048 }
  0x99   : > { %s834_s22 = sshll.u32 %s833_s20, 4  ;;  %s835_s22 = int_to_ptr.hbm [resolvable:$true] %s834_s22 }
  0x9a   : > { %s8346_s8 = sshra.s32 %s835_s22, 4  ;;  %s8347_s8 = int_to_ptr.hbm [resolvable:$true] %s8346_s8 }
  0x9b   : > { %s8348_s2 = scalar_lea.hbm %s8347_s8, 1024  ;;  %p8354_p6 = scmp.lt.s32.totalorder %s8347_s8, %s10488_s18 }
  0x9c   : > { %p8349_p2 = scmp.ne.s32.totalorder %s8347_s8, %s8348_s2  ;;  %p8355_p9 = scmp.lt.s32.totalorder %s8353_s23, %s8348_s2 }
  0x9e   : > { %p8351_p7 = pnand %p8349_p2, %p8681_p5  ;;  %p8356_p10 = por %p8355_p9, %p8354_p6 }
  0xa0   : > { %p8352_p8 = pneg %p8351_p7 }
  0xa2   : > { %p8357_p11 = pnand %p8356_p10, %p8352_p8 }
  0xa4   : > { %8360 = shalt.err (!%p8357_p11)
}
  0xa5   : > { %7844 = dma.hbm_to_vmem [thread:$0]  (!%p8669_p0), %s835_s22, 16384, %s837_s9, %s8677_s17, %s10487_s0, %s10487_s0, %s10486_s3  }
  0xa6   : > { %855 = sbr.rel (%p8627_p4) target bundleno = 2625 (0xa41), region = 108  ;;  %s10489_s14 = sld [smem:[#allocation31_spill]] (!%p8627_p4) }
  0xab   : > { %8421 = dma.done.wait (%p278_p1), [#allocation5], 768  }
  0xac   : > { %8423 = vsyncadd (%p278_p1), [#allocation5], 4294966528 }
  0xad   : > { %8425 = dma.done.wait (%p278_p1), [#allocation8], 64  }
  0xae   : > { %8427 = vsyncadd (%p278_p1), [#allocation8], 4294967232 }
  0xaf   : > { %8429 = dma.done.wait (%p278_p1), [#allocation11], 3840  }
  0xb0   : > { %8431 = vsyncadd (%p278_p1), [#allocation11], 4294963456 }
  0xb1   : > { %8433 = dma.done.wait (%p278_p1), [#allocation14], 32  }
  0xb2   : > { %8435 = vsyncadd (%p278_p1), [#allocation14], 4294967264  ;;  %s10490_s17 = sld [smem:[#allocation29_spill]]  ;;  %s887_s27 = sand.u32 1, %s10489_s14  }
  0xb3   : > { %s888_s3 = scalar_lea.sflag [#allocation5], %s887_s27 }
  0xb8   : > { %s889_s25 = sand.u32 1, %s10490_s17  }
  0xb9   : > { %s7763_s10 = smul.u32 768, %s889_s25 }
  0xbb   : > { %s8828_s0 = scalar_lea.vmem [#allocation15], %s7763_s10 }
  0xbc   : > { %8437 = dma.done.wait (%p8659_p12), %s888_s3, 49248  }
  0xbd   : > { %8439 = vsyncadd (%p8659_p12), %s888_s3, 4294918048  ;;  %s7764_s6 = smul.u32 6, %s889_s25  ;;  %s5691_s1 = sshll.u32 %s889_s25, 8 }
  0xbe   : > { %s5692_s19 = sshll.u32 %s889_s25, 10  ;;  %s8836_s13 = scalar_lea.vmem [#allocation17], %s5691_s1 }
  0xbf   : > { %s8834_s4 = scalar_lea.vmem [#allocation16], %s7764_s6  ;;  %s8838_s15 = scalar_lea.vmem [#allocation18], %s5692_s19 }
  0xc0   : > { %s8840_s20 = scalar_lea.vmem [#allocation19], %s5692_s19 }
  0xc1   : > { %8441 = dma.done.wait (%p278_p1), [#allocation8], 32  }
  0xc2   : > { %8443 = vsyncadd (%p278_p1), [#allocation8], 4294967264  ;;  %p1041_p4 = scmp.lt.s32.totalorder %s10489_s14, 1  ;;  %s10492_s30 = sld [smem:[#allocation43_spill]] }
  0xc3   : > { %s10493_s26 = sld [smem:[#allocation44_spill]] }
  0xc4   : > { %s1042_s22 = scalar_select %p1041_p4, %s10489_s14, 1 }
  0xc5   : > { %s10494_s25 = sld [smem:[#allocation48_spill]] }
  0xc6   : > { %s8848_s29 = sshll.u32 %s1042_s22, 1  ;;  %s5700_s9 = sshll.u32 %s1042_s22, 3 }
  0xc7   : > { %s10495_s1 = sld [smem:[#allocation49_spill]] }
  0xc8   : > { %s1044_s28 = scalar_lea.vmem %s10492_s30, %s8848_s29  ;;  %s10496_s12 = sld [smem:[#allocation50_spill]] }
  0xc9   : > { %s1048_s17 = scalar_lea.vmem %s10493_s26, %s8848_s29  ;;  %s10497_s8 = sld [smem:[#allocation52_spill]] }
  0xca   : > { %s10498_s5 = sld [smem:[#allocation54_spill]] }
  0xcb   : > { %s1052_s10 = scalar_lea.vmem %s10494_s25, %s8848_s29 }
  0xcc   : > { %1073 = sbr.rel (%p5666_p3) target bundleno = 401 (0x191), region = 160 }
  0xcd   : > { %s1056_s19 = scalar_lea.vmem %s10495_s1, %s8848_s29 }
  0xce   : > { %s1060_s22 = scalar_lea.vmem %s10496_s12, %s8848_s29  ;;  %s10499_s12 = sld [smem:[#allocation38_spill]] (!%p5666_p3) }
  0xcf   : > { %s8873_s2 = scalar_lea.vmem %s10497_s8, %s5700_s9 }
  0xd0   : > { %s1068_s26 = scalar_lea.vmem %s10498_s5, %s8848_s29 }
  0xd1   : > { %v5761_v0 = vld [vmem:[#allocation12 + $0x70] sm:$0xf]  ;;  %v7366_v1 = vld [vmem:[#allocation12 + $0x74] sm:$0xf0]  ;;  %v7365_v2 = vld [vmem:[#allocation12 + $0x74] sm:$0xf] }
  0xd2   : > { %v5762_v3 = vor.u32 %v7366_v1, %v5761_v0  ;;  %v5763_v4 = vld [vmem:[#allocation12 + $0x78] sm:$0xf0]  ;;  %v5753_v5 = vld [vmem:[#allocation12 + $0x60] sm:$0xf]  ;;  %v7364_v6 = vld [vmem:[#allocation12 + $0x64] sm:$0xf0] }
  0xd3   : > { %v5766_v7 = vor.u32 %v7365_v2, %v5763_v4  ;;  %v7363_v8 = vld [vmem:[#allocation12 + $0x64] sm:$0xf]  ;;  %v5755_v9 = vld [vmem:[#allocation12 + $0x68] sm:$0xf0]  ;;  %v5754_v10 = vor.u32 %v7364_v6, %v5753_v5  ;;  %v5745_v11 = vld [vmem:[#allocation12 + $0x50] sm:$0xf] }
  0xd4   : > { %1265 = vmatpush.bf16.msra.mxu0 %v5762_v3  ;;  %v5758_v12 = vor.u32 %v7363_v8, %v5755_v9  ;;  %v7362_v13 = vld [vmem:[#allocation12 + $0x54] sm:$0xf0]  ;;  %v7373_v14 = vld [vmem:[#allocation12 + $0xb4] sm:$0xf]  ;;  %v5795_v15 = vld [vmem:[#allocation12 + $0xb8] sm:$0xf0] }
  0xd5   : > { %1301 = vmatpush.bf16.msra.mxu2 %v5766_v7  ;;  %v7361_v16 = vld [vmem:[#allocation12 + $0x54] sm:$0xf]  ;;  %v5747_v17 = vld [vmem:[#allocation12 + $0x58] sm:$0xf0]  ;;  %v5798_v18 = vor.u32 %v7373_v14, %v5795_v15  ;;  %v7371_v19 = vld [vmem:[#allocation12 + $0xa4] sm:$0xf]  ;;  %v5746_v22 = vor.u32 %v7362_v13, %v5745_v11 }
  0xd6   : > { %v5787_v20 = vld [vmem:[#allocation12 + $0xa8] sm:$0xf0]  ;;  %v5793_v21 = vld [vmem:[#allocation12 + $0xb0] sm:$0xf]  ;;  %v5737_v23 = vld [vmem:[#allocation12 + $0x40] sm:$0xf]  ;;  %v5750_v27 = vor.u32 %v7361_v16, %v5747_v17 }
  0xd7   : > { %1323 = vmatpush.bf16.msra.mxu3 %v5798_v18  ;;  %v7360_v24 = vld [vmem:[#allocation12 + $0x44] sm:$0xf0]  ;;  %v5790_v25 = vor.u32 %v7371_v19, %v5787_v20  ;;  %v7374_v26 = vld [vmem:[#allocation12 + $0xb4] sm:$0xf0]  ;;  %v7359_v28 = vld [vmem:[#allocation12 + $0x44] sm:$0xf] }
  0xd8   : > { %1266 = vmatpush.bf16.msra.mxu0 %v5754_v10  ;;  %v5739_v29 = vld [vmem:[#allocation12 + $0x48] sm:$0xf0]  ;;  %v5794_v30 = vor.u32 %v7374_v26, %v5793_v21  ;;  %v7369_v31 = vld [vmem:[#allocation12 + $0x94] sm:$0xf]  ;;  %v5779_v32 = vld [vmem:[#allocation12 + $0x98] sm:$0xf0]  ;;  %v5738_v36 = vor.u32 %v7360_v24, %v5737_v23 }
  0xd9   : > { %1302 = vmatpush.bf16.msra.mxu2 %v5758_v12  ;;  %v5785_v33 = vld [vmem:[#allocation12 + $0xa0] sm:$0xf]  ;;  %v7372_v34 = vld [vmem:[#allocation12 + $0xa4] sm:$0xf0]  ;;  %v5729_v37 = vld [vmem:[#allocation12 + $0x30] sm:$0xf]  ;;  %v5782_v39 = vor.u32 %v7369_v31, %v5779_v32  ;;  %v5742_v41 = vor.u32 %v7359_v28, %v5739_v29 }
  0xda   : > { %1287 = vmatpush.bf16.msra.mxu1 %v5794_v30  ;;  %v5786_v35 = vor.u32 %v7372_v34, %v5785_v33  ;;  %v7358_v38 = vld [vmem:[#allocation12 + $0x34] sm:$0xf0]  ;;  %v7367_v40 = vld [vmem:[#allocation12 + $0x84] sm:$0xf]  ;;  %v5771_v42 = vld [vmem:[#allocation12 + $0x88] sm:$0xf0] }
  0xdb   : > { %1324 = vmatpush.bf16.msra.mxu3 %v5790_v25  ;;  %v5777_v43 = vld [vmem:[#allocation12 + $0x90] sm:$0xf]  ;;  %v7370_v44 = vld [vmem:[#allocation12 + $0x94] sm:$0xf0]  ;;  %v7357_v45 = vld [vmem:[#allocation12 + $0x34] sm:$0xf]  ;;  %v5730_v52 = vor.u32 %v7358_v38, %v5729_v37  ;;  %v5774_v53 = vor.u32 %v7367_v40, %v5771_v42 }
  0xdc   : > { %1267 = vmatpush.bf16.msra.mxu0 %v5746_v22  ;;  %v5731_v46 = vld [vmem:[#allocation12 + $0x38] sm:$0xf0]  ;;  %v5721_v47 = vld [vmem:[#allocation12 + $0x20] sm:$0xf]  ;;  %v5778_v48 = vor.u32 %v7370_v44, %v5777_v43  ;;  %v1075_v49 = vld [vmem:[#allocation4 + $0x8] sm:$0xff]  ;;  %v8479_v61 = vmov 0  }
  0xdd   : > { %1303 = vmatpush.bf16.msra.mxu2 %v5750_v27  ;;  %v1077_v50 = vld [vmem:[#allocation4 + $0x18] sm:$0xff]  ;;  %v1080_v51 = vld [vmem:[#allocation7] sm:$0x3]  ;;  %v1092_v55 = vld [vmem:[#allocation9] sm:$0x3]  ;;  %v5734_v57 = vor.u32 %v7357_v45, %v5731_v46  ;;  %7914 = vset.pattern.permute.xlu0 %v8479_v61  ;;  %vm1258_vm0 = vcmask 523264  }
  0xde   : > { %1288 = vmatpush.bf16.msra.mxu1 %v5786_v35  ;;  %v8881_v54 = vperm.slane %v1080_v51, 1  ;;  %v5769_v56 = vld [vmem:[#allocation12 + $0x80] sm:$0xf]  ;;  %v7356_v58 = vld [vmem:[#allocation12 + $0x24] sm:$0xf0]  ;;  %v1095_v59 = vperm.slane %v1092_v55, 1  ;;  %7915 = vset.pattern.permute.xlu1 %v8479_v61 }
  0xdf   : > { %1325 = vmatpush.bf16.msra.mxu3 %v5782_v39  ;;  %v7368_v60 = vld [vmem:[#allocation12 + $0x84] sm:$0xf0]  ;;  %v7355_v62 = vld [vmem:[#allocation12 + $0x24] sm:$0xf]  ;;  %v5723_v63 = vld [vmem:[#allocation12 + $0x28] sm:$0xf0]  ;;  %v5722_v5 = vor.u32 %v7356_v58, %v5721_v47 }
  0xe0   : > { %1268 = vmatpush.bf16.msra.mxu0 %v5738_v36  ;;  %v1087_v0 = vsub.f32 %v1075_v49, %v8881_v54  ;;  %v1089_v1 = vsub.f32 %v1077_v50, %v8881_v54  ;;  %v5770_v2 = vor.u32 %v7368_v60, %v5769_v56  ;;  %v1082_v3 = vperm.slane %v1080_v51, 0  ;;  %v1337_v4 = vld [vmem:[%s10499_s12] sm:$0xff]  ;;  %v1074_v8 = vld [vmem:[#allocation4] sm:$0xff]  ;;  %v7354_v13 = vld [vmem:[#allocation12 + $0x14] sm:$0xf0] }
  0xe1   : > { %1304 = vmatpush.bf16.msra.mxu2 %v5742_v41  ;;  %v1076_v9 = vld [vmem:[#allocation4 + $0x10] sm:$0xff]  ;;  %v1339_v10 = vld [vmem:[%s10499_s12 + $0x10] sm:$0xff]  ;;  %v5726_v11 = vor.u32 %v7355_v62, %v5723_v63  ;;  %1342 = vperm.xlu0 %7914, %v1337_v4   ;;  %v7353_v14 = vld [vmem:[#allocation12 + $0x14] sm:$0xf]  ;;  %v1094_v19 = vperm.slane %v1092_v55, 0 }
  0xe2   : > { %1289 = vmatpush.bf16.msra.mxu1 %v5778_v48  ;;  %v1099_v6 = vmul.f32 %v1095_v59, %v1087_v0  ;;  %v1101_v7 = vmul.f32 %v1095_v59, %v1089_v1  ;;  %v5713_v12 = vld [vmem:[#allocation12 + $0x10] sm:$0xf]  ;;  %v5715_v15 = vld [vmem:[#allocation12 + $0x18] sm:$0xf0]  ;;  %1352 = vperm.xlu1 %7915, %v1339_v10   ;;  %v1086_v17 = vsub.f32 %v1074_v8, %v1082_v3  ;;  %v5705_v22 = vld [vmem:[#allocation12] sm:$0xf] }
  0xe3   : > { %1326 = vmatpush.bf16.msra.mxu3 %v5774_v53  ;;  %v1088_v18 = vsub.f32 %v1076_v9, %v1082_v3  ;;  %v5714_v20 = vor.u32 %v7354_v13, %v5713_v12  ;;  %v5718_v21 = vor.u32 %v7353_v14, %v5715_v15  ;;  %v7352_v23 = vld [vmem:[#allocation12 + $0x4] sm:$0xf0]  ;;  %v7351_v25 = vld [vmem:[#allocation12 + $0x4] sm:$0xf]  ;;  %v5707_v26 = vld [vmem:[#allocation12 + $0x8] sm:$0xf0] }
  0xe4   : > { %1269 = vmatpush.bf16.msra.mxu0 %v5730_v52  ;;  %v1105_v16 = vpack.c.bf16 %v1101_v7, %v1099_v6  ;;  %v1079_v24 = vld [vmem:[#allocation4 + $0x28] sm:$0xff]  ;;  %v1338_v27 = vld [vmem:[%s10499_s12 + $0x8] sm:$0xff]  ;;  %v1098_v28 = vmul.f32 %v1094_v19, %v1086_v17  ;;  %v5706_v30 = vor.u32 %v7352_v23, %v5705_v22  ;;  %v5710_v32 = vor.u32 %v7351_v25, %v5707_v26  ;;  %v1078_v36 = vld [vmem:[#allocation4 + $0x20] sm:$0xff] }
  0xe5   : > { %1305 = vmatpush.bf16.msra.mxu2 %v5734_v57  ;;  %v1100_v29 = vmul.f32 %v1094_v19, %v1088_v18  ;;  %v1091_v31 = vsub.f32 %v1079_v24, %v8881_v54  ;;  %v1090_v37 = vsub.f32 %v1078_v36, %v1082_v3  ;;  %v1132_v41 = vld [vmem:[#allocation13] sm:$0x3]  ;;  %v1361_v50 = vld [vmem:[#allocation10] sm:$0xff]  ;;  %v1362_v61 = vld [vmem:[#allocation10 + $0x8] sm:$0xff] }
  0xe6   : > { %1290 = vmatpush.bf16.msra.mxu1 %v5770_v2  ;;  %5801 = vmatmul.msk.bf16.vlgmr.msra.gmra.mxu3 %vm1258_vm0, %v1105_v16  ;;  %v1134_v43 = vperm.slane %v1132_v41, 0  ;;  %v1135_v51 = vperm.slane %v1132_v41, 1  ;;  %v1363_v1 = vld [vmem:[#allocation10 + $0x10] sm:$0xff]  ;;  %v1364_v12 = vld [vmem:[#allocation10 + $0x18] sm:$0xff]  ;;  %v1366_v24 = vld [vmem:[#allocation10 + $0x28] sm:$0xff] }
  0xe7   : > { %v1104_v33 = vpack.c.bf16 %v1100_v29, %v1098_v28  ;;  %v1103_v34 = vmul.f32 %v1095_v59, %v1091_v31  ;;  %v1102_v38 = vmul.f32 %v1094_v19, %v1090_v37 }
  0xe8   : > { %1270 = vmatpush.bf16.msra.mxu0 %v5722_v5 }
  0xe9   : > { %1306 = vmatpush.bf16.msra.mxu2 %v5726_v11  ;;  %5799 = vmatmul.msk.bf16.vlgmr.msra.gmra.mxu1 %vm1258_vm0, %v1105_v16  ;;  %v1107_v35 = vpack.c.bf16 %v1103_v34, %v1103_v34  ;;  %v1106_v39 = vpack.c.bf16 %v1102_v38, %v1102_v38  ;;  %v1365_v16 = vld [vmem:[#allocation10 + $0x20] sm:$0xff] }
  0xea   : > { %1347 = vperm.xlu0 %7914, %v1338_v27  }
  0xec   : > { %1271 = vmatpush.bf16.msra.mxu0 %v5714_v20 }
  0xed   : > { %1307 = vmatpush.bf16.msra.mxu2 %v5718_v21 }
  0xf0   : > { %1272 = vmatpush.bf16.msra.mxu0 %v5706_v30 }
  0xf1   : > { %1308 = vmatpush.bf16.msra.mxu2 %v5710_v32 }
  0xf3   : > { %1273 = vmatmul.bf16.vlgmr.msra.gmra.mxu0 %v1104_v33 }
  0xf4   : > { %1309 = vmatmul.bf16.vlgmr.msra.gmra.mxu2 %v1104_v33 }
  0xf6   : > { %5802 = vmatmul.msk.bf16.gmra.mxu3 %vm1258_vm0, %v1107_v35 }
  0xf9   : > { %5800 = vmatmul.msk.bf16.gmra.mxu1 %vm1258_vm0, %v1107_v35 }
 0x103   : > { %1278 = vmatmul.bf16.gmra.mxu0 %v1106_v39 }
 0x104   : > { %1314 = vmatmul.bf16.gmra.mxu2 %v1106_v39 }
 0x153   : > { %v1343_v46 = vpop.permute.xlu0 %1342 }
 0x154   : > { %v1353_v11 = vpop.permute.xlu1 %1352 }
 0x15c   : > { %v1348_v60 = vpop.permute.xlu0 %1347 }
 0x166   : > { %v1292_v40 = vpop.f32.mrf.mxu1 }
 0x169   : > { %v1328_v42 = vpop.f32.mrf.mxu3 }
 0x16e   : > { %v1294_v44 = vpop.f32.mrf.mxu1 }
 0x170   : > { %v1274_v45 = vpop.f32.mrf.mxu0 }
 0x171   : > { %v1275_v47 = vadd.f32 %v1274_v45, %v1134_v43  ;;  %v1330_v49 = vpop.f32.mrf.mxu3 }
 0x173   : > { %v1293_v48 = vadd.f32 %v1292_v40, %v1275_v47 }
 0x175   : > { %v1355_v52 = vmul.f32 %v1343_v46, %v1293_v48 }
 0x176   : > { %v1297_v55 = vpop.f32.mrf.mxu1 }
 0x177   : > { %v1367_v53 = vadd.f32 %v1361_v50, %v1355_v52  ;;  %v1310_v54 = vpop.f32.mrf.mxu2 }
 0x178   : > { %v1311_v56 = vadd.f32 %v1310_v54, %v1135_v51  ;;  %v1276_v57 = vpop.f32.mrf.mxu0 }
 0x179   : > { %1373 = vst [vmem:[#allocation2 + $0x28] sm:$0xff] %v1367_v53  ;;  %v1277_v58 = vadd.f32 %v1276_v57, %v1134_v43  ;;  %v1333_v63 = vpop.f32.mrf.mxu3 }
 0x17a   : > { %v1329_v59 = vadd.f32 %v1328_v42, %v1311_v56 }
 0x17b   : > { %v1295_v62 = vadd.f32 %v1294_v44, %v1277_v58 }
 0x17c   : > { %v1356_v0 = vmul.f32 %v1343_v46, %v1329_v59 }
 0x17d   : > { %v1357_v2 = vmul.f32 %v1348_v60, %v1295_v62 }
 0x17e   : > { %v1368_v3 = vadd.f32 %v1362_v61, %v1356_v0  ;;  %v1299_v6 = vpop.f32.mrf.mxu1 }
 0x17f   : > { %v1369_v4 = vadd.f32 %v1363_v1, %v1357_v2  ;;  %v1312_v5 = vpop.f32.mrf.mxu2 }
 0x180   : > { %1374 = vst [vmem:[#allocation2 + $0x10] sm:$0xff] %v1368_v3  ;;  %v1313_v7 = vadd.f32 %v1312_v5, %v1135_v51  ;;  %v1279_v8 = vpop.f32.mrf.mxu0 }
 0x181   : > { %1375 = vst [vmem:[#allocation2 + $0x8] sm:$0xff] %v1369_v4  ;;  %v1280_v9 = vadd.f32 %v1279_v8, %v1134_v43  ;;  %v1335_v13 = vpop.f32.mrf.mxu3 }
 0x182   : > { %v1331_v10 = vadd.f32 %v1330_v49, %v1313_v7 }
 0x183   : > { %v1298_v14 = vadd.f32 %v1297_v55, %v1280_v9 }
 0x184   : > { %v1358_v15 = vmul.f32 %v1348_v60, %v1331_v10 }
 0x185   : > { %v1359_v17 = vmul.f32 %v1353_v11, %v1298_v14 }
 0x186   : > { %v1370_v18 = vadd.f32 %v1364_v12, %v1358_v15 }
 0x187   : > { %v1315_v19 = vpop.f32.mrf.mxu2  ;;  %v1371_v20 = vadd.f32 %v1365_v16, %v1359_v17 }
 0x188   : > { %1376 = vst [vmem:[#allocation2] sm:$0xff] %v1370_v18  ;;  %v1316_v21 = vadd.f32 %v1315_v19, %v1135_v51  ;;  %v1281_v22 = vpop.f32.mrf.mxu0 }
 0x189   : > { %1377 = vst [vmem:[#allocation2 + $0x18] sm:$0xff] %v1371_v20 }
 0x18a   : > { %v1334_v23 = vadd.f32 %v1333_v63, %v1316_v21 }
 0x18c   : > { %v1360_v25 = vmul.f32 %v1353_v11, %v1334_v23 }
 0x18e   : > { %v1372_v26 = vadd.f32 %v1366_v24, %v1360_v25 }
 0x18f   : > { %v1317_v27 = vpop.f32.mrf.mxu2 }
 0x190   : > { %1378 = vst [vmem:[#allocation2 + $0x20] sm:$0xff] %v1372_v26 }
 0x191 PF: > { %v1379_v28 = vld [vmem:[#allocation2 + $0x28] sm:$0xff]  ;;  %v1380_v29 = vld [vmem:[#allocation2 + $0x10] sm:$0xff]  ;;  %v1383_v31 = vld [vmem:[#allocation2 + $0x18] sm:$0xff]  ;;  %v8480_v37 = vmov 256.0   ;;  %vm2374_vm11 = vcmask 1043456   ;;  %vm2332_vm12 = vcmask 195584  }
 0x192   : > { %v1387_v30 = vadd.f32 %v1380_v29, %v1379_v28  ;;  %v1381_v34 = vld [vmem:[#allocation2 + $0x8] sm:$0xff]  ;;  %v1382_v35 = vld [vmem:[#allocation2] sm:$0xff]  ;;  %7918 = vrcp.f32 %v8480_v37  ;;  %v5949_v13 = vld [vmem:[%s8828_s0 + $0x120] sm:$0xf] }
 0x193   : > { %v1390_v36 = vadd.f32 %v1382_v35, %v1381_v34  ;;  %v5973_v1 = vld [vmem:[%s8828_s0 + $0x150] sm:$0xf]  ;;  %v7420_v2 = vld [vmem:[%s8828_s0 + $0x164] sm:$0xf0]  ;;  %v7417_v6 = vld [vmem:[%s8828_s0 + $0x154] sm:$0xf] }
 0x194   : > { %1388 = vadd.xlane.f32.xlu0 %v1387_v30  ;;  %v6165_v3 = vld [vmem:[%s8828_s0 + $0x2d0] sm:$0xf]  ;;  %v5974_v4 = vor.u32 %v7420_v2, %v5973_v1  ;;  %v7468_v5 = vld [vmem:[%s8828_s0 + $0x2e4] sm:$0xf0]  ;;  %v5975_v7 = vld [vmem:[%s8828_s0 + $0x168] sm:$0xf0] }
 0x195   : > { %v6166_v8 = vor.u32 %v7468_v5, %v6165_v3  ;;  %v5978_v9 = vor.u32 %v7417_v6, %v5975_v7  ;;  %v7465_v10 = vld [vmem:[%s8828_s0 + $0x2d4] sm:$0xf]  ;;  %v6167_v11 = vld [vmem:[%s8828_s0 + $0x2e8] sm:$0xf0]  ;;  %v7414_v14 = vld [vmem:[%s8828_s0 + $0x134] sm:$0xf0] }
 0x196   : > { %2085 = vmatpush.bf16.msra.mxu0 %v5974_v4  ;;  %v6170_v12 = vor.u32 %v7465_v10, %v6167_v11  ;;  %v6141_v15 = vld [vmem:[%s8828_s0 + $0x2a0] sm:$0xf]  ;;  %v5950_v16 = vor.u32 %v7414_v14, %v5949_v13  ;;  %v7462_v17 = vld [vmem:[%s8828_s0 + $0x2b4] sm:$0xf0]  ;;  %v7411_v18 = vld [vmem:[%s8828_s0 + $0x124] sm:$0xf] }
 0x197   : > { %v1384_v32 = vld [vmem:[#allocation2 + $0x20] sm:$0xff]  ;;  %2103 = vmatpush.bf16.msra.mxu1 %v6166_v8  ;;  %2121 = vmatpush.bf16.msra.mxu2 %v5978_v9  ;;  %v5951_v19 = vld [vmem:[%s8828_s0 + $0x138] sm:$0xf0]  ;;  %v6142_v20 = vor.u32 %v7462_v17, %v6141_v15  ;;  %v7459_v22 = vld [vmem:[%s8828_s0 + $0x2a4] sm:$0xf] }
 0x198   : > { %v1393_v33 = vadd.f32 %v1384_v32, %v1383_v31  ;;  %v7919_v38 = vpop.eup %7918  ;;  %2139 = vmatpush.bf16.msra.mxu3 %v6170_v12  ;;  %v5954_v21 = vor.u32 %v7411_v18, %v5951_v19  ;;  %v6143_v23 = vld [vmem:[%s8828_s0 + $0x2b8] sm:$0xf0]  ;;  %v5925_v25 = vld [vmem:[%s8828_s0 + $0xf0] sm:$0xf]  ;;  %v7408_v26 = vld [vmem:[%s8828_s0 + $0x104] sm:$0xf0] }
 0x199   : > { %v1397_v39 = vmul.f32 256.0, %v7919_v38  ;;  %vm1401_vm1 = vweird.f32 %v7919_v38  ;;  %v6146_v24 = vor.u32 %v7459_v22, %v6143_v23  ;;  %v6117_v27 = vld [vmem:[%s8828_s0 + $0x270] sm:$0xf]  ;;  %v7405_v30 = vld [vmem:[%s8828_s0 + $0xf4] sm:$0xf] }
 0x19a   : > { %1394 = vadd.xlane.f32.xlu1 %v1393_v33  ;;  %2086 = vmatpush.bf16.msra.mxu0 %v5950_v16  ;;  %v5901_v37 = vld [vmem:[%s8828_s0 + $0xc0] sm:$0xf]  ;;  %v7441_v1 = vld [vmem:[%s8828_s0 + $0x214] sm:$0xf]  ;;  %v6071_v2 = vld [vmem:[%s8828_s0 + $0x228] sm:$0xf0] }
 0x19b   : > { %v1398_v40 = vsub.f32 1.0, %v1397_v39  ;;  %2104 = vmatpush.bf16.msra.mxu1 %v6142_v20  ;;  %2122 = vmatpush.bf16.msra.mxu2 %v5954_v21  ;;  %v6093_v39 = vld [vmem:[%s8828_s0 + $0x240] sm:$0xf]  ;;  %v6074_v3 = vor.u32 %v7441_v1, %v6071_v2  ;;  %v7390_v5 = vld [vmem:[%s8828_s0 + $0x74] sm:$0xf0] }
 0x19c   : > { %1391 = vadd.xlane.f32.xlu0 %v1390_v36  ;;  %2140 = vmatpush.bf16.msra.mxu3 %v6146_v24  ;;  %v5853_v4 = vld [vmem:[%s8828_s0 + $0x60] sm:$0xf]  ;;  %v7438_v8 = vld [vmem:[%s8828_s0 + $0x1f4] sm:$0xf0]  ;;  %v7387_v9 = vld [vmem:[%s8828_s0 + $0x64] sm:$0xf] }
 0x19d   : > { %v1399_v41 = vmul.f32 %v7919_v38, %v1398_v40  ;;  %v6045_v6 = vld [vmem:[%s8828_s0 + $0x1e0] sm:$0xf]  ;;  %v5854_v7 = vor.u32 %v7390_v5, %v5853_v4  ;;  %v5855_v10 = vld [vmem:[%s8828_s0 + $0x78] sm:$0xf0]  ;;  %v7435_v13 = vld [vmem:[%s8828_s0 + $0x1e4] sm:$0xf] }
 0x19e   : > { %v6046_v11 = vor.u32 %v7438_v8, %v6045_v6  ;;  %v5858_v12 = vor.u32 %v7387_v9, %v5855_v10  ;;  %v6047_v14 = vld [vmem:[%s8828_s0 + $0x1f8] sm:$0xf0]  ;;  %v5829_v16 = vld [vmem:[%s8828_s0 + $0x30] sm:$0xf]  ;;  %v7384_v17 = vld [vmem:[%s8828_s0 + $0x44] sm:$0xf0] }
 0x19f   : > { %v1400_v42 = vadd.f32 %v7919_v38, %v1399_v41  ;;  %v7450_v41 = vld [vmem:[%s8828_s0 + $0x254] sm:$0xf0]  ;;  %v6050_v15 = vor.u32 %v7435_v13, %v6047_v14  ;;  %v6021_v18 = vld [vmem:[%s8828_s0 + $0x1b0] sm:$0xf]  ;;  %v5830_v19 = vor.u32 %v7384_v17, %v5829_v16  ;;  %v7432_v20 = vld [vmem:[%s8828_s0 + $0x1c4] sm:$0xf0] }
 0x1a0   : > { %v7381_v21 = vld [vmem:[%s8828_s0 + $0x34] sm:$0xf]  ;;  %v5831_v22 = vld [vmem:[%s8828_s0 + $0x48] sm:$0xf0]  ;;  %v6022_v23 = vor.u32 %v7432_v20, %v6021_v18  ;;  %v7415_v1 = vld [vmem:[%s8828_s0 + $0x13c] sm:$0xf0] }
 0x1a1   : > { %v8899_v43 = vsel %vm1401_vm1, %v7919_v38, %v1400_v42  ;;  %v7402_v38 = vld [vmem:[%s8828_s0 + $0xd4] sm:$0xf0]  ;;  %v7399_v42 = vld [vmem:[%s8828_s0 + $0xc4] sm:$0xf]  ;;  %v5834_v24 = vor.u32 %v7381_v21, %v5831_v22  ;;  %v6149_v2 = vld [vmem:[%s8828_s0 + $0x2a8] sm:$0xf] }
 0x1a2   : > { %v5902_v40 = vor.u32 %v7402_v38, %v5901_v37  ;;  %v7463_v6 = vld [vmem:[%s8828_s0 + $0x2bc] sm:$0xf0]  ;;  %v5959_v10 = vld [vmem:[%s8828_s0 + $0x140] sm:$0xf0]  ;;  %v7409_v16 = vld [vmem:[%s8828_s0 + $0x10c] sm:$0xf0] }
 0x1a3   : > { %v6150_v9 = vor.u32 %v7463_v6, %v6149_v2  ;;  %v7457_v20 = vld [vmem:[%s8828_s0 + $0x28c] sm:$0xf0]  ;;  %v7406_v21 = vld [vmem:[%s8828_s0 + $0xfc] sm:$0xf] }
 0x1a4   : > { %v7394_v2 = vld [vmem:[%s8828_s0 + $0x9c] sm:$0xf] }
 0x207   : > { %v1389_v44 = vpop.xlane.xlu0 %1388 }
 0x208   : > { %v1403_v45 = vmul.f32 %v8899_v43, %v1389_v44  ;;  %v5903_v44 = vld [vmem:[%s8828_s0 + $0xd8] sm:$0xf0] }
 0x20a   : > { %v8902_v46 = vsub.f32 %v1379_v28, %v1403_v45  ;;  %v8904_v47 = vsub.f32 %v1380_v29, %v1403_v45  ;;  %v5926_v28 = vor.u32 %v7408_v26, %v5925_v25  ;;  %v7456_v29 = vld [vmem:[%s8828_s0 + $0x284] sm:$0xf0]  ;;  %v6094_v45 = vor.u32 %v7450_v41, %v6093_v39  ;;  %v7429_v25 = vld [vmem:[%s8828_s0 + $0x1b4] sm:$0xf]  ;;  %v6023_v26 = vld [vmem:[%s8828_s0 + $0x1c8] sm:$0xf0] }
 0x20b   : > { %v5999_v41 = vld [vmem:[%s8828_s0 + $0x198] sm:$0xf0] }
 0x20c   : > { %v1412_v48 = vmul.f32 %v8902_v46, %v8902_v46  ;;  %v1413_v49 = vmul.f32 %v8904_v47, %v8904_v47  ;;  %2087 = vmatpush.bf16.msra.mxu0 %v5926_v28  ;;  %v6026_v28 = vor.u32 %v7429_v25, %v6023_v26  ;;  %v6127_v25 = vld [vmem:[%s8828_s0 + $0x290] sm:$0xf0]  ;;  %v1385_v26 = vld [vmem:[%s1044_s28] sm:$0x3] }
 0x20d   : > { %v1395_v50 = vpop.xlane.xlu1 %1394 }
 0x20e   : > { %v1418_v51 = vadd.f32 %v1413_v49, %v1412_v48  ;;  %v1405_v54 = vmul.f32 %v8899_v43, %v1395_v50  ;;  %v5906_v48 = vor.u32 %v7399_v42, %v5903_v44  ;;  %v7447_v49 = vld [vmem:[%s8828_s0 + $0x244] sm:$0xf]  ;;  %v6095_v50 = vld [vmem:[%s8828_s0 + $0x258] sm:$0xf0]  ;;  %v5981_v44 = vld [vmem:[%s8828_s0 + $0x158] sm:$0xf] }
 0x20f   : > { %v1392_v52 = vpop.xlane.xlu0 %1391 }
 0x210   : > { %v1404_v53 = vmul.f32 %v8899_v43, %v1392_v52  ;;  %1419 = vadd.xlane.f32.xlu1 %v1418_v51  ;;  %v8916_v57 = vsub.f32 %v1383_v31, %v1405_v54  ;;  %v8918_v58 = vsub.f32 %v1384_v32, %v1405_v54  ;;  %v5927_v31 = vld [vmem:[%s8828_s0 + $0x108] sm:$0xf0]  ;;  %v6118_v32 = vor.u32 %v7456_v29, %v6117_v27  ;;  %v5877_v52 = vld [vmem:[%s8828_s0 + $0x90] sm:$0xf] }
 0x211   : > { %v5930_v33 = vor.u32 %v7405_v30, %v5927_v31  ;;  %2088 = vmatpush.bf16.msra.mxu0 %v5902_v40  ;;  %v6098_v51 = vor.u32 %v7447_v49, %v6095_v50  ;;  %v6069_v54 = vld [vmem:[%s8828_s0 + $0x210] sm:$0xf]  ;;  %v5805_v30 = vld [vmem:[%s8828_s0] sm:$0xf]  ;;  %v7378_v31 = vld [vmem:[%s8828_s0 + $0x14] sm:$0xf0] }
 0x212   : > { %v8912_v55 = vsub.f32 %v1381_v34, %v1404_v53  ;;  %v8914_v56 = vsub.f32 %v1382_v35, %v1404_v53  ;;  %v1416_v62 = vmul.f32 %v8916_v57, %v8916_v57  ;;  %v1417_v63 = vmul.f32 %v8918_v58, %v8918_v58  ;;  %v7453_v34 = vld [vmem:[%s8828_s0 + $0x274] sm:$0xf]  ;;  %v6119_v35 = vld [vmem:[%s8828_s0 + $0x288] sm:$0xf0]  ;;  %2105 = vmatpush.bf16.msra.mxu1 %v6118_v32  ;;  %v7396_v53 = vld [vmem:[%s8828_s0 + $0xa4] sm:$0xf0] }
 0x213   : > { %v6122_v36 = vor.u32 %v7453_v34, %v6119_v35  ;;  %2123 = vmatpush.bf16.msra.mxu2 %v5930_v33  ;;  %v5997_v32 = vld [vmem:[%s8828_s0 + $0x180] sm:$0xf]  ;;  %v5806_v33 = vor.u32 %v7378_v31, %v5805_v30  ;;  %v7426_v34 = vld [vmem:[%s8828_s0 + $0x194] sm:$0xf0]  ;;  %v7375_v35 = vld [vmem:[%s8828_s0 + $0x4] sm:$0xf] }
 0x214   : > { %v1414_v59 = vmul.f32 %v8912_v55, %v8912_v55  ;;  %v1415_v60 = vmul.f32 %v8914_v56, %v8914_v56  ;;  %v1424_v0 = vadd.f32 %v1417_v63, %v1416_v62  ;;  %v5879_v62 = vld [vmem:[%s8828_s0 + $0xa8] sm:$0xf0]  ;;  %v5998_v38 = vor.u32 %v7426_v34, %v5997_v32  ;;  %v7423_v40 = vld [vmem:[%s8828_s0 + $0x184] sm:$0xf]  ;;  %v7469_v50 = vld [vmem:[%s8828_s0 + $0x2ec] sm:$0xf0] }
 0x215   : > { %2141 = vmatpush.bf16.msra.mxu3 %v6122_v36  ;;  %v5807_v36 = vld [vmem:[%s8828_s0 + $0x18] sm:$0xf0]  ;;  %v6002_v42 = vor.u32 %v7423_v40, %v5999_v41  ;;  %v5909_v31 = vld [vmem:[%s8828_s0 + $0xc8] sm:$0xf]  ;;  %v7403_v32 = vld [vmem:[%s8828_s0 + $0xdc] sm:$0xf0] }
 0x216   : > { %v1421_v61 = vadd.f32 %v1415_v60, %v1414_v59  ;;  %2106 = vmatpush.bf16.msra.mxu1 %v6094_v45  ;;  %v5878_v59 = vor.u32 %v7396_v53, %v5877_v52  ;;  %v7444_v60 = vld [vmem:[%s8828_s0 + $0x224] sm:$0xf0]  ;;  %v5810_v39 = vor.u32 %v7375_v35, %v5807_v36  ;;  %v7421_v45 = vld [vmem:[%s8828_s0 + $0x16c] sm:$0xf0]  ;;  %v5983_v52 = vld [vmem:[%s8828_s0 + $0x170] sm:$0xf0]  ;;  %v5910_v34 = vor.u32 %v7403_v32, %v5909_v31 }
 0x217   : > { %2124 = vmatpush.bf16.msra.mxu2 %v5906_v48  ;;  %v6070_v63 = vor.u32 %v7444_v60, %v6069_v54  ;;  %v6173_v48 = vld [vmem:[%s8828_s0 + $0x2d8] sm:$0xf]  ;;  %v5982_v49 = vor.u32 %v7421_v45, %v5981_v44  ;;  %v7466_v60 = vld [vmem:[%s8828_s0 + $0x2dc] sm:$0xf]  ;;  %v6101_v35 = vld [vmem:[%s8828_s0 + $0x248] sm:$0xf] }
 0x218   : > { %1422 = vadd.xlane.f32.xlu2 %v1421_v61  ;;  %v7393_v61 = vld [vmem:[%s8828_s0 + $0x94] sm:$0xf]  ;;  %2089 = vmatpush.bf16.msra.mxu0 %v5878_v59  ;;  %v6174_v54 = vor.u32 %v7469_v50, %v6173_v48  ;;  %v7451_v36 = vld [vmem:[%s8828_s0 + $0x25c] sm:$0xf0]  ;;  %v5911_v41 = vld [vmem:[%s8828_s0 + $0xe0] sm:$0xf0] }
 0x219   : > { %2142 = vmatpush.bf16.msra.mxu3 %v6098_v51  ;;  %v7418_v51 = vld [vmem:[%s8828_s0 + $0x15c] sm:$0xf]  ;;  %v6102_v40 = vor.u32 %v7451_v36, %v6101_v35 }
 0x21a   : > { %2107 = vmatpush.bf16.msra.mxu1 %v6070_v63  ;;  %v5986_v59 = vor.u32 %v7418_v51, %v5983_v52 }
 0x21c   : > { %2090 = vmatpush.bf16.msra.mxu0 %v5854_v7  ;;  %v7412_v7 = vld [vmem:[%s8828_s0 + $0x12c] sm:$0xf] }
 0x21d   : > { %2143 = vmatpush.bf16.msra.mxu3 %v6074_v3  ;;  %v5962_v13 = vor.u32 %v7412_v7, %v5959_v10  ;;  %v6079_v10 = vld [vmem:[%s8828_s0 + $0x230] sm:$0xf0] }
 0x21e   : > { %2108 = vmatpush.bf16.msra.mxu1 %v6046_v11  ;;  %v7460_v11 = vld [vmem:[%s8828_s0 + $0x2ac] sm:$0xf] }
 0x220   : > { %1425 = vadd.xlane.f32.xlu2 %v1424_v0  ;;  %v5882_v0 = vor.u32 %v7393_v61, %v5879_v62  ;;  %2091 = vmatpush.bf16.msra.mxu0 %v5830_v19  ;;  %v6175_v61 = vld [vmem:[%s8828_s0 + $0x2f0] sm:$0xf0]  ;;  %v6125_v19 = vld [vmem:[%s8828_s0 + $0x278] sm:$0xf] }
 0x221   : > { %2144 = vmatpush.bf16.msra.mxu3 %v6050_v15  ;;  %v6178_v63 = vor.u32 %v7466_v60, %v6175_v61  ;;  %v5933_v15 = vld [vmem:[%s8828_s0 + $0xf8] sm:$0xf]  ;;  %v6126_v22 = vor.u32 %v7457_v20, %v6125_v19  ;;  %v7439_v19 = vld [vmem:[%s8828_s0 + $0x1fc] sm:$0xf0] }
 0x222   : > { %2125 = vmatpush.bf16.msra.mxu2 %v5882_v0  ;;  %2109 = vmatpush.bf16.msra.mxu1 %v6022_v23  ;;  %v5957_v0 = vld [vmem:[%s8828_s0 + $0x128] sm:$0xf]  ;;  %v5934_v18 = vor.u32 %v7409_v16, %v5933_v15  ;;  %v5935_v23 = vld [vmem:[%s8828_s0 + $0x110] sm:$0xf0]  ;;  %v5885_v61 = vld [vmem:[%s8828_s0 + $0x98] sm:$0xf] }
 0x223   : > { %v5958_v5 = vor.u32 %v7415_v1, %v5957_v0  ;;  %v7445_v1 = vld [vmem:[%s8828_s0 + $0x22c] sm:$0xf0]  ;;  %v6053_v15 = vld [vmem:[%s8828_s0 + $0x1e8] sm:$0xf] }
 0x224   : > { %2092 = vmatpush.bf16.msra.mxu0 %v5806_v33 }
 0x225   : > { %2145 = vmatpush.bf16.msra.mxu3 %v6026_v28 }
 0x226   : > { %2126 = vmatpush.bf16.msra.mxu2 %v5858_v12  ;;  %2110 = vmatpush.bf16.msra.mxu1 %v5998_v38  ;;  %v6151_v12 = vld [vmem:[%s8828_s0 + $0x2c0] sm:$0xf0]  ;;  %v7400_v38 = vld [vmem:[%s8828_s0 + $0xcc] sm:$0xf] }
 0x227   : > { %v6154_v14 = vor.u32 %v7460_v11, %v6151_v12  ;;  %v5914_v48 = vor.u32 %v7400_v38, %v5911_v41  ;;  %v7430_v41 = vld [vmem:[%s8828_s0 + $0x1bc] sm:$0xf] }
 0x228   : > { %2157 = vmatpush.bf16.msrb.mxu0 %v5982_v49  ;;  %v6103_v49 = vld [vmem:[%s8828_s0 + $0x260] sm:$0xf0] }
 0x229   : > { %2146 = vmatpush.bf16.msra.mxu3 %v6002_v42  ;;  %v7448_v42 = vld [vmem:[%s8828_s0 + $0x24c] sm:$0xf] }
 0x22a   : > { %2127 = vmatpush.bf16.msra.mxu2 %v5834_v24  ;;  %2175 = vmatpush.bf16.msrb.mxu1 %v6174_v54  ;;  %v7454_v24 = vld [vmem:[%s8828_s0 + $0x27c] sm:$0xf]  ;;  %v6106_v52 = vor.u32 %v7448_v42, %v6103_v49  ;;  %v9057_v54 = vperm.slane %v1385_v26, 0  ;;  %v6031_v42 = vld [vmem:[%s8828_s0 + $0x1d0] sm:$0xf0] }
 0x22b   : > { %v6130_v30 = vor.u32 %v7454_v24, %v6127_v25 }
 0x22c   : > { %2158 = vmatpush.bf16.msrb.mxu0 %v5958_v5  ;;  %v5887_v5 = vld [vmem:[%s8828_s0 + $0xb0] sm:$0xf0] }
 0x22d   : > { %2211 = vmatpush.bf16.msrb.mxu3 %v6178_v63  ;;  %v6077_v63 = vld [vmem:[%s8828_s0 + $0x218] sm:$0xf] }
 0x22e   : > { %2128 = vmatpush.bf16.msra.mxu2 %v5810_v39  ;;  %2176 = vmatpush.bf16.msrb.mxu1 %v6150_v9  ;;  %v6078_v7 = vor.u32 %v7445_v1, %v6077_v63  ;;  %v7442_v9 = vld [vmem:[%s8828_s0 + $0x21c] sm:$0xf]  ;;  %v5815_v63 = vld [vmem:[%s8828_s0 + $0x20] sm:$0xf0] }
 0x22f   : > { %v6082_v12 = vor.u32 %v7442_v9, %v6079_v10 }
 0x230   : > { %2159 = vmatpush.bf16.msrb.mxu0 %v5934_v18 }
 0x231   : > { %2212 = vmatpush.bf16.msrb.mxu3 %v6154_v14  ;;  %v7391_v14 = vld [vmem:[%s8828_s0 + $0x7c] sm:$0xf0] }
 0x232   : > { %2193 = vmatpush.bf16.msrb.mxu2 %v5986_v59  ;;  %2177 = vmatpush.bf16.msrb.mxu1 %v6126_v22  ;;  %v9059_v59 = vperm.slane %v1385_v26, 1  ;;  %v5863_v22 = vld [vmem:[%s8828_s0 + $0x80] sm:$0xf0] }
 0x234   : > { %2160 = vmatpush.bf16.msrb.mxu0 %v5910_v34  ;;  %v7382_v34 = vld [vmem:[%s8828_s0 + $0x3c] sm:$0xf] }
 0x235   : > { %2213 = vmatpush.bf16.msrb.mxu3 %v6130_v30 }
 0x236   : > { %2194 = vmatpush.bf16.msrb.mxu2 %v5962_v13  ;;  %2178 = vmatpush.bf16.msrb.mxu1 %v6102_v40  ;;  %v5861_v13 = vld [vmem:[%s8828_s0 + $0x68] sm:$0xf]  ;;  %v5839_v40 = vld [vmem:[%s8828_s0 + $0x50] sm:$0xf0] }
 0x237   : > { %v5862_v18 = vor.u32 %v7391_v14, %v5861_v13 }
 0x239   : > { %2214 = vmatpush.bf16.msrb.mxu3 %v6106_v52  ;;  %v7379_v52 = vld [vmem:[%s8828_s0 + $0x1c] sm:$0xf0] }
 0x23a   : > { %2179 = vmatpush.bf16.msrb.mxu1 %v6078_v7 }
 0x23d   : > { %2215 = vmatpush.bf16.msrb.mxu3 %v6082_v12 }
 0x283   : > { %v1420_v27 = vpop.xlane.xlu1 %1419 }
 0x284   : > { %v1427_v29 = vmul.f32 %v1420_v27, %v8899_v43 }
 0x286   : > { %v8991_v37 = vadd.f32 1e-06, %v1427_v29  ;;  %v5938_v29 = vor.u32 %v7406_v21, %v5935_v23  ;;  %v6054_v21 = vor.u32 %v7439_v19, %v6053_v15  ;;  %v7436_v23 = vld [vmem:[%s8828_s0 + $0x1ec] sm:$0xf] }
 0x288   : > { %7920 = vrsqrt.f32 %v8991_v37  ;;  %2195 = vmatpush.bf16.msrb.mxu2 %v5938_v29  ;;  %vm1439_vm3 = vweird.f32 %v8991_v37  ;;  %v6029_v29 = vld [vmem:[%s8828_s0 + $0x1b8] sm:$0xf]  ;;  %2180 = vmatpush.bf16.msrb.mxu1 %v6054_v21  ;;  %v5991_v21 = vld [vmem:[%s8828_s0 + $0x178] sm:$0xf0] }
 0x28b   : > { %v1423_v53 = vpop.xlane.xlu2 %1422 }
 0x28c   : > { %v1428_v62 = vmul.f32 %v1423_v53, %v8899_v43  ;;  %v1386_v53 = vld [vmem:[%s1048_s17] sm:$0x3]  ;;  %2196 = vmatpush.bf16.msrb.mxu2 %v5914_v48  ;;  %s10502_s17 = sld [smem:[#allocation40_spill]] }
 0x28d   : > { %v9072_v6 = vperm.slane %v1386_v53, 0  ;;  %v9096_v30 = vperm.slane %v1386_v53, 1 }
 0x28e   : > { %v9008_v3 = vpop.eup %7920  ;;  %v9010_v4 = vadd.f32 1e-06, %v1428_v62  ;;  %v7397_v62 = vld [vmem:[%s8828_s0 + $0xac] sm:$0xf0] }
 0x28f   : > { %v1434_v8 = vmul.f32 %v9008_v3, %v8991_v37  ;;  %vm1440_vm2 = vweird.f32 %v9008_v3  ;;  %v5886_v0 = vor.u32 %v7397_v62, %v5885_v61 }
 0x290   : > { %7922 = vrsqrt.f32 %v9010_v4  ;;  %vm1441_vm4 = vmor %vm1439_vm3, %vm1440_vm2  ;;  %vm1449_vm6 = vweird.f32 %v9010_v4 }
 0x291   : > { %v1435_v17 = vmul.f32 %v9008_v3, %v1434_v8  ;;  %v5890_v8 = vor.u32 %v7394_v2, %v5887_v5  ;;  %2161 = vmatpush.bf16.msrb.mxu0 %v5886_v0  ;;  %v7424_v5 = vld [vmem:[%s8828_s0 + $0x18c] sm:$0xf] }
 0x293   : > { %v1436_v27 = vmul.f32 0.5, %v1435_v17  ;;  %v1426_v28 = vpop.xlane.xlu2 %1425  ;;  %2197 = vmatpush.bf16.msrb.mxu2 %v5890_v8 }
 0x294   : > { %v1429_v33 = vmul.f32 %v1426_v28, %v8899_v43  ;;  %v7385_v28 = vld [vmem:[%s8828_s0 + $0x4c] sm:$0xf0] }
 0x295   : > { %v1437_v39 = vsub.f32 1.5, %v1436_v27  ;;  %v5837_v27 = vld [vmem:[%s8828_s0 + $0x38] sm:$0xf]  ;;  %2162 = vmatpush.bf16.msrb.mxu0 %v5862_v18  ;;  %v6181_v18 = vld [vmem:[%s8828_s0 + $0x2e0] sm:$0xf] }
 0x296   : > { %v9043_v44 = vpop.eup %7922  ;;  %v9045_v45 = vadd.f32 1e-06, %v1429_v33  ;;  %v7433_v33 = vld [vmem:[%s8828_s0 + $0x1cc] sm:$0xf0] }
 0x297   : > { %v1438_v50 = vmul.f32 %v9008_v3, %v1437_v39  ;;  %v1444_v51 = vmul.f32 %v9043_v44, %v9010_v4  ;;  %vm1450_vm5 = vweird.f32 %v9043_v44  ;;  %v5838_v4 = vor.u32 %v7385_v28, %v5837_v27  ;;  %v7416_v28 = vld [vmem:[%s8828_s0 + $0x144] sm:$0xf0] }
 0x298   : > { %7924 = vrsqrt.f32 %v9045_v45  ;;  %vm1451_vm7 = vmor %vm1449_vm6, %vm1450_vm5  ;;  %v6030_v39 = vor.u32 %v7433_v33, %v6029_v29  ;;  %vm1459_vm8 = vweird.f32 %v9045_v45  ;;  %v6157_v29 = vld [vmem:[%s8828_s0 + $0x2b0] sm:$0xf]  ;;  %v7461_v33 = vld [vmem:[%s8828_s0 + $0x2b4] sm:$0xf] }
 0x299   : > { %v1442_v37 = vsel %vm1441_vm4, %v9008_v3, %v1438_v50  ;;  %v1445_v60 = vmul.f32 %v9043_v44, %v1444_v51  ;;  %v5842_v50 = vor.u32 %v7382_v34, %v5839_v40  ;;  %v5813_v51 = vld [vmem:[%s8828_s0 + $0x8] sm:$0xf]  ;;  %2163 = vmatpush.bf16.msrb.mxu0 %v5838_v4  ;;  %v6133_v40 = vld [vmem:[%s8828_s0 + $0x280] sm:$0xf] }
 0x29a   : > { %v1463_v11 = vmul.f32 %v1442_v37, %v8902_v46  ;;  %v1464_v16 = vmul.f32 %v1442_v37, %v8904_v47  ;;  %v7388_v46 = vld [vmem:[%s8828_s0 + $0x6c] sm:$0xf]  ;;  %v6055_v47 = vld [vmem:[%s8828_s0 + $0x200] sm:$0xf0]  ;;  %v6034_v37 = vor.u32 %v7430_v41, %v6031_v42  ;;  %2181 = vmatpush.bf16.msrb.mxu1 %v6030_v39  ;;  %v7458_v41 = vld [vmem:[%s8828_s0 + $0x294] sm:$0xf0] }
 0x29b   : > { %v1446_v3 = vmul.f32 0.5, %v1445_v60  ;;  %v5866_v26 = vor.u32 %v7388_v46, %v5863_v22  ;;  %v6058_v32 = vor.u32 %v7436_v23, %v6055_v47  ;;  %v7427_v60 = vld [vmem:[%s8828_s0 + $0x19c] sm:$0xf0]  ;;  %v7419_v46 = vld [vmem:[%s8828_s0 + $0x164] sm:$0xf] }
 0x29c   : > { %v1474_v31 = vmul.f32 %v9057_v54, %v1463_v11  ;;  %v1475_v35 = vmul.f32 %v9059_v59, %v1464_v16  ;;  %v5989_v16 = vld [vmem:[%s8828_s0 + $0x160] sm:$0xf]  ;;  %v5994_v22 = vor.u32 %v7419_v46, %v5991_v21  ;;  %v7467_v23 = vld [vmem:[%s8828_s0 + $0x2e4] sm:$0xf]  ;;  %v6183_v47 = vld [vmem:[%s8828_s0 + $0x2f8] sm:$0xf0] }
 0x29d   : > { %v1447_v17 = vsub.f32 1.5, %v1446_v3  ;;  %2198 = vmatpush.bf16.msrb.mxu2 %v5866_v26  ;;  %2216 = vmatpush.bf16.msrb.mxu3 %v6058_v32  ;;  %v6007_v3 = vld [vmem:[%s8828_s0 + $0x1a0] sm:$0xf0]  ;;  %v6186_v27 = vor.u32 %v7467_v23, %v6183_v47  ;;  %v5869_v46 = vld [vmem:[%s8828_s0 + $0x70] sm:$0xf] }
 0x29e   : > { %v9084_v20 = vpop.eup %7924  ;;  %v1485_v0 = vadd.f32 %v9072_v6, %v1474_v31  ;;  %v1486_v7 = vadd.f32 %v9096_v30, %v1475_v35  ;;  %v6010_v14 = vor.u32 %v7424_v5, %v6007_v3  ;;  %v7464_v31 = vld [vmem:[%s8828_s0 + $0x2c4] sm:$0xf0]  ;;  %v6159_v35 = vld [vmem:[%s8828_s0 + $0x2c8] sm:$0xf0]  ;;  %v7407_v42 = vld [vmem:[%s8828_s0 + $0x104] sm:$0xf] }
 0x29f   : > { %v1448_v24 = vmul.f32 %v9043_v44, %v1447_v17  ;;  %v1454_v25 = vmul.f32 %v9084_v20, %v9045_v45  ;;  %vm1460_vm9 = vweird.f32 %v9084_v20  ;;  %v7422_v17 = vld [vmem:[%s8828_s0 + $0x174] sm:$0xf0]  ;;  %v6158_v4 = vor.u32 %v7464_v31, %v6157_v29  ;;  %v7449_v5 = vld [vmem:[%s8828_s0 + $0x254] sm:$0xf]  ;;  %v6111_v3 = vld [vmem:[%s8828_s0 + $0x268] sm:$0xf0] }
 0x2a0   : > { %vm1461_vm10 = vmor %vm1459_vm8, %vm1460_vm9  ;;  %v5990_v19 = vor.u32 %v7422_v17, %v5989_v16  ;;  %v7470_v45 = vld [vmem:[%s8828_s0 + $0x2f4] sm:$0xf0]  ;;  %v6162_v39 = vor.u32 %v7461_v33, %v6159_v35  ;;  %v7395_v16 = vld [vmem:[%s8828_s0 + $0xa4] sm:$0xf] }
 0x2a1   : > { %v1452_v36 = vsel %vm1451_vm7, %v9043_v44, %v1448_v24  ;;  %v1455_v38 = vmul.f32 %v9084_v20, %v1454_v25  ;;  %v6005_v44 = vld [vmem:[%s8828_s0 + $0x188] sm:$0xf]  ;;  %2199 = vmatpush.bf16.msrb.mxu2 %v5842_v50  ;;  %2217 = vmatpush.bf16.msrb.mxu3 %v6034_v37  ;;  %v5965_v24 = vld [vmem:[%s8828_s0 + $0x130] sm:$0xf]  ;;  %v5943_v50 = vld [vmem:[%s8828_s0 + $0x118] sm:$0xf0] }
 0x2a2   : > { %v1465_v48 = vmul.f32 %v1452_v36, %v8912_v55  ;;  %v1466_v49 = vmul.f32 %v1452_v36, %v8914_v56  ;;  %v5814_v55 = vor.u32 %v7379_v52, %v5813_v51  ;;  %v7376_v56 = vld [vmem:[%s8828_s0 + $0xc] sm:$0xf]  ;;  %v6006_v2 = vor.u32 %v7427_v60, %v6005_v44  ;;  %v5941_v36 = vld [vmem:[%s8828_s0 + $0x100] sm:$0xf]  ;;  %v7455_v51 = vld [vmem:[%s8828_s0 + $0x284] sm:$0xf] }
 0x2a3   : > { %v1456_v53 = vmul.f32 0.5, %v1455_v38  ;;  %v5818_v13 = vor.u32 %v7376_v56, %v5815_v63  ;;  %v5966_v32 = vor.u32 %v7416_v28, %v5965_v24  ;;  %v7410_v38 = vld [vmem:[%s8828_s0 + $0x114] sm:$0xf0]  ;;  %v6135_v52 = vld [vmem:[%s8828_s0 + $0x298] sm:$0xf0]  ;;  %v5946_v60 = vor.u32 %v7407_v42, %v5943_v50 }
 0x2a4   : > { %v1476_v61 = vmul.f32 %v9057_v54, %v1465_v48  ;;  %v1477_v62 = vmul.f32 %v9059_v59, %v1466_v49  ;;  %2164 = vmatpush.bf16.msrb.mxu0 %v5814_v55  ;;  %2182 = vmatpush.bf16.msrb.mxu1 %v6006_v2  ;;  %v5942_v44 = vor.u32 %v7410_v38, %v5941_v36  ;;  %v5917_v37 = vld [vmem:[%s8828_s0 + $0xd0] sm:$0xf]  ;;  %v7452_v55 = vld [vmem:[%s8828_s0 + $0x264] sm:$0xf0]  ;;  %v7401_v63 = vld [vmem:[%s8828_s0 + $0xd4] sm:$0xf] }
 0x2a5   : > { %v1457_v1 = vsub.f32 1.5, %v1456_v53  ;;  %2200 = vmatpush.bf16.msrb.mxu2 %v5818_v13  ;;  %2218 = vmatpush.bf16.msrb.mxu3 %v6010_v14  ;;  %v6134_v53 = vor.u32 %v7458_v41, %v6133_v40  ;;  %v5919_v2 = vld [vmem:[%s8828_s0 + $0xe8] sm:$0xf0]  ;;  %v6085_v13 = vld [vmem:[%s8828_s0 + $0x220] sm:$0xf] }
 0x2a6   : > { %v1487_v8 = vadd.f32 %v9072_v6, %v1476_v61  ;;  %v1488_v9 = vadd.f32 %v9096_v30, %v1477_v62  ;;  %v6138_v61 = vor.u32 %v7455_v51, %v6135_v52  ;;  %v6109_v62 = vld [vmem:[%s8828_s0 + $0x250] sm:$0xf]  ;;  %v5895_v17 = vld [vmem:[%s8828_s0 + $0xb8] sm:$0xf0]  ;;  %v7440_v47 = vld [vmem:[%s8828_s0 + $0x204] sm:$0xf0] }
 0x2a7   : > { %v1458_v10 = vmul.f32 %v9084_v20, %v1457_v1  ;;  %v6110_v1 = vor.u32 %v7452_v55, %v6109_v62  ;;  %v5898_v21 = vor.u32 %v7395_v16, %v5895_v17  ;;  %v6061_v23 = vld [vmem:[%s8828_s0 + $0x1f0] sm:$0xf]  ;;  %v7437_v28 = vld [vmem:[%s8828_s0 + $0x1f4] sm:$0xf]  ;;  %v6063_v29 = vld [vmem:[%s8828_s0 + $0x208] sm:$0xf0] }
 0x2a8   : > { %v9128_v11 = vpack.c.bf16 %v1487_v8, %v1485_v0  ;;  %v9130_v12 = vpack.c.bf16 %v1488_v9, %v1486_v7  ;;  %v6114_v8 = vor.u32 %v7449_v5, %v6111_v3  ;;  %v5893_v9 = vld [vmem:[%s8828_s0 + $0xa0] sm:$0xf]  ;;  %v6066_v33 = vor.u32 %v7437_v28, %v6063_v29  ;;  %v5847_v35 = vld [vmem:[%s8828_s0 + $0x58] sm:$0xf0]  ;;  %v5821_v41 = vld [vmem:[%s8828_s0 + $0x10] sm:$0xf] }
 0x2a9   : > { %v1462_v15 = vsel %vm1461_vm10, %v9084_v20, %v1458_v10  ;;  %v6182_v20 = vor.u32 %v7470_v45, %v6181_v18  ;;  %v7398_v10 = vld [vmem:[%s8828_s0 + $0xb4] sm:$0xf0]  ;;  %v6087_v45 = vld [vmem:[%s8828_s0 + $0x238] sm:$0xf0]  ;;  %v5845_v31 = vld [vmem:[%s8828_s0 + $0x40] sm:$0xf] }
 0x2aa   : > { %2093 = vmatmul.bf16.vlgmr.msra.gmra.mxu0 %v9128_v11  ;;  %2111 = vmatmul.bf16.vlgmr.msra.gmra.mxu1 %v9130_v12  ;;  %v1467_v25 = vmul.f32 %v1462_v15, %v8916_v57  ;;  %v1468_v26 = vmul.f32 %v1462_v15, %v8918_v58  ;;  %v7413_v57 = vld [vmem:[%s8828_s0 + $0x134] sm:$0xf]  ;;  %v5967_v58 = vld [vmem:[%s8828_s0 + $0x148] sm:$0xf0]  ;;  %v5894_v14 = vor.u32 %v7398_v10, %v5893_v9  ;;  %v7446_v15 = vld [vmem:[%s8828_s0 + $0x234] sm:$0xf0] }
 0x2ab   : > { %2129 = vmatmul.bf16.vlgmr.msra.gmra.mxu2 %v9128_v11  ;;  %2147 = vmatmul.bf16.vlgmr.msra.gmra.mxu3 %v9130_v12  ;;  %v5970_v34 = vor.u32 %v7413_v57, %v5967_v58  ;;  %v6086_v18 = vor.u32 %v7446_v15, %v6085_v13  ;;  %v7434_v57 = vld [vmem:[%s8828_s0 + $0x1d4] sm:$0xf0]  ;;  %v6039_v40 = vld [vmem:[%s8828_s0 + $0x1d8] sm:$0xf0]  ;;  %v7380_v42 = vld [vmem:[%s8828_s0 + $0x24] sm:$0xf0] }
 0x2ac   : > { %2229 = vmatpush.bf16.msra.mxu0 %v5990_v19  ;;  %2247 = vmatpush.bf16.msra.mxu1 %v6182_v20  ;;  %v1478_v48 = vmul.f32 %v9057_v54, %v1467_v25  ;;  %v1479_v49 = vmul.f32 %v9059_v59, %v1468_v26  ;;  %v7404_v54 = vld [vmem:[%s8828_s0 + $0xe4] sm:$0xf0]  ;;  %v7443_v19 = vld [vmem:[%s8828_s0 + $0x224] sm:$0xf]  ;;  %v6062_v25 = vor.u32 %v7440_v47, %v6061_v23  ;;  %v7389_v26 = vld [vmem:[%s8828_s0 + $0x74] sm:$0xf] }
 0x2ad   : > { %2265 = vmatpush.bf16.msra.mxu2 %v5994_v22  ;;  %2283 = vmatpush.bf16.msra.mxu3 %v6186_v27  ;;  %v5918_v0 = vor.u32 %v7404_v54, %v5917_v37  ;;  %v6090_v20 = vor.u32 %v7443_v19, %v6087_v45  ;;  %v7392_v22 = vld [vmem:[%s8828_s0 + $0x84] sm:$0xf0]  ;;  %v5871_v27 = vld [vmem:[%s8828_s0 + $0x88] sm:$0xf0]  ;;  %v7377_v52 = vld [vmem:[%s8828_s0 + $0x14] sm:$0xf] }
 0x2ae   : > { %v1489_v59 = vadd.f32 %v9072_v6, %v1478_v48  ;;  %v1490_v56 = vadd.f32 %v9096_v30, %v1479_v49  ;;  %v5922_v30 = vor.u32 %v7401_v63, %v5919_v2  ;;  %v5870_v24 = vor.u32 %v7392_v22, %v5869_v46  ;;  %v6013_v48 = vld [vmem:[%s8828_s0 + $0x190] sm:$0xf]  ;;  %v7428_v49 = vld [vmem:[%s8828_s0 + $0x1a4] sm:$0xf0]  ;;  %v5823_v37 = vld [vmem:[%s8828_s0 + $0x28] sm:$0xf0] }
 0x2af   : > { %v5874_v58 = vor.u32 %v7389_v26, %v5871_v27  ;;  %v5826_v54 = vor.u32 %v7377_v52, %v5823_v37 }
 0x2b0   : > { %2230 = vmatpush.bf16.msra.mxu0 %v5966_v32  ;;  %2248 = vmatpush.bf16.msra.mxu1 %v6158_v4  ;;  %v9177_v7 = vpack.c.bf16 %v1489_v59, %v1489_v59  ;;  %v9179_v6 = vpack.c.bf16 %v1490_v56, %v1490_v56  ;;  %v7386_v32 = vld [vmem:[%s8828_s0 + $0x54] sm:$0xf0]  ;;  %v6037_v4 = vld [vmem:[%s8828_s0 + $0x1c0] sm:$0xf] }
 0x2b1   : > { %2266 = vmatpush.bf16.msra.mxu2 %v5970_v34  ;;  %2284 = vmatpush.bf16.msra.mxu3 %v6162_v39  ;;  %v7383_v34 = vld [vmem:[%s8828_s0 + $0x44] sm:$0xf]  ;;  %v5846_v36 = vor.u32 %v7386_v32, %v5845_v31  ;;  %v6038_v38 = vor.u32 %v7434_v57, %v6037_v4 }
 0x2b2   : > { %v7431_v39 = vld [vmem:[%s8828_s0 + $0x1c4] sm:$0xf]  ;;  %v5850_v50 = vor.u32 %v7383_v34, %v5847_v35 }
 0x2b3   : > { %v6042_v51 = vor.u32 %v7431_v39, %v6039_v40 }
 0x2b4   : > { %2231 = vmatpush.bf16.msra.mxu0 %v5942_v44  ;;  %2249 = vmatpush.bf16.msra.mxu1 %v6134_v53  ;;  %v5822_v44 = vor.u32 %v7380_v42, %v5821_v41  ;;  %v6014_v53 = vor.u32 %v7428_v49, %v6013_v48 }
 0x2b5   : > { %2267 = vmatpush.bf16.msra.mxu2 %v5946_v60  ;;  %2285 = vmatpush.bf16.msra.mxu3 %v6138_v61  ;;  %v7425_v60 = vld [vmem:[%s8828_s0 + $0x194] sm:$0xf]  ;;  %v6015_v61 = vld [vmem:[%s8828_s0 + $0x1a8] sm:$0xf0] }
 0x2b6   : > { %v6018_v62 = vor.u32 %v7425_v60, %v6015_v61 }
 0x2b8   : > { %2232 = vmatpush.bf16.msra.mxu0 %v5918_v0  ;;  %2250 = vmatpush.bf16.msra.mxu1 %v6110_v1 }
 0x2b9   : > { %2268 = vmatpush.bf16.msra.mxu2 %v5922_v30  ;;  %2286 = vmatpush.bf16.msra.mxu3 %v6114_v8 }
 0x2ba   : > { %2098 = vmatmul.bf16.gmra.mxu0 %v9177_v7  ;;  %2116 = vmatmul.bf16.gmra.mxu1 %v9179_v6 }
 0x2bb   : > { %2134 = vmatmul.bf16.gmra.mxu2 %v9177_v7  ;;  %2152 = vmatmul.bf16.gmra.mxu3 %v9179_v6 }
 0x2bc   : > { %2233 = vmatpush.bf16.msra.mxu0 %v5894_v14  ;;  %2251 = vmatpush.bf16.msra.mxu1 %v6086_v18  ;;  %v9244_v18 = vld [vmem:[%s8834_s4] sm:$0x3f] }
 0x2bd   : > { %2269 = vmatpush.bf16.msra.mxu2 %v5898_v21  ;;  %2287 = vmatpush.bf16.msra.mxu3 %v6090_v20  ;;  %v1595_v19 = vperm.slane %v9244_v18, 2  ;;  %v1596_v26 = vperm.slane %v9244_v18, 3  ;;  %v1594_v40 = vperm.slane %v9244_v18, 1 }
 0x2c0   : > { %2234 = vmatpush.bf16.msra.mxu0 %v5870_v24  ;;  %2252 = vmatpush.bf16.msra.mxu1 %v6062_v25  ;;  %v1593_v25 = vperm.slane %v9244_v18, 0 }
 0x2c1   : > { %2270 = vmatpush.bf16.msra.mxu2 %v5874_v58  ;;  %2288 = vmatpush.bf16.msra.mxu3 %v6066_v33 }
 0x2c4   : > { %2235 = vmatpush.bf16.msra.mxu0 %v5846_v36  ;;  %2253 = vmatpush.bf16.msra.mxu1 %v6038_v38 }
 0x2c5   : > { %2271 = vmatpush.bf16.msra.mxu2 %v5850_v50  ;;  %2289 = vmatpush.bf16.msra.mxu3 %v6042_v51 }
 0x2c8   : > { %2236 = vmatpush.bf16.msra.mxu0 %v5822_v44  ;;  %2254 = vmatpush.bf16.msra.mxu1 %v6014_v53 }
 0x2c9   : > { %2272 = vmatpush.bf16.msra.mxu2 %v5826_v54  ;;  %2290 = vmatpush.bf16.msra.mxu3 %v6018_v62 }
 0x2ca   : > { %2165 = vmatmul.bf16.vlgmr.msrb.gmra.mxu0 %v9128_v11  ;;  %2183 = vmatmul.bf16.vlgmr.msrb.gmra.mxu1 %v9130_v12 }
 0x2cb   : > { %2201 = vmatmul.bf16.vlgmr.msrb.gmra.mxu2 %v9128_v11  ;;  %2219 = vmatmul.bf16.vlgmr.msrb.gmra.mxu3 %v9130_v12 }
 0x2da   : > { %2170 = vmatmul.bf16.gmra.mxu0 %v9177_v7  ;;  %2188 = vmatmul.bf16.gmra.mxu1 %v9179_v6 }
 0x2db   : > { %2206 = vmatmul.bf16.gmra.mxu2 %v9177_v7  ;;  %2224 = vmatmul.bf16.gmra.mxu3 %v9179_v6 }
 0x2ea   : > { %2237 = vmatmul.bf16.vlgmr.msra.gmra.mxu0 %v9128_v11  ;;  %2255 = vmatmul.bf16.vlgmr.msra.gmra.mxu1 %v9130_v12 }
 0x2eb   : > { %2273 = vmatmul.bf16.vlgmr.msra.gmra.mxu2 %v9128_v11  ;;  %2291 = vmatmul.bf16.vlgmr.msra.gmra.mxu3 %v9130_v12 }
 0x2fa   : > { %2242 = vmatmul.bf16.gmra.mxu0 %v9177_v7  ;;  %2260 = vmatmul.bf16.gmra.mxu1 %v9179_v6 }
 0x2fb   : > { %2278 = vmatmul.bf16.gmra.mxu2 %v9177_v7  ;;  %2296 = vmatmul.bf16.gmra.mxu3 %v9179_v6 }
 0x327   : > { %v2094_v55 = vpop.f32.mrf.mxu0  ;;  %v2112_v59 = vpop.f32.mrf.mxu1 }
 0x328   : > { %v2095_v33 = vadd.f32 %v2094_v55, %v1593_v25 }
 0x32a   : > { %v2113_v42 = vadd.f32 %v2112_v59, %v2095_v33 }
 0x32c   : > { %v2301_v61 = vmul.f32 0.088388346, %v2113_v42 }
 0x32e   : > { %v2130_v56 = vpop.f32.mrf.mxu2  ;;  %v9233_v63 = vpop.f32.mrf.mxu3 }
 0x32f   : > { %v2096_v0 = vpop.f32.mrf.mxu0  ;;  %v2114_v1 = vpop.f32.mrf.mxu1  ;;  %v2131_v60 = vadd.f32 %v2130_v56, %v1594_v40 }
 0x330   : > { %v2097_v31 = vadd.f32 %v2096_v0, %v1593_v25 }
 0x332   : > { %v2115_v36 = vadd.f32 %v2114_v1, %v2097_v31  ;;  %v2149_v1 = vadd.f32 %v9233_v63, %v2131_v60 }
 0x334   : > { %v2302_v52 = vmul.f32 0.088388346, %v2115_v36 }
 0x336   : > { %v2132_v2 = vpop.f32.mrf.mxu2  ;;  %v2150_v11 = vpop.f32.mrf.mxu3  ;;  %v2304_v55 = vpack.c.bf16 %v2302_v52, %v2301_v61 }
 0x337   : > { %v9235_v5 = vpop.f32.mrf.mxu0  ;;  %v9237_v12 = vpop.f32.mrf.mxu1  ;;  %v2133_v49 = vadd.f32 %v2132_v2, %v1594_v40 }
 0x339   : > { %v2151_v62 = vadd.f32 %v2150_v11, %v2133_v49 }
 0x33b   : > { %v2400_v59 = vmul.f32 0.088388346, %v2151_v62 }
 0x33e   : > { %v9239_v3 = vpop.f32.mrf.mxu2  ;;  %v9241_v30 = vpop.f32.mrf.mxu3 }
 0x33f   : > { %v2101_v7 = vpop.f32.mrf.mxu0  ;;  %v2119_v6 = vpop.f32.mrf.mxu1  ;;  %v2136_v11 = vadd.f32 %v9239_v3, %v1594_v40  ;;  %v7916_v40 = vld [vmem:[%s10502_s17] ss:$0 sm:$0xff] }
 0x340   : > { %v2100_v6 = vadd.f32 %v9235_v5, %v1593_v25 }
 0x341   : > { %v2154_v5 = vadd.f32 %v9241_v30, %v2136_v11 }
 0x342   : > { %v2118_v56 = vadd.f32 %v9237_v12, %v2100_v6  ;;  %v1598_v12 = vperm.slane %v9244_v18, 5 }
 0x343   : > { %v2401_v3 = vmul.f32 0.088388346, %v2154_v5 }
 0x346   : > { %v2137_v8 = vpop.f32.mrf.mxu2  ;;  %v2155_v9 = vpop.f32.mrf.mxu3 }
 0x347   : > { %v2166_v10 = vpop.f32.mrf.mxu0  ;;  %v2184_v13 = vpop.f32.mrf.mxu1 }
 0x348   : > { %v2167_v27 = vadd.f32 %v2166_v10, %v1595_v19  ;;  %v2399_v10 = vmul.f32 0.088388346, %v2149_v1 }
 0x34a   : > { %v2185_v35 = vadd.f32 %v2184_v13, %v2167_v27  ;;  %v2402_v13 = vpack.c.bf16 %v2400_v59, %v2399_v10 }
 0x34e   : > { %v2202_v14 = vpop.f32.mrf.mxu2  ;;  %v2220_v15 = vpop.f32.mrf.mxu3 }
 0x34f   : > { %v2168_v16 = vpop.f32.mrf.mxu0  ;;  %v2186_v17 = vpop.f32.mrf.mxu1  ;;  %v2203_v48 = vadd.f32 %v2202_v14, %v1596_v26  ;;  %v1597_v14 = vperm.slane %v9244_v18, 4 }
 0x350   : > { %v2169_v47 = vadd.f32 %v2168_v16, %v1595_v19  ;;  %v2303_v16 = vmul.f32 0.088388346, %v2118_v56 }
 0x351   : > { %v2221_v54 = vadd.f32 %v2220_v15, %v2203_v48 }
 0x352   : > { %v2187_v58 = vadd.f32 %v2186_v17, %v2169_v47 }
 0x354   : > { %v2306_v41 = vpack.c.bf16 %v2187_v58, %v2185_v35  ;;  %v2403_v58 = vpack.c.bf16 %v2401_v3, %v2401_v3 }
 0x356   : > { %v2204_v45 = vpop.f32.mrf.mxu2  ;;  %v2222_v46 = vpop.f32.mrf.mxu3 }
 0x357   : > { %v2171_v21 = vpop.f32.mrf.mxu0  ;;  %v2189_v20 = vpop.f32.mrf.mxu1  ;;  %v2205_v38 = vadd.f32 %v2204_v45, %v1596_v26 }
 0x358   : > { %v2172_v22 = vadd.f32 %v2171_v21, %v1595_v19 }
 0x359   : > { %v2223_v44 = vadd.f32 %v2222_v46, %v2205_v38 }
 0x35a   : > { %v2190_v23 = vadd.f32 %v2189_v20, %v2172_v22  ;;  %v2305_v22 = vpack.c.bf16 %v2303_v16, %v2303_v16 }
 0x35b   : > { %v2404_v0 = vpack.c.bf16 %v2223_v44, %v2221_v54 }
 0x35c   : > { %v2307_v24 = vpack.c.bf16 %v2190_v23, %v2190_v23 }
 0x35e   : > { %v2207_v28 = vpop.f32.mrf.mxu2  ;;  %v2225_v29 = vpop.f32.mrf.mxu3  ;;  %2320 = vmatpush.bf16.xpose.msrb.mxu0 %v2307_v24 }
 0x35f   : > { %v2208_v32 = vadd.f32 %v2207_v28, %v1596_v26  ;;  %v2173_v4 = vpop.f32.mrf.mxu0  ;;  %v2191_v57 = vpop.f32.mrf.mxu1 }
 0x361   : > { %v2226_v34 = vadd.f32 %v2225_v29, %v2208_v32 }
 0x363   : > { %v2405_v39 = vpack.c.bf16 %v2226_v34, %v2226_v34 }
 0x365   : > { %2418 = vmatpush.bf16.xpose.msrb.mxu2 %v2405_v39 }
 0x366   : > { %v2209_v50 = vpop.f32.mrf.mxu2  ;;  %v2227_v51 = vpop.f32.mrf.mxu3  ;;  %2321 = vmatpush.bf16.xpose.msrb.mxu0 %v2306_v41 }
 0x367   : > { %v2238_v53 = vpop.f32.mrf.mxu0  ;;  %v2256_v37 = vpop.f32.mrf.mxu1  ;;  %v7917_v50 = vld [vmem:[%s10502_s17] ss:$0 sm:$0xff] }
 0x368   : > { %v2239_v20 = vadd.f32 %v2238_v53, %v1597_v14 }
 0x36a   : > { %v2257_v27 = vadd.f32 %v2256_v37, %v2239_v20 }
 0x36d   : > { %2419 = vmatpush.bf16.xpose.msrb.mxu2 %v2404_v0  ;;  %2322 = vmatmul.bf16.vlgmr.msrb.gmra.mxu0 %v2304_v55 }
 0x36e   : > { %v2274_v7 = vpop.f32.mrf.mxu2  ;;  %v2292_v2 = vpop.f32.mrf.mxu3 }
 0x36f   : > { %v2240_v8 = vpop.f32.mrf.mxu0  ;;  %v2258_v9 = vpop.f32.mrf.mxu1  ;;  %v2275_v57 = vadd.f32 %v2274_v7, %v1598_v12 }
 0x370   : > { %v2241_v46 = vadd.f32 %v2240_v8, %v1597_v14 }
 0x371   : > { %v2293_v35 = vadd.f32 %v2292_v2, %v2275_v57  ;;  %v6249_v57 = vld [vmem:[%s8836_s13 + $0x70] sm:$0xf] }
 0x372   : > { %v2259_v47 = vadd.f32 %v2258_v9, %v2241_v46 }
 0x374   : > { %2420 = vmatmul.bf16.vlgmr.msrb.gmra.mxu2 %v2402_v13  ;;  %v2308_v32 = vpack.c.bf16 %v2259_v47, %v2257_v27 }
 0x376   : > { %v2276_v15 = vpop.f32.mrf.mxu2  ;;  %v2294_v63 = vpop.f32.mrf.mxu3 }
 0x377   : > { %v2243_v17 = vpop.f32.mrf.mxu0  ;;  %v2261_v19 = vpop.f32.mrf.mxu1  ;;  %v2277_v30 = vadd.f32 %v2276_v15, %v1598_v12 }
 0x378   : > { %v2244_v45 = vadd.f32 %v2243_v17, %v1597_v14 }
 0x379   : > { %v2295_v18 = vadd.f32 %v2294_v63, %v2277_v30 }
 0x37a   : > { %v2262_v21 = vadd.f32 %v2261_v19, %v2244_v45 }
 0x37b   : > { %v2406_v39 = vpack.c.bf16 %v2295_v18, %v2293_v35  ;;  %v6241_v35 = vld [vmem:[%s8836_s13 + $0x60] sm:$0xf] }
 0x37c   : > { %v2309_v23 = vpack.c.bf16 %v2262_v21, %v2262_v21 }
 0x37d   : > { %2327 = vmatmul.bf16.gmra.mxu0 %v2305_v22 }
 0x37e   : > { %v2376_v24 = vsel %vm2374_vm11, %v2309_v23, 0  ;;  %v2279_v25 = vpop.f32.mrf.mxu2  ;;  %v2297_v26 = vpop.f32.mrf.mxu3 }
 0x37f   : > { %v2280_v28 = vadd.f32 %v2279_v25, %v1598_v12  ;;  %v2245_v29 = vpop.f32.mrf.mxu0  ;;  %v2263_v31 = vpop.f32.mrf.mxu1  ;;  %2384 = vmatpush.bf16.msrb.mxu1 %v2376_v24 }
 0x381   : > { %v2298_v4 = vadd.f32 %v2297_v26, %v2280_v28 }
 0x383   : > { %v2407_v33 = vpack.c.bf16 %v2298_v4, %v2298_v4  ;;  %2385 = vmatpush.bf16.msrb.mxu1 %v2308_v32 }
 0x384   : > { %2425 = vmatmul.bf16.gmra.mxu2 %v2403_v58  ;;  %v7486_v58 = vld [vmem:[%s8836_s13 + $0x74] sm:$0xf0] }
 0x385   : > { %v2472_v34 = vsel %vm2374_vm11, %v2407_v33, 0  ;;  %v7485_v33 = vld [vmem:[%s8836_s13 + $0x74] sm:$0xf]  ;;  %v6250_v18 = vor.u32 %v7486_v58, %v6249_v57  ;;  %v7478_v57 = vld [vmem:[%s8836_s13 + $0x34] sm:$0xf0] }
 0x386   : > { %v2281_v36 = vpop.f32.mrf.mxu2  ;;  %v2299_v38 = vpop.f32.mrf.mxu3  ;;  %2480 = vmatpush.bf16.msrb.mxu3 %v2472_v34  ;;  %v6251_v34 = vld [vmem:[%s8836_s13 + $0x78] sm:$0xf0] }
 0x387   : > { %v7484_v36 = vld [vmem:[%s8836_s13 + $0x64] sm:$0xf0]  ;;  %v6254_v38 = vor.u32 %v7485_v33, %v6251_v34  ;;  %2703 = vmatpush.bf16.msra.mxu0 %v6250_v18  ;;  %v7477_v18 = vld [vmem:[%s8836_s13 + $0x34] sm:$0xf] }
 0x389   : > { %2739 = vmatpush.bf16.msra.mxu2 %v6254_v38 }
 0x38a   : > { %2481 = vmatpush.bf16.msrb.mxu3 %v2406_v39  ;;  %v7483_v39 = vld [vmem:[%s8836_s13 + $0x64] sm:$0xf] }
 0x3ea   : > { %v2323_v41 = vpop.f32.mrf.mxu0 }
 0x3eb   : > { %v2324_v42 = vadd.f32 %v7916_v40, %v2323_v41  ;;  %v6313_v41 = vld [vmem:[%s8836_s13 + $0xf0] sm:$0xf] }
 0x3ed   : > { %v2333_v48 = vsel %vm2332_vm12, %v2324_v42, -inf }
 0x3ee   : > { %2334 = vmax.xlane.f32.xlu2 %v2333_v48  ;;  %v6242_v48 = vor.u32 %v7484_v36, %v6241_v35 }
 0x3f0   : > { %2704 = vmatpush.bf16.msra.mxu0 %v6242_v48 }
 0x3f2   : > { %v2325_v49 = vpop.f32.mrf.mxu0 }
 0x3f3   : > { %v2326_v61 = vadd.f32 %v7916_v40, %v2325_v49  ;;  %v7502_v49 = vld [vmem:[%s8836_s13 + $0xf4] sm:$0xf0] }
 0x3f5   : > { %v2336_v0 = vsel %vm2332_vm12, %v2326_v61, -inf }
 0x3f7   : > { %v2421_v51 = vpop.f32.mrf.mxu2 }
 0x3f8   : > { %v2422_v52 = vadd.f32 %v7917_v50, %v2421_v51  ;;  %v6315_v51 = vld [vmem:[%s8836_s13 + $0xf8] sm:$0xf0] }
 0x3fa   : > { %v2430_v44 = vsel %vm2332_vm12, %v2422_v52, -inf  ;;  %v2328_v53 = vpop.f32.mrf.mxu0 }
 0x3fb   : > { %2431 = vmax.xlane.f32.xlu0 %v2430_v44  ;;  %v2329_v37 = vadd.f32 %v7916_v40, %v2328_v53  ;;  %v6243_v40 = vld [vmem:[%s8836_s13 + $0x68] sm:$0xf0]  ;;  %v6314_v53 = vor.u32 %v7502_v49, %v6313_v41  ;;  %v6209_v49 = vld [vmem:[%s8836_s13 + $0x20] sm:$0xf] }
 0x3fc   : > { %v6246_v44 = vor.u32 %v7483_v39, %v6243_v40 }
 0x3fd   : > { %v2339_v60 = vsel %vm2332_vm12, %v2329_v37, -inf  ;;  %2721 = vmatpush.bf16.msra.mxu1 %v6314_v53 }
 0x3fe   : > { %2340 = vmax.xlane.f32.xlu2 %v2339_v60  ;;  %v6233_v60 = vld [vmem:[%s8836_s13 + $0x50] sm:$0xf]  ;;  %2740 = vmatpush.bf16.msra.mxu2 %v6246_v44  ;;  %v6211_v44 = vld [vmem:[%s8836_s13 + $0x28] sm:$0xf0] }
 0x3ff   : > { %v2423_v54 = vpop.f32.mrf.mxu2 }
 0x400   : > { %v2424_v62 = vadd.f32 %v7917_v50, %v2423_v54  ;;  %v7481_v54 = vld [vmem:[%s8836_s13 + $0x54] sm:$0xf] }
 0x402   : > { %v2433_v55 = vsel %vm2332_vm12, %v2424_v62, -inf  ;;  %v2330_v1 = vpop.f32.mrf.mxu0 }
 0x403   : > { %2434 = vmax.xlane.f32.xlu1 %v2433_v55  ;;  %2337 = vmax.xlane.f32.xlu0 %v2336_v0  ;;  %v6305_v55 = vld [vmem:[%s8836_s13 + $0xe0] sm:$0xf]  ;;  %v7500_v0 = vld [vmem:[%s8836_s13 + $0xe4] sm:$0xf0] }
 0x404   : > { %v6306_v1 = vor.u32 %v7500_v0, %v6305_v55 }
 0x406   : > { %2722 = vmatpush.bf16.msra.mxu1 %v6306_v1  ;;  %v7473_v1 = vld [vmem:[%s8836_s13 + $0x14] sm:$0xf] }
 0x407   : > { %v2426_v59 = vpop.f32.mrf.mxu2 }
 0x408   : > { %v2427_v7 = vadd.f32 %v7917_v50, %v2426_v59  ;;  %v7501_v50 = vld [vmem:[%s8836_s13 + $0xf4] sm:$0xf]  ;;  %v7499_v59 = vld [vmem:[%s8836_s13 + $0xe4] sm:$0xf] }
 0x40a   : > { %v2436_v2 = vsel %vm2332_vm12, %v2427_v7, -inf }
 0x40b   : > { %2437 = vmax.xlane.f32.xlu1 %v2436_v2 }
 0x40f   : > { %v2428_v6 = vpop.f32.mrf.mxu2 }
 0x461   : > { %v2335_v8 = vpop.xlane.xlu2 %2334 }
 0x462   : > { %v2342_v9 = vsub.f32 %v2324_v42, %v2335_v8  ;;  %v6225_v8 = vld [vmem:[%s8836_s13 + $0x40] sm:$0xf] }
 0x464   : > { %v2345_v10 = vmul.f32 1.442695, %v2342_v9  ;;  %v7480_v9 = vld [vmem:[%s8836_s13 + $0x44] sm:$0xf0] }
 0x466   : > { %7926 = vpow2.f32 %v2345_v10 }
 0x46c   : > { %v9271_v13 = vpop.eup %7926 }
 0x46d   : > { %v2351_v56 = vsel %vm2332_vm12, %v9271_v13, 0.0 }
 0x46e   : > { %v2432_v11 = vpop.xlane.xlu0 %2431  ;;  %2352 = vadd.xlane.f32.xlu2 %v2351_v56 }
 0x46f   : > { %v2439_v14 = vsub.f32 %v2422_v52, %v2432_v11  ;;  %v6297_v11 = vld [vmem:[%s8836_s13 + $0xd0] sm:$0xf] }
 0x471   : > { %v2442_v15 = vmul.f32 1.442695, %v2439_v14  ;;  %v2341_v63 = vpop.xlane.xlu2 %2340  ;;  %v7498_v14 = vld [vmem:[%s8836_s13 + $0xd4] sm:$0xf0] }
 0x472   : > { %v2344_v16 = vsub.f32 %v2329_v37, %v2341_v63  ;;  %v6318_v37 = vor.u32 %v7501_v50, %v6315_v51  ;;  %v7476_v50 = vld [vmem:[%s8836_s13 + $0x24] sm:$0xf0]  ;;  %v7475_v51 = vld [vmem:[%s8836_s13 + $0x24] sm:$0xf] }
 0x473   : > { %7928 = vpow2.f32 %v2442_v15  ;;  %v7497_v15 = vld [vmem:[%s8836_s13 + $0xd4] sm:$0xf]  ;;  %v6214_v53 = vor.u32 %v7475_v51, %v6211_v44  ;;  %v8004_v44 = vld [vmem:[#allocation2 + $0x28] sm:$0xff] }
 0x474   : > { %v2349_v17 = vmul.f32 1.442695, %v2344_v16  ;;  %2757 = vmatpush.bf16.msra.mxu3 %v6318_v37  ;;  %v7479_v16 = vld [vmem:[%s8836_s13 + $0x44] sm:$0xf]  ;;  %v7493_v37 = vld [vmem:[%s8836_s13 + $0xb4] sm:$0xf] }
 0x476   : > { %7930 = vpow2.f32 %v2349_v17  ;;  %v2435_v19 = vpop.xlane.xlu1 %2434  ;;  %v2338_v45 = vpop.xlane.xlu0 %2337  ;;  %v6227_v17 = vld [vmem:[%s8836_s13 + $0x48] sm:$0xf0] }
 0x477   : > { %v2440_v46 = vsub.f32 %v2424_v62, %v2435_v19  ;;  %v2343_v5 = vsub.f32 %v2326_v61, %v2338_v45  ;;  %v7482_v61 = vld [vmem:[%s8836_s13 + $0x54] sm:$0xf0]  ;;  %v6235_v62 = vld [vmem:[%s8836_s13 + $0x58] sm:$0xf0] }
 0x478   : > { %v6234_v2 = vor.u32 %v7482_v61, %v6233_v60  ;;  %v6238_v56 = vor.u32 %v7481_v54, %v6235_v62  ;;  %v6299_v19 = vld [vmem:[%s8836_s13 + $0xd8] sm:$0xf0]  ;;  %v6201_v54 = vld [vmem:[%s8836_s13 + $0x10] sm:$0xf]  ;;  %v7474_v62 = vld [vmem:[%s8836_s13 + $0x14] sm:$0xf0] }
 0x479   : > { %v9275_v21 = vpop.eup %7928  ;;  %v2444_v20 = vmul.f32 1.442695, %v2440_v46  ;;  %v2347_v22 = vmul.f32 1.442695, %v2343_v5  ;;  %v6298_v46 = vor.u32 %v7498_v14, %v6297_v11  ;;  %v6302_v5 = vor.u32 %v7497_v15, %v6299_v19  ;;  %v6283_v61 = vld [vmem:[%s8836_s13 + $0xb8] sm:$0xf0] }
 0x47a   : > { %v2448_v23 = vsel %vm2332_vm12, %v9275_v21, 0.0  ;;  %2705 = vmatpush.bf16.msra.mxu0 %v6234_v2  ;;  %2741 = vmatpush.bf16.msra.mxu2 %v6238_v56  ;;  %v6286_v55 = vor.u32 %v7493_v37, %v6283_v61  ;;  %v6202_v0 = vor.u32 %v7474_v62, %v6201_v54  ;;  %v6273_v2 = vld [vmem:[%s8836_s13 + $0xa0] sm:$0xf]  ;;  %v7472_v14 = vld [vmem:[%s8836_s13 + $0x4] sm:$0xf0] }
 0x47b   : > { %7932 = vpow2.f32 %v2444_v20  ;;  %2449 = vadd.xlane.f32.xlu0 %v2448_v23  ;;  %v6289_v20 = vld [vmem:[%s8836_s13 + $0xc0] sm:$0xf]  ;;  %2723 = vmatpush.bf16.msra.mxu1 %v6298_v46  ;;  %v7471_v15 = vld [vmem:[%s8836_s13 + $0x4] sm:$0xf]  ;;  %v6265_v19 = vld [vmem:[%s8836_s13 + $0x90] sm:$0xf] }
 0x47c   : > { %v9279_v12 = vpop.eup %7930  ;;  %7934 = vpow2.f32 %v2347_v22  ;;  %v6193_v11 = vld [vmem:[%s8836_s13] sm:$0xf]  ;;  %v7489_v46 = vld [vmem:[%s8836_s13 + $0x94] sm:$0xf] }
 0x47d   : > { %v2357_v47 = vsel %vm2332_vm12, %v9279_v12, 0.0 }
 0x47e   : > { %v2438_v3 = vpop.xlane.xlu1 %2437  ;;  %2358 = vadd.xlane.f32.xlu2 %v2357_v47 }
 0x47f   : > { %v2441_v24 = vsub.f32 %v2427_v7, %v2438_v3  ;;  %v6307_v7 = vld [vmem:[%s8836_s13 + $0xe8] sm:$0xf0]  ;;  %v6226_v3 = vor.u32 %v7480_v9, %v6225_v8  ;;  %v7491_v8 = vld [vmem:[%s8836_s13 + $0xa4] sm:$0xf] }
 0x480   : > { %v6310_v6 = vor.u32 %v7499_v59, %v6307_v7  ;;  %v6203_v59 = vld [vmem:[%s8836_s13 + $0x18] sm:$0xf0] }
 0x481   : > { %v9283_v25 = vpop.eup %7932  ;;  %v2446_v26 = vmul.f32 1.442695, %v2441_v24  ;;  %v7496_v24 = vld [vmem:[%s8836_s13 + $0xc4] sm:$0xf0]  ;;  %2706 = vmatpush.bf16.msra.mxu0 %v6226_v3  ;;  %v6206_v7 = vor.u32 %v7473_v1, %v6203_v59  ;;  %v7487_v3 = vld [vmem:[%s8836_s13 + $0x84] sm:$0xf] }
 0x482   : > { %v9285_v27 = vpop.eup %7934  ;;  %v2451_v28 = vsel %vm2332_vm12, %v9283_v25, 0.0  ;;  %2758 = vmatpush.bf16.msra.mxu3 %v6310_v6  ;;  %v7492_v6 = vld [vmem:[%s8836_s13 + $0xa4] sm:$0xf0] }
 0x483   : > { %7936 = vpow2.f32 %v2446_v26  ;;  %2452 = vadd.xlane.f32.xlu1 %v2451_v28  ;;  %v2354_v29 = vsel %vm2332_vm12, %v9285_v27, 0.0  ;;  %v7495_v26 = vld [vmem:[%s8836_s13 + $0xc4] sm:$0xf]  ;;  %v6291_v28 = vld [vmem:[%s8836_s13 + $0xc8] sm:$0xf0]  ;;  %v6274_v9 = vor.u32 %v7492_v6, %v6273_v2 }
 0x484   : > { %2355 = vadd.xlane.f32.xlu0 %v2354_v29  ;;  %v6294_v36 = vor.u32 %v7495_v26, %v6291_v28  ;;  %v6259_v26 = vld [vmem:[%s8836_s13 + $0x88] sm:$0xf0]  ;;  %v8007_v6 = vld [vmem:[#allocation2] sm:$0xff] }
 0x485   : > { %v6262_v28 = vor.u32 %v7487_v3, %v6259_v26 }
 0x486   : > { %2759 = vmatpush.bf16.msra.mxu3 %v6302_v5 }
 0x489   : > { %v9291_v31 = vpop.eup %7936 }
 0x48a   : > { %v2454_v30 = vsel %vm2332_vm12, %v9291_v31, 0.0  ;;  %2760 = vmatpush.bf16.msra.mxu3 %v6294_v36 }
 0x48b   : > { %2455 = vadd.xlane.f32.xlu1 %v2454_v30 }
 0x48e   : > { %2761 = vmatpush.bf16.msra.mxu3 %v6286_v55 }
 0x4e1   : > { %v2353_v4 = vpop.xlane.xlu2 %2352 }
 0x4ee   : > { %v2450_v32 = vpop.xlane.xlu0 %2449 }
 0x4ef   : > { %7938 = vrcp.f32 %v2450_v32  ;;  %v6230_v32 = vor.u32 %v7479_v16, %v6227_v17  ;;  %v6195_v16 = vld [vmem:[%s8836_s13 + $0x8] sm:$0xf0] }
 0x4f0   : > { %7940 = vrcp.f32 %v2353_v4  ;;  %v6217_v4 = vld [vmem:[%s8836_s13 + $0x30] sm:$0xf]  ;;  %v6198_v17 = vor.u32 %v7471_v15, %v6195_v16 }
 0x4f1   : > { %v2359_v34 = vpop.xlane.xlu2 %2358  ;;  %2742 = vmatpush.bf16.msra.mxu2 %v6230_v32 }
 0x4f5   : > { %v7939_v10 = vpop.eup %7938 }
 0x4f6   : > { %v2453_v42 = vpop.xlane.xlu1 %2452  ;;  %v7941_v63 = vpop.eup %7940  ;;  %v2460_v23 = vmul.f32 %v7939_v10, %v9275_v21  ;;  %v6219_v21 = vld [vmem:[%s8836_s13 + $0x38] sm:$0xf0]  ;;  %v6275_v10 = vld [vmem:[%s8836_s13 + $0xa8] sm:$0xf0] }
 0x4f7   : > { %7942 = vrcp.f32 %v2453_v42  ;;  %v2356_v52 = vpop.xlane.xlu0 %2355  ;;  %v2363_v29 = vmul.f32 %v7941_v63, %v9271_v13  ;;  %v6218_v13 = vor.u32 %v7478_v57, %v6217_v4  ;;  %v6278_v56 = vor.u32 %v7491_v8, %v6275_v10 }
 0x4f8   : > { %7944 = vrcp.f32 %v2356_v52  ;;  %v6210_v52 = vor.u32 %v7476_v50, %v6209_v49  ;;  %v6194_v63 = vor.u32 %v7472_v14, %v6193_v11 }
 0x4f9   : > { %2707 = vmatpush.bf16.msra.mxu0 %v6218_v13  ;;  %2762 = vmatpush.bf16.msra.mxu3 %v6278_v56  ;;  %v2537_v13 = vld [vmem:[%s1052_s10] sm:$0x3] }
 0x4fd   : > { %v7943_v45 = vpop.eup %7942  ;;  %2708 = vmatpush.bf16.msra.mxu0 %v6210_v52 }
 0x4fe   : > { %v7945_v22 = vpop.eup %7944  ;;  %v2461_v47 = vmul.f32 %v7943_v45, %v9283_v25  ;;  %v2456_v33 = vpop.xlane.xlu1 %2455  ;;  %v6290_v25 = vor.u32 %v7496_v24, %v6289_v20  ;;  %v7490_v45 = vld [vmem:[%s8836_s13 + $0x94] sm:$0xf0]  ;;  %v6267_v20 = vld [vmem:[%s8836_s13 + $0x98] sm:$0xf0] }
 0x4ff   : > { %v2364_v30 = vmul.f32 %v7945_v22, %v9285_v27  ;;  %7946 = vrcp.f32 %v2456_v33  ;;  %v6222_v27 = vor.u32 %v7477_v18, %v6219_v21  ;;  %v6266_v5 = vor.u32 %v7490_v45, %v6265_v19  ;;  %v8008_v19 = vld [vmem:[#allocation2 + $0x18] sm:$0xff] }
 0x500   : > { %v2463_v58 = vpack.c.bf16 %v2461_v47, %v2460_v23  ;;  %7948 = vrcp.f32 %v2359_v34  ;;  %2724 = vmatpush.bf16.msra.mxu1 %v6290_v25  ;;  %v6270_v22 = vor.u32 %v7489_v46, %v6267_v20  ;;  %v6257_v23 = vld [vmem:[%s8836_s13 + $0x80] sm:$0xf]  ;;  %v7488_v47 = vld [vmem:[%s8836_s13 + $0x84] sm:$0xf0] }
 0x501   : > { %v2366_v35 = vpack.c.bf16 %v2364_v30, %v2363_v29  ;;  %2743 = vmatpush.bf16.msra.mxu2 %v6222_v27  ;;  %2709 = vmatpush.bf16.msra.mxu0 %v6202_v0  ;;  %v6258_v24 = vor.u32 %v7488_v47, %v6257_v23  ;;  %v2539_v27 = vperm.slane %v2537_v13, 0  ;;  %v8009_v46 = vld [vmem:[#allocation2 + $0x20] sm:$0xff] }
 0x502   : > { %6189 = vmatmul.msk.bf16.vlgmr.msrb.gmra.mxu3 %vm2332_vm12, %v2463_v58 }
 0x503   : > { %6187 = vmatmul.msk.bf16.vlgmr.msrb.gmra.mxu1 %vm2332_vm12, %v2366_v35  ;;  %2763 = vmatpush.bf16.msra.mxu3 %v6270_v22 }
 0x505   : > { %v7947_v38 = vpop.eup %7946  ;;  %2744 = vmatpush.bf16.msra.mxu2 %v6214_v53  ;;  %2710 = vmatpush.bf16.msra.mxu0 %v6194_v63 }
 0x506   : > { %v7949_v39 = vpop.eup %7948  ;;  %v2462_v40 = vmul.f32 %v7947_v38, %v9291_v31  ;;  %v6281_v31 = vld [vmem:[%s8836_s13 + $0xb0] sm:$0xf] }
 0x507   : > { %v2365_v41 = vmul.f32 %v7949_v39, %v9279_v12  ;;  %v7494_v12 = vld [vmem:[%s8836_s13 + $0xb4] sm:$0xf0]  ;;  %2764 = vmatpush.bf16.msra.mxu3 %v6262_v28  ;;  %v2540_v39 = vperm.slane %v2537_v13, 1 }
 0x508   : > { %v2464_v42 = vpack.c.bf16 %v2462_v40, %v2462_v40  ;;  %v6282_v60 = vor.u32 %v7494_v12, %v6281_v31  ;;  %v8005_v31 = vld [vmem:[#allocation2 + $0x10] sm:$0xff] }
 0x509   : > { %v2367_v48 = vpack.c.bf16 %v2365_v41, %v2365_v41  ;;  %2745 = vmatpush.bf16.msra.mxu2 %v6206_v7  ;;  %v8006_v7 = vld [vmem:[#allocation2 + $0x8] sm:$0xff] }
 0x50a   : > { %2725 = vmatpush.bf16.msra.mxu1 %v6282_v60 }
 0x50d   : > { %2746 = vmatpush.bf16.msra.mxu2 %v6198_v17 }
 0x50e   : > { %2726 = vmatpush.bf16.msra.mxu1 %v6274_v9 }
 0x512   : > { %6190 = vmatmul.msk.bf16.gmra.mxu3 %vm2332_vm12, %v2464_v42  ;;  %2727 = vmatpush.bf16.msra.mxu1 %v6266_v5 }
 0x513   : > { %6188 = vmatmul.msk.bf16.gmra.mxu1 %vm2332_vm12, %v2367_v48 }
 0x516   : > { %2728 = vmatpush.bf16.msra.mxu1 %v6258_v24 }
 0x580   : > { %v2387_v29 = vpop.f32.mrf.mxu1 }
 0x585   : > { %v2483_v30 = vpop.f32.mrf.mxu3 }
 0x588   : > { %v2389_v32 = vpop.f32.mrf.mxu1 }
 0x589   : > { %v2501_v4 = vpack.c.bf16 %v2389_v32, %v2387_v29 }
 0x58b   : > { %2711 = vmatmul.bf16.vlgmr.msra.gmra.mxu0 %v2501_v4  ;;  %2747 = vmatmul.bf16.vlgmr.msra.gmra.mxu2 %v2501_v4 }
 0x58d   : > { %v2485_v57 = vpop.f32.mrf.mxu3 }
 0x58e   : > { %v2502_v58 = vpack.c.bf16 %v2485_v57, %v2483_v30 }
 0x590   : > { %v2392_v33 = vpop.f32.mrf.mxu1  ;;  %2729 = vmatmul.bf16.vlgmr.msra.gmra.mxu1 %v2502_v58  ;;  %2765 = vmatmul.bf16.vlgmr.msra.gmra.mxu3 %v2502_v58 }
 0x591   : > { %v2503_v34 = vpack.c.bf16 %v2392_v33, %v2392_v33 }
 0x595   : > { %v2488_v18 = vpop.f32.mrf.mxu3 }
 0x596   : > { %v2504_v25 = vpack.c.bf16 %v2488_v18, %v2488_v18 }
 0x598   : > { %v2394_v21 = vpop.f32.mrf.mxu1 }
 0x59b   : > { %2716 = vmatmul.bf16.gmra.mxu0 %v2503_v34  ;;  %2752 = vmatmul.bf16.gmra.mxu2 %v2503_v34 }
 0x59d   : > { %v2490_v35 = vpop.f32.mrf.mxu3 }
 0x5a0   : > { %2734 = vmatmul.bf16.gmra.mxu1 %v2504_v25  ;;  %2770 = vmatmul.bf16.gmra.mxu3 %v2504_v25 }
 0x608   : > { %v2712_v36 = vpop.f32.mrf.mxu0 }
 0x609   : > { %v2713_v41 = vadd.f32 %v2712_v36, %v2539_v27 }
 0x60d   : > { %v2730_v38 = vpop.f32.mrf.mxu1 }
 0x60e   : > { %v2748_v40 = vpop.f32.mrf.mxu2  ;;  %v2731_v48 = vadd.f32 %v2730_v38, %v2713_v41  ;;  %v6801_v41 = vld [vmem:[%s8838_s15 + $0x3c0] sm:$0xf] }
 0x60f   : > { %v2749_v49 = vadd.f32 %v2748_v40, %v2540_v39  ;;  %v7563_v40 = vld [vmem:[%s8838_s15 + $0x1dc] sm:$0xf0] }
 0x610   : > { %v2714_v42 = vpop.f32.mrf.mxu0  ;;  %v9374_v53 = vadd.f32 %v8004_v44, %v2731_v48  ;;  %v7627_v48 = vld [vmem:[%s8838_s15 + $0x3dc] sm:$0xf0]  ;;  %v7623_v44 = vld [vmem:[%s8838_s15 + $0x3c4] sm:$0xf] }
 0x611   : > { %v2715_v60 = vadd.f32 %v2714_v42, %v2539_v27 }
 0x613   : > { %v2766_v50 = vpop.f32.mrf.mxu3 }
 0x614   : > { %v2767_v51 = vadd.f32 %v2766_v50, %v2749_v49  ;;  %v7559_v49 = vld [vmem:[%s8838_s15 + $0x1c4] sm:$0xf] }
 0x615   : > { %v2732_v52 = vpop.f32.mrf.mxu1  ;;  %v6547_v50 = vld [vmem:[%s8838_s15 + $0x1e0] sm:$0xf0] }
 0x616   : > { %v9376_v12 = vadd.f32 %v8005_v31, %v2767_v51  ;;  %v2750_v37 = vpop.f32.mrf.mxu2  ;;  %v2733_v62 = vadd.f32 %v2732_v52, %v2715_v60  ;;  %v6802_v51 = vor.u32 %v7627_v48, %v6801_v41  ;;  %v6550_v52 = vor.u32 %v7559_v49, %v6547_v50  ;;  %v6803_v31 = vld [vmem:[%s8838_s15 + $0x3e0] sm:$0xf0]  ;;  %v6513_v60 = vld [vmem:[%s8838_s15 + $0x180] sm:$0xf] }
 0x617   : > { %v2751_v55 = vadd.f32 %v2750_v37, %v2540_v39  ;;  %v6806_v37 = vor.u32 %v7623_v44, %v6803_v31  ;;  %v7527_v41 = vld [vmem:[%s8838_s15 + $0xc4] sm:$0xf]  ;;  %v6385_v44 = vld [vmem:[%s8838_s15 + $0x80] sm:$0xf] }
 0x618   : > { %v2717_v61 = vpop.f32.mrf.mxu0  ;;  %v2783_v54 = vadd.f32 %v9376_v12, %v9374_v53  ;;  %v9380_v2 = vadd.f32 %v8006_v7, %v2733_v62  ;;  %3688 = vmatpush.bf16.msrb.mxu1 %v6802_v51  ;;  %3706 = vmatpush.bf16.msrb.mxu2 %v6550_v52  ;;  %v7591_v50 = vld [vmem:[%s8838_s15 + $0x2c4] sm:$0xf]  ;;  %v7523_v31 = vld [vmem:[%s8838_s15 + $0x9c] sm:$0xf0] }
 0x619   : > { %v2718_v10 = vadd.f32 %v2717_v61, %v2539_v27  ;;  %v7555_v61 = vld [vmem:[%s8838_s15 + $0x19c] sm:$0xf0]  ;;  %3724 = vmatpush.bf16.msrb.mxu3 %v6806_v37  ;;  %v6675_v51 = vld [vmem:[%s8838_s15 + $0x2e0] sm:$0xf0] }
 0x61a   : > { %2784 = vadd.xlane.f32.xlu0 %v2783_v54  ;;  %v6769_v54 = vld [vmem:[%s8838_s15 + $0x380] sm:$0xf]  ;;  %v6514_v62 = vor.u32 %v7555_v61, %v6513_v60  ;;  %v6678_v52 = vor.u32 %v7591_v50, %v6675_v51  ;;  %v6386_v60 = vor.u32 %v7523_v31, %v6385_v44  ;;  %v7624_v51 = vld [vmem:[%s8838_s15 + $0x3cc] sm:$0xf] }
 0x61b   : > { %v2768_v0 = vpop.f32.mrf.mxu3  ;;  %v6641_v37 = vld [vmem:[%s8838_s15 + $0x280] sm:$0xf] }
 0x61c   : > { %v2769_v1 = vadd.f32 %v2768_v0, %v2751_v55  ;;  %v7619_v55 = vld [vmem:[%s8838_s15 + $0x39c] sm:$0xf0]  ;;  %v7551_v0 = vld [vmem:[%s8838_s15 + $0x184] sm:$0xf] }
 0x61d   : > { %v2735_v59 = vpop.f32.mrf.mxu1  ;;  %v7587_v61 = vld [vmem:[%s8838_s15 + $0x29c] sm:$0xf0] }
 0x61e   : > { %v9382_v8 = vadd.f32 %v8007_v6, %v2769_v1  ;;  %v2753_v9 = vpop.f32.mrf.mxu2  ;;  %v2736_v14 = vadd.f32 %v2735_v59, %v2718_v10  ;;  %v6515_v1 = vld [vmem:[%s8838_s15 + $0x1a0] sm:$0xf0]  ;;  %v6770_v59 = vor.u32 %v7619_v55, %v6769_v54  ;;  %v6642_v55 = vor.u32 %v7587_v61, %v6641_v37  ;;  %v6521_v37 = vld [vmem:[%s8838_s15 + $0x188] sm:$0xf] }
 0x61f   : > { %v2754_v15 = vadd.f32 %v2753_v9, %v2540_v39  ;;  %v6545_v39 = vld [vmem:[%s8838_s15 + $0x1c0] sm:$0xf]  ;;  %v6518_v7 = vor.u32 %v7551_v0, %v6515_v1  ;;  %v7615_v6 = vld [vmem:[%s8838_s15 + $0x384] sm:$0xf]  ;;  %v6777_v61 = vld [vmem:[%s8838_s15 + $0x388] sm:$0xf] }
 0x620   : > { %v2719_v56 = vpop.f32.mrf.mxu0  ;;  %v2786_v11 = vadd.f32 %v9382_v8, %v9380_v2  ;;  %v9386_v45 = vadd.f32 %v8008_v19, %v2736_v14  ;;  %v6546_v42 = vor.u32 %v7563_v40, %v6545_v39  ;;  %v6771_v9 = vld [vmem:[%s8838_s15 + $0x3a0] sm:$0xf0]  ;;  %3689 = vmatpush.bf16.msrb.mxu1 %v6770_v59  ;;  %v6737_v14 = vld [vmem:[%s8838_s15 + $0x340] sm:$0xf] }
 0x621   : > { %v6774_v10 = vor.u32 %v7615_v6, %v6771_v9  ;;  %3707 = vmatpush.bf16.msrb.mxu2 %v6518_v7  ;;  %v6481_v56 = vld [vmem:[%s8838_s15 + $0x140] sm:$0xf]  ;;  %v7519_v54 = vld [vmem:[%s8838_s15 + $0x84] sm:$0xf] }
 0x622   : > { %2787 = vadd.xlane.f32.xlu1 %v2786_v11  ;;  %3670 = vmatpush.bf16.msrb.mxu0 %v6546_v42  ;;  %v7547_v11 = vld [vmem:[%s8838_s15 + $0x15c] sm:$0xf0]  ;;  %v6419_v42 = vld [vmem:[%s8838_s15 + $0xe0] sm:$0xf0] }
 0x623   : > { %v2771_v63 = vpop.f32.mrf.mxu3  ;;  %3725 = vmatpush.bf16.msrb.mxu3 %v6774_v10  ;;  %v7595_v40 = vld [vmem:[%s8838_s15 + $0x2dc] sm:$0xf0]  ;;  %v6422_v49 = vor.u32 %v7527_v41, %v6419_v42  ;;  %v7583_v1 = vld [vmem:[%s8838_s15 + $0x284] sm:$0xf]  ;;  %v7560_v41 = vld [vmem:[%s8838_s15 + $0x1cc] sm:$0xf] }
 0x624   : > { %v2772_v16 = vadd.f32 %v2771_v63, %v2754_v15  ;;  %v6482_v15 = vor.u32 %v7547_v11, %v6481_v56  ;;  %v7611_v63 = vld [vmem:[%s8838_s15 + $0x35c] sm:$0xf0]  ;;  %v6643_v59 = vld [vmem:[%s8838_s15 + $0x2a0] sm:$0xf0]  ;;  %v6555_v42 = vld [vmem:[%s8838_s15 + $0x1e8] sm:$0xf0] }
 0x625   : > { %v2737_v17 = vpop.f32.mrf.mxu1  ;;  %v6738_v19 = vor.u32 %v7611_v63, %v6737_v14  ;;  %v6646_v7 = vor.u32 %v7583_v1, %v6643_v59  ;;  %v6353_v6 = vld [vmem:[%s8838_s15 + $0x40] sm:$0xf]  ;;  %v7511_v14 = vld [vmem:[%s8838_s15 + $0x44] sm:$0xf]  ;;  %v6558_v50 = vor.u32 %v7560_v41, %v6555_v42  ;;  %v7552_v1 = vld [vmem:[%s8838_s15 + $0x18c] sm:$0xf] }
 0x626   : > { %v9388_v5 = vadd.f32 %v8009_v46, %v2772_v16  ;;  %v2755_v20 = vpop.f32.mrf.mxu2  ;;  %3671 = vmatpush.bf16.msrb.mxu0 %v6514_v62  ;;  %v7543_v16 = vld [vmem:[%s8838_s15 + $0x144] sm:$0xf]  ;;  %v7515_v9 = vld [vmem:[%s8838_s15 + $0x5c] sm:$0xf0]  ;;  %v7600_v41 = vld [vmem:[%s8838_s15 + $0x30c] sm:$0xf] }
 0x627   : > { %v6483_v17 = vld [vmem:[%s8838_s15 + $0x160] sm:$0xf0]  ;;  %3690 = vmatpush.bf16.msrb.mxu1 %v6738_v19  ;;  %v6609_v10 = vld [vmem:[%s8838_s15 + $0x240] sm:$0xf]  ;;  %v6354_v56 = vor.u32 %v7515_v9, %v6353_v6  ;;  %v6523_v6 = vld [vmem:[%s8838_s15 + $0x1a8] sm:$0xf0] }
 0x628   : > { %v2789_v22 = vadd.f32 %v9388_v5, %v9386_v45  ;;  %v6486_v46 = vor.u32 %v7543_v16, %v6483_v17  ;;  %v7607_v20 = vld [vmem:[%s8838_s15 + $0x344] sm:$0xf]  ;;  %v7579_v11 = vld [vmem:[%s8838_s15 + $0x25c] sm:$0xf0]  ;;  %v7616_v9 = vld [vmem:[%s8838_s15 + $0x38c] sm:$0xf] }
 0x629   : > { %v6387_v62 = vld [vmem:[%s8838_s15 + $0xa0] sm:$0xf0]  ;;  %v6610_v16 = vor.u32 %v7579_v11, %v6609_v10  ;;  %v6779_v10 = vld [vmem:[%s8838_s15 + $0x3a8] sm:$0xf0] }
 0x62a   : > { %2790 = vadd.xlane.f32.xlu2 %v2789_v22  ;;  %v6739_v22 = vld [vmem:[%s8838_s15 + $0x360] sm:$0xf0]  ;;  %3672 = vmatpush.bf16.msrb.mxu0 %v6482_v15  ;;  %v6390_v0 = vor.u32 %v7519_v54, %v6387_v62  ;;  %v6782_v11 = vor.u32 %v7616_v9, %v6779_v10  ;;  %v6427_v9 = vld [vmem:[%s8838_s15 + $0xe8] sm:$0xf0] }
 0x62b   : > { %v2773_v23 = vpop.f32.mrf.mxu3  ;;  %3708 = vmatpush.bf16.msrb.mxu2 %v6486_v46  ;;  %v6355_v15 = vld [vmem:[%s8838_s15 + $0x60] sm:$0xf0] }
 0x62c   : > { %v6742_v23 = vor.u32 %v7607_v20, %v6739_v22  ;;  %v6358_v17 = vor.u32 %v7511_v14, %v6355_v15  ;;  %v7575_v19 = vld [vmem:[%s8838_s15 + $0x244] sm:$0xf]  ;;  %v6489_v14 = vld [vmem:[%s8838_s15 + $0x148] sm:$0xf] }
 0x62d   : > { %v6611_v46 = vld [vmem:[%s8838_s15 + $0x260] sm:$0xf0]  ;;  %v7548_v15 = vld [vmem:[%s8838_s15 + $0x164] sm:$0xf0] }
 0x62e   : > { %3726 = vmatpush.bf16.msrb.mxu3 %v6742_v23  ;;  %v6614_v22 = vor.u32 %v7575_v19, %v6611_v46  ;;  %v6321_v23 = vld [vmem:[%s8838_s15] sm:$0xf]  ;;  %v7612_v19 = vld [vmem:[%s8838_s15 + $0x364] sm:$0xf0]  ;;  %v7544_v46 = vld [vmem:[%s8838_s15 + $0x14c] sm:$0xf] }
 0x68d   : > { %v2785_v47 = vpop.xlane.xlu0 %2784 }
 0x68e   : > { %v2792_v3 = vmul.f32 %v2785_v47, %v8899_v43  ;;  %v6449_v47 = vld [vmem:[%s8838_s15 + $0x100] sm:$0xf] }
 0x690   : > { %v9394_v24 = vsub.f32 %v9374_v53, %v2792_v3  ;;  %v9397_v26 = vsub.f32 %v9376_v12, %v2792_v3  ;;  %v7539_v3 = vld [vmem:[%s8838_s15 + $0x11c] sm:$0xf0] }
 0x692   : > { %v2801_v28 = vmul.f32 %v9394_v24, %v9394_v24  ;;  %v2802_v29 = vmul.f32 %v9397_v26, %v9397_v26 }
 0x694   : > { %v2807_v30 = vadd.f32 %v2802_v29, %v2801_v28  ;;  %v6705_v28 = vld [vmem:[%s8838_s15 + $0x300] sm:$0xf]  ;;  %v6450_v29 = vor.u32 %v7539_v3, %v6449_v47 }
 0x695   : > { %v2788_v32 = vpop.xlane.xlu1 %2787  ;;  %v7507_v47 = vld [vmem:[%s8838_s15 + $0x1c] sm:$0xf0] }
 0x696   : > { %v2793_v4 = vmul.f32 %v2788_v32, %v8899_v43  ;;  %2808 = vadd.xlane.f32.xlu0 %v2807_v30  ;;  %v7603_v30 = vld [vmem:[%s8838_s15 + $0x31c] sm:$0xf0]  ;;  %v7535_v32 = vld [vmem:[%s8838_s15 + $0x104] sm:$0xf]  ;;  %3673 = vmatpush.bf16.msrb.mxu0 %v6450_v29  ;;  %v6322_v29 = vor.u32 %v7507_v47, %v6321_v23  ;;  %v7608_v23 = vld [vmem:[%s8838_s15 + $0x34c] sm:$0xf] }
 0x697   : > { %v6577_v3 = vld [vmem:[%s8838_s15 + $0x200] sm:$0xf]  ;;  %v6747_v47 = vld [vmem:[%s8838_s15 + $0x368] sm:$0xf0] }
 0x698   : > { %v9405_v57 = vsub.f32 %v9380_v2, %v2793_v4  ;;  %v9408_v58 = vsub.f32 %v9382_v8, %v2793_v4  ;;  %v6451_v4 = vld [vmem:[%s8838_s15 + $0x120] sm:$0xf0] }
 0x69a   : > { %v2803_v33 = vmul.f32 %v9405_v57, %v9405_v57  ;;  %v2804_v18 = vmul.f32 %v9408_v58, %v9408_v58 }
 0x69c   : > { %v2810_v21 = vadd.f32 %v2804_v18, %v2803_v33  ;;  %v6706_v33 = vor.u32 %v7603_v30, %v6705_v28  ;;  %v6454_v18 = vor.u32 %v7535_v32, %v6451_v4  ;;  %v7571_v30 = vld [vmem:[%s8838_s15 + $0x21c] sm:$0xf0]  ;;  %v7503_v32 = vld [vmem:[%s8838_s15 + $0x4] sm:$0xf] }
 0x69d   : > { %v2791_v34 = vpop.xlane.xlu2 %2790  ;;  %v6578_v4 = vor.u32 %v7571_v30, %v6577_v3  ;;  %v2781_v3 = vld [vmem:[%s1056_s19] sm:$0x3] }
 0x69e   : > { %v2794_v35 = vmul.f32 %v2791_v34, %v8899_v43  ;;  %2811 = vadd.xlane.f32.xlu1 %v2810_v21  ;;  %v7599_v21 = vld [vmem:[%s8838_s15 + $0x304] sm:$0xf]  ;;  %3691 = vmatpush.bf16.msrb.mxu1 %v6706_v33 }
 0x69f   : > { %v6707_v34 = vld [vmem:[%s8838_s15 + $0x320] sm:$0xf0]  ;;  %3709 = vmatpush.bf16.msrb.mxu2 %v6454_v18 }
 0x6a0   : > { %v9416_v25 = vsub.f32 %v9386_v45, %v2794_v35  ;;  %v9419_v36 = vsub.f32 %v9388_v5, %v2794_v35  ;;  %v6710_v35 = vor.u32 %v7599_v21, %v6707_v34  ;;  %v6323_v33 = vld [vmem:[%s8838_s15 + $0x20] sm:$0xf0] }
 0x6a1   : > { %v7567_v18 = vld [vmem:[%s8838_s15 + $0x204] sm:$0xf]  ;;  %v6326_v34 = vor.u32 %v7503_v32, %v6323_v33  ;;  %v6457_v33 = vld [vmem:[%s8838_s15 + $0x108] sm:$0xf] }
 0x6a2   : > { %v2805_v13 = vmul.f32 %v9416_v25, %v9416_v25  ;;  %v2806_v27 = vmul.f32 %v9419_v36, %v9419_v36  ;;  %3727 = vmatpush.bf16.msrb.mxu3 %v6710_v35  ;;  %v6579_v21 = vld [vmem:[%s8838_s15 + $0x220] sm:$0xf0] }
 0x6a3   : > { %3710 = vmatpush.bf16.msrb.mxu2 %v6422_v49  ;;  %v6582_v35 = vor.u32 %v7567_v18, %v6579_v21  ;;  %v7540_v18 = vld [vmem:[%s8838_s15 + $0x124] sm:$0xf0] }
 0x6a4   : > { %v2813_v38 = vadd.f32 %v2806_v27, %v2805_v13  ;;  %v6417_v13 = vld [vmem:[%s8838_s15 + $0xc0] sm:$0xf] }
 0x6a5   : > { %v7531_v27 = vld [vmem:[%s8838_s15 + $0xdc] sm:$0xf0] }
 0x6a6   : > { %2814 = vadd.xlane.f32.xlu2 %v2813_v38  ;;  %v6673_v38 = vld [vmem:[%s8838_s15 + $0x2c0] sm:$0xf]  ;;  %v6418_v39 = vor.u32 %v7531_v27, %v6417_v13  ;;  %3728 = vmatpush.bf16.msrb.mxu3 %v6678_v52  ;;  %v6553_v13 = vld [vmem:[%s8838_s15 + $0x1c8] sm:$0xf]  ;;  %v6811_v52 = vld [vmem:[%s8838_s15 + $0x3e8] sm:$0xf0] }
 0x6a7   : > { %v6674_v48 = vor.u32 %v7595_v40, %v6673_v38  ;;  %3711 = vmatpush.bf16.msrb.mxu2 %v6390_v0  ;;  %v7564_v27 = vld [vmem:[%s8838_s15 + $0x1e4] sm:$0xf0]  ;;  %v6814_v31 = vor.u32 %v7624_v51, %v6811_v52 }
 0x6a8   : > { %3674 = vmatpush.bf16.msrb.mxu0 %v6418_v39  ;;  %v6809_v38 = vld [vmem:[%s8838_s15 + $0x3c8] sm:$0xf]  ;;  %v6554_v39 = vor.u32 %v7564_v27, %v6553_v13  ;;  %v7536_v27 = vld [vmem:[%s8838_s15 + $0x10c] sm:$0xf] }
 0x6a9   : > { %3692 = vmatpush.bf16.msrb.mxu1 %v6674_v48  ;;  %v7628_v40 = vld [vmem:[%s8838_s15 + $0x3e4] sm:$0xf0] }
 0x6aa   : > { %3729 = vmatpush.bf16.msrb.mxu3 %v6646_v7  ;;  %v6810_v49 = vor.u32 %v7628_v40, %v6809_v38  ;;  %v7620_v0 = vld [vmem:[%s8838_s15 + $0x3a4] sm:$0xf0]  ;;  %v6459_v40 = vld [vmem:[%s8838_s15 + $0x128] sm:$0xf0] }
 0x6ab   : > { %3712 = vmatpush.bf16.msrb.mxu2 %v6358_v17  ;;  %v6778_v7 = vor.u32 %v7620_v0, %v6777_v61  ;;  %v6745_v17 = vld [vmem:[%s8838_s15 + $0x348] sm:$0xf] }
 0x6ac   : > { %3675 = vmatpush.bf16.msrb.mxu0 %v6386_v60  ;;  %v7556_v60 = vld [vmem:[%s8838_s15 + $0x1a4] sm:$0xf0] }
 0x6ad   : > { %3693 = vmatpush.bf16.msrb.mxu1 %v6642_v55  ;;  %v6522_v55 = vor.u32 %v7556_v60, %v6521_v37  ;;  %v7604_v13 = vld [vmem:[%s8838_s15 + $0x324] sm:$0xf0]  ;;  %v9554_v37 = vperm.slane %v2781_v3, 0  ;;  %v9556_v60 = vperm.slane %v2781_v3, 1 }
 0x6ae   : > { %3730 = vmatpush.bf16.msrb.mxu3 %v6614_v22  ;;  %v6491_v22 = vld [vmem:[%s8838_s15 + $0x168] sm:$0xf0]  ;;  %v7532_v0 = vld [vmem:[%s8838_s15 + $0xe4] sm:$0xf0] }
 0x6af   : > { %3713 = vmatpush.bf16.msrb.mxu2 %v6326_v34  ;;  %v6494_v32 = vor.u32 %v7544_v46, %v6491_v22  ;;  %v6458_v34 = vor.u32 %v7540_v18, %v6457_v33  ;;  %v6649_v46 = vld [vmem:[%s8838_s15 + $0x288] sm:$0xf] }
 0x6b0   : > { %3676 = vmatpush.bf16.msrb.mxu0 %v6354_v56  ;;  %v6526_v56 = vor.u32 %v7552_v1, %v6523_v6  ;;  %v6681_v1 = vld [vmem:[%s8838_s15 + $0x2c8] sm:$0xf]  ;;  %v7528_v6 = vld [vmem:[%s8838_s15 + $0xcc] sm:$0xf] }
 0x6b1   : > { %3694 = vmatpush.bf16.msrb.mxu1 %v6610_v16  ;;  %v6490_v16 = vor.u32 %v7548_v15, %v6489_v14  ;;  %v7592_v14 = vld [vmem:[%s8838_s15 + $0x2cc] sm:$0xf] }
 0x6b2   : > { %3731 = vmatpush.bf16.msrb.mxu3 %v6582_v35  ;;  %v6713_v35 = vld [vmem:[%s8838_s15 + $0x308] sm:$0xf]  ;;  %v6683_v15 = vld [vmem:[%s8838_s15 + $0x2e8] sm:$0xf0] }
 0x6b3   : > { %3778 = vmatpush.bf16.msra.mxu2 %v6558_v50  ;;  %v6715_v50 = vld [vmem:[%s8838_s15 + $0x328] sm:$0xf0] }
 0x6b4   : > { %3677 = vmatpush.bf16.msrb.mxu0 %v6322_v29 }
 0x6b5   : > { %3695 = vmatpush.bf16.msrb.mxu1 %v6578_v4  ;;  %v6750_v4 = vor.u32 %v7608_v23, %v6747_v47  ;;  %v7588_v47 = vld [vmem:[%s8838_s15 + $0x2a4] sm:$0xf0] }
 0x6b6   : > { %3796 = vmatpush.bf16.msra.mxu3 %v6814_v31  ;;  %v2782_v31 = vld [vmem:[%s1060_s22] sm:$0x3] }
 0x6b7   : > { %3779 = vmatpush.bf16.msra.mxu2 %v6526_v56  ;;  %v9569_v10 = vperm.slane %v2782_v31, 0 }
 0x6b8   : > { %3742 = vmatpush.bf16.msra.mxu0 %v6554_v39  ;;  %v6714_v39 = vor.u32 %v7604_v13, %v6713_v35  ;;  %v6617_v35 = vld [vmem:[%s8838_s15 + $0x248] sm:$0xf]  ;;  %v9593_v13 = vperm.slane %v2782_v31, 1  ;;  %v6619_v31 = vld [vmem:[%s8838_s15 + $0x268] sm:$0xf0] }
 0x6b9   : > { %3760 = vmatpush.bf16.msra.mxu1 %v6810_v49  ;;  %v6462_v49 = vor.u32 %v7536_v27, %v6459_v40  ;;  %v7512_v40 = vld [vmem:[%s8838_s15 + $0x4c] sm:$0xf] }
 0x6ba   : > { %3797 = vmatpush.bf16.msra.mxu3 %v6782_v11  ;;  %v6430_v11 = vor.u32 %v7528_v6, %v6427_v9  ;;  %v7572_v6 = vld [vmem:[%s8838_s15 + $0x224] sm:$0xf0] }
 0x6bb   : > { %3780 = vmatpush.bf16.msra.mxu2 %v6494_v32  ;;  %v7584_v32 = vld [vmem:[%s8838_s15 + $0x28c] sm:$0xf] }
 0x6bc   : > { %3743 = vmatpush.bf16.msra.mxu0 %v6522_v55  ;;  %v6425_v55 = vld [vmem:[%s8838_s15 + $0xc8] sm:$0xf] }
 0x6bd   : > { %3761 = vmatpush.bf16.msra.mxu1 %v6778_v7  ;;  %v7596_v7 = vld [vmem:[%s8838_s15 + $0x2e4] sm:$0xf0] }
 0x6be   : > { %3798 = vmatpush.bf16.msra.mxu3 %v6750_v4  ;;  %v6682_v56 = vor.u32 %v7596_v7, %v6681_v1  ;;  %v7508_v1 = vld [vmem:[%s8838_s15 + $0x24] sm:$0xf0] }
 0x6bf   : > { %3781 = vmatpush.bf16.msra.mxu2 %v6462_v49 }
 0x6c0   : > { %3744 = vmatpush.bf16.msra.mxu0 %v6490_v16  ;;  %v6686_v16 = vor.u32 %v7592_v14, %v6683_v15 }
 0x6c3   : > { %3782 = vmatpush.bf16.msra.mxu2 %v6430_v11  ;;  %v6331_v11 = vld [vmem:[%s8838_s15 + $0x28] sm:$0xf0] }
 0x6c4   : > { %3745 = vmatpush.bf16.msra.mxu0 %v6458_v34  ;;  %v7516_v34 = vld [vmem:[%s8838_s15 + $0x64] sm:$0xf0] }
 0x709   : > { %v2809_v63 = vpop.xlane.xlu0 %2808 }
 0x70a   : > { %v2816_v20 = vmul.f32 %v2809_v63, %v8899_v43 }
 0x70c   : > { %v9485_v28 = vadd.f32 1e-06, %v2816_v20  ;;  %v6746_v20 = vor.u32 %v7612_v19, %v6745_v17  ;;  %v6393_v17 = vld [vmem:[%s8838_s15 + $0x88] sm:$0xf] }
 0x70d   : > { %v7524_v19 = vld [vmem:[%s8838_s15 + $0xa4] sm:$0xf0] }
 0x70e   : > { %7950 = vrsqrt.f32 %v9485_v28  ;;  %3762 = vmatpush.bf16.msra.mxu1 %v6746_v20  ;;  %vm2828_vm14 = vweird.f32 %v9485_v28  ;;  %v6394_v23 = vor.u32 %v7524_v19, %v6393_v17 }
 0x711   : > { %v2812_v48 = vpop.xlane.xlu1 %2811 }
 0x712   : > { %v2817_v44 = vmul.f32 %v2812_v48, %v8899_v43  ;;  %3763 = vmatpush.bf16.msra.mxu1 %v6714_v39  ;;  %v7580_v39 = vld [vmem:[%s8838_s15 + $0x264] sm:$0xf0] }
 0x714   : > { %v9505_v54 = vpop.eup %7950  ;;  %v9507_v62 = vadd.f32 1e-06, %v2817_v44  ;;  %v6718_v44 = vor.u32 %v7600_v41, %v6715_v50 }
 0x715   : > { %v2823_v59 = vmul.f32 %v9505_v54, %v9485_v28  ;;  %vm2829_vm13 = vweird.f32 %v9505_v54 }
 0x716   : > { %7952 = vrsqrt.f32 %v9507_v62  ;;  %vm2830_vm15 = vmor %vm2828_vm14, %vm2829_vm13  ;;  %3799 = vmatpush.bf16.msra.mxu3 %v6718_v44  ;;  %3764 = vmatpush.bf16.msra.mxu1 %v6682_v56  ;;  %vm2838_vm1 = vweird.f32 %v9507_v62  ;;  %v7576_v44 = vld [vmem:[%s8838_s15 + $0x24c] sm:$0xf] }
 0x717   : > { %v2824_v63 = vmul.f32 %v9505_v54, %v2823_v59  ;;  %v6426_v59 = vor.u32 %v7532_v0, %v6425_v55  ;;  %v6329_v0 = vld [vmem:[%s8838_s15 + $0x8] sm:$0xf]  ;;  %v6622_v7 = vor.u32 %v7576_v44, %v6619_v31  ;;  %v7504_v56 = vld [vmem:[%s8838_s15 + $0xc] sm:$0xf]  ;;  %v6787_v31 = vld [vmem:[%s8838_s15 + $0x3b0] sm:$0xf0] }
 0x719   : > { %v2825_v29 = vmul.f32 0.5, %v2824_v63  ;;  %v2815_v30 = vpop.xlane.xlu2 %2814  ;;  %3746 = vmatpush.bf16.msra.mxu0 %v6426_v59 }
 0x71a   : > { %v2818_v21 = vmul.f32 %v2815_v30, %v8899_v43  ;;  %3800 = vmatpush.bf16.msra.mxu3 %v6686_v16  ;;  %v6395_v30 = vld [vmem:[%s8838_s15 + $0xa8] sm:$0xf0] }
 0x71b   : > { %v2826_v38 = vsub.f32 1.5, %v2825_v29  ;;  %v6650_v29 = vor.u32 %v7588_v47, %v6649_v46  ;;  %v6587_v16 = vld [vmem:[%s8838_s15 + $0x228] sm:$0xf0]  ;;  %v6334_v47 = vor.u32 %v7504_v56, %v6331_v11  ;;  %v6465_v11 = vld [vmem:[%s8838_s15 + $0x110] sm:$0xf] }
 0x71c   : > { %v9540_v42 = vpop.eup %7952  ;;  %v9542_v48 = vadd.f32 1e-06, %v2818_v21  ;;  %v6361_v21 = vld [vmem:[%s8838_s15 + $0x48] sm:$0xf] }
 0x71d   : > { %v2827_v51 = vmul.f32 %v9505_v54, %v2826_v38  ;;  %v2833_v52 = vmul.f32 %v9540_v42, %v9507_v62  ;;  %vm2839_vm0 = vweird.f32 %v9540_v42  ;;  %3747 = vmatpush.bf16.msra.mxu0 %v6394_v23  ;;  %v6362_v62 = vor.u32 %v7516_v34, %v6361_v21  ;;  %3765 = vmatpush.bf16.msra.mxu1 %v6650_v29  ;;  %v7625_v34 = vld [vmem:[%s8838_s15 + $0x3d4] sm:$0xf] }
 0x71e   : > { %7954 = vrsqrt.f32 %v9542_v48  ;;  %vm2840_vm2 = vmor %vm2838_vm1, %vm2839_vm0  ;;  %vm2848_vm4 = vweird.f32 %v9542_v48 }
 0x71f   : > { %v2831_v28 = vsel %vm2830_vm15, %v9505_v54, %v2827_v51  ;;  %v2834_v61 = vmul.f32 %v9540_v42, %v2833_v52  ;;  %v6618_v51 = vor.u32 %v7580_v39, %v6617_v35  ;;  %v6363_v52 = vld [vmem:[%s8838_s15 + $0x68] sm:$0xf0]  ;;  %v6819_v35 = vld [vmem:[%s8838_s15 + $0x3f0] sm:$0xf0] }
 0x720   : > { %v2852_v63 = vmul.f32 %v2831_v28, %v9394_v24  ;;  %v2853_v20 = vmul.f32 %v2831_v28, %v9397_v26  ;;  %v7520_v24 = vld [vmem:[%s8838_s15 + $0x8c] sm:$0xf]  ;;  %v6366_v55 = vor.u32 %v7512_v40, %v6363_v52  ;;  %v6822_v39 = vor.u32 %v7625_v34, %v6819_v35  ;;  %v7557_v40 = vld [vmem:[%s8838_s15 + $0x1ac] sm:$0xf0]  ;;  %v7617_v52 = vld [vmem:[%s8838_s15 + $0x394] sm:$0xf] }
 0x721   : > { %v2835_v54 = vmul.f32 0.5, %v2834_v61  ;;  %v6651_v26 = vld [vmem:[%s8838_s15 + $0x2a8] sm:$0xf0]  ;;  %v6398_v18 = vor.u32 %v7520_v24, %v6395_v30  ;;  %3748 = vmatpush.bf16.msra.mxu0 %v6362_v62  ;;  %3766 = vmatpush.bf16.msra.mxu1 %v6618_v51  ;;  %v6561_v30 = vld [vmem:[%s8838_s15 + $0x1d0] sm:$0xf] }
 0x722   : > { %v2863_v27 = vmul.f32 %v9554_v37, %v2852_v63  ;;  %v6654_v38 = vor.u32 %v7584_v32, %v6651_v26  ;;  %v2864_v41 = vmul.f32 %v9556_v60, %v2853_v20  ;;  %v7568_v63 = vld [vmem:[%s8838_s15 + $0x20c] sm:$0xf]  ;;  %v7565_v32 = vld [vmem:[%s8838_s15 + $0x1ec] sm:$0xf0]  ;;  %v7593_v34 = vld [vmem:[%s8838_s15 + $0x2d4] sm:$0xf] }
 0x723   : > { %v2836_v22 = vsub.f32 1.5, %v2835_v54  ;;  %3783 = vmatpush.bf16.msra.mxu2 %v6398_v18  ;;  %v6590_v24 = vor.u32 %v7568_v63, %v6587_v16  ;;  %v6817_v26 = vld [vmem:[%s8838_s15 + $0x3d0] sm:$0xf]  ;;  %v6563_v18 = vld [vmem:[%s8838_s15 + $0x1f0] sm:$0xf0] }
 0x724   : > { %v9581_v3 = vpop.eup %7954  ;;  %3801 = vmatpush.bf16.msra.mxu3 %v6654_v38  ;;  %v2875_v17 = vadd.f32 %v9593_v13, %v2864_v41  ;;  %v6785_v41 = vld [vmem:[%s8838_s15 + $0x390] sm:$0xf]  ;;  %v6691_v35 = vld [vmem:[%s8838_s15 + $0x2f0] sm:$0xf0] }
 0x725   : > { %v2837_v4 = vmul.f32 %v9540_v42, %v2836_v22  ;;  %v2843_v33 = vmul.f32 %v9581_v3, %v9542_v48  ;;  %vm2849_vm3 = vweird.f32 %v9581_v3  ;;  %v6562_v48 = vor.u32 %v7565_v32, %v6561_v30  ;;  %v7605_v63 = vld [vmem:[%s8838_s15 + $0x32c] sm:$0xf0] }
 0x726   : > { %vm2850_vm5 = vmor %vm2848_vm4, %vm2849_vm3  ;;  %v6433_v32 = vld [vmem:[%s8838_s15 + $0xd0] sm:$0xf] }
 0x727   : > { %v2841_v49 = vsel %vm2840_vm2, %v9540_v42, %v2837_v4  ;;  %v2844_v50 = vmul.f32 %v9581_v3, %v2843_v33  ;;  %v6585_v42 = vld [vmem:[%s8838_s15 + $0x208] sm:$0xf]  ;;  %3784 = vmatpush.bf16.msra.mxu2 %v6366_v55  ;;  %v7629_v4 = vld [vmem:[%s8838_s15 + $0x3ec] sm:$0xf0]  ;;  %v7561_v33 = vld [vmem:[%s8838_s15 + $0x1d4] sm:$0xf]  ;;  %v6790_v55 = vor.u32 %v7617_v52, %v6787_v31 }
 0x728   : > { %v2854_v28 = vmul.f32 %v2841_v49, %v9405_v57  ;;  %v2855_v61 = vmul.f32 %v2841_v49, %v9408_v58  ;;  %v6330_v57 = vor.u32 %v7508_v1, %v6329_v0  ;;  %v2874_v58 = vadd.f32 %v9569_v10, %v2863_v27  ;;  %3802 = vmatpush.bf16.msra.mxu3 %v6622_v7  ;;  %v6529_v27 = vld [vmem:[%s8838_s15 + $0x190] sm:$0xf]  ;;  %v6659_v52 = vld [vmem:[%s8838_s15 + $0x2b0] sm:$0xf0] }
 0x729   : > { %v2845_v59 = vmul.f32 0.5, %v2844_v50  ;;  %v6586_v15 = vor.u32 %v7572_v6, %v6585_v42  ;;  %v6566_v21 = vor.u32 %v7561_v33, %v6563_v18  ;;  %v7621_v49 = vld [vmem:[%s8838_s15 + $0x3ac] sm:$0xf0]  ;;  %v6530_v50 = vor.u32 %v7557_v40, %v6529_v27  ;;  %v7545_v42 = vld [vmem:[%s8838_s15 + $0x154] sm:$0xf] }
 0x72a   : > { %v2865_v9 = vmul.f32 %v9554_v37, %v2854_v28  ;;  %v2866_v54 = vmul.f32 %v9556_v60, %v2855_v61  ;;  %3749 = vmatpush.bf16.msra.mxu0 %v6330_v57  ;;  %v6786_v51 = vor.u32 %v7621_v49, %v6785_v41  ;;  %v6497_v28 = vld [vmem:[%s8838_s15 + $0x150] sm:$0xf]  ;;  %v6499_v6 = vld [vmem:[%s8838_s15 + $0x170] sm:$0xf0] }
 0x72b   : > { %v2846_v14 = vsub.f32 1.5, %v2845_v59  ;;  %3767 = vmatpush.bf16.msra.mxu1 %v6586_v15  ;;  %3785 = vmatpush.bf16.msra.mxu2 %v6334_v47  ;;  %v7549_v61 = vld [vmem:[%s8838_s15 + $0x16c] sm:$0xf0]  ;;  %v7601_v47 = vld [vmem:[%s8838_s15 + $0x314] sm:$0xf] }
 0x72c   : > { %v2876_v19 = vadd.f32 %v9569_v10, %v2865_v9  ;;  %v2877_v46 = vadd.f32 %v9593_v13, %v2866_v54  ;;  %3803 = vmatpush.bf16.msra.mxu3 %v6590_v24  ;;  %v6753_v0 = vld [vmem:[%s8838_s15 + $0x350] sm:$0xf]  ;;  %v7609_v9 = vld [vmem:[%s8838_s15 + $0x354] sm:$0xf]  ;;  %v6498_v57 = vor.u32 %v7549_v61, %v6497_v28 }
 0x72d   : > { %v2847_v20 = vmul.f32 %v9581_v3, %v2846_v14  ;;  %v7613_v1 = vld [vmem:[%s8838_s15 + $0x36c] sm:$0xf0]  ;;  %v6755_v54 = vld [vmem:[%s8838_s15 + $0x370] sm:$0xf0] }
 0x72e   : > { %v9625_v22 = vpack.c.bf16 %v2876_v19, %v2874_v58  ;;  %v9627_v23 = vpack.c.bf16 %v2877_v46, %v2875_v17  ;;  %v6754_v56 = vor.u32 %v7613_v1, %v6753_v0  ;;  %v6502_v58 = vor.u32 %v7545_v42, %v6499_v6  ;;  %v6721_v15 = vld [vmem:[%s8838_s15 + $0x310] sm:$0xf]  ;;  %v7537_v17 = vld [vmem:[%s8838_s15 + $0x114] sm:$0xf] }
 0x72f   : > { %v2851_v29 = vsel %vm2850_vm5, %v9581_v3, %v2847_v20  ;;  %v6818_v3 = vor.u32 %v7629_v4, %v6817_v26  ;;  %v6758_v14 = vor.u32 %v7609_v9, %v6755_v54  ;;  %v6722_v46 = vor.u32 %v7605_v63, %v6721_v15  ;;  %v6467_v20 = vld [vmem:[%s8838_s15 + $0x130] sm:$0xf0]  ;;  %v7533_v26 = vld [vmem:[%s8838_s15 + $0xec] sm:$0xf0] }
 0x730   : > { %3678 = vmatmul.bf16.vlgmr.msrb.gmra.mxu0 %v9625_v22  ;;  %3696 = vmatmul.bf16.vlgmr.msrb.gmra.mxu1 %v9627_v23  ;;  %v2856_v38 = vmul.f32 %v2851_v29, %v9416_v25  ;;  %v2857_v62 = vmul.f32 %v2851_v29, %v9419_v36  ;;  %v7553_v25 = vld [vmem:[%s8838_s15 + $0x194] sm:$0xf]  ;;  %v6434_v4 = vor.u32 %v7533_v26, %v6433_v32  ;;  %v7597_v33 = vld [vmem:[%s8838_s15 + $0x2ec] sm:$0xf0]  ;;  %v7562_v32 = vld [vmem:[%s8838_s15 + $0x1dc] sm:$0xf] }
 0x731   : > { %3714 = vmatmul.bf16.vlgmr.msrb.gmra.mxu2 %v9625_v22  ;;  %3732 = vmatmul.bf16.vlgmr.msrb.gmra.mxu3 %v9627_v23  ;;  %v6531_v36 = vld [vmem:[%s8838_s15 + $0x1b0] sm:$0xf0]  ;;  %v6401_v27 = vld [vmem:[%s8838_s15 + $0x90] sm:$0xf]  ;;  %v6571_v26 = vld [vmem:[%s8838_s15 + $0x1f8] sm:$0xf0] }
 0x732   : > { %3814 = vmatpush.bf16.msrb.mxu0 %v6562_v48  ;;  %3832 = vmatpush.bf16.msrb.mxu1 %v6818_v3  ;;  %v6534_v44 = vor.u32 %v7553_v25, %v6531_v36  ;;  %v2867_v59 = vmul.f32 %v9554_v37, %v2856_v38  ;;  %v2868_v7 = vmul.f32 %v9556_v60, %v2857_v62  ;;  %v7541_v37 = vld [vmem:[%s8838_s15 + $0x12c] sm:$0xf0]  ;;  %v6723_v24 = vld [vmem:[%s8838_s15 + $0x330] sm:$0xf0] }
 0x733   : > { %3850 = vmatpush.bf16.msrb.mxu2 %v6566_v21  ;;  %3868 = vmatpush.bf16.msrb.mxu3 %v6822_v39  ;;  %v6466_v19 = vor.u32 %v7541_v37, %v6465_v11  ;;  %v6726_v30 = vor.u32 %v7601_v47, %v6723_v24  ;;  %v6689_v48 = vld [vmem:[%s8838_s15 + $0x2d0] sm:$0xf]  ;;  %v7529_v18 = vld [vmem:[%s8838_s15 + $0xd4] sm:$0xf]  ;;  %v6694_v62 = vor.u32 %v7593_v34, %v6691_v35  ;;  %v7566_v47 = vld [vmem:[%s8838_s15 + $0x1f4] sm:$0xf0] }
 0x734   : > { %v2878_v60 = vadd.f32 %v9569_v10, %v2867_v59  ;;  %v2879_v16 = vadd.f32 %v9593_v13, %v2868_v7  ;;  %v6470_v13 = vor.u32 %v7537_v17, %v6467_v20  ;;  %v6435_v3 = vld [vmem:[%s8838_s15 + $0xf0] sm:$0xf0]  ;;  %v6690_v21 = vor.u32 %v7597_v33, %v6689_v48  ;;  %v7525_v39 = vld [vmem:[%s8838_s15 + $0xac] sm:$0xf0]  ;;  %v6569_v20 = vld [vmem:[%s8838_s15 + $0x1d8] sm:$0xf] }
 0x735   : > { %v6438_v38 = vor.u32 %v7529_v18, %v6435_v3  ;;  %v6657_v40 = vld [vmem:[%s8838_s15 + $0x290] sm:$0xf]  ;;  %v6402_v49 = vor.u32 %v7525_v39, %v6401_v27  ;;  %v6403_v25 = vld [vmem:[%s8838_s15 + $0xb0] sm:$0xf0]  ;;  %v6825_v24 = vld [vmem:[%s8838_s15 + $0x3d8] sm:$0xf] }
 0x736   : > { %3815 = vmatpush.bf16.msrb.mxu0 %v6530_v50  ;;  %3833 = vmatpush.bf16.msrb.mxu1 %v6786_v51  ;;  %v9672_v29 = vpack.c.bf16 %v2878_v60, %v2878_v60  ;;  %v9674_v10 = vpack.c.bf16 %v2879_v16, %v2879_v16  ;;  %v7589_v41 = vld [vmem:[%s8838_s15 + $0x2ac] sm:$0xf0]  ;;  %v7521_v51 = vld [vmem:[%s8838_s15 + $0x94] sm:$0xf]  ;;  %v7626_v33 = vld [vmem:[%s8838_s15 + $0x3dc] sm:$0xf] }
 0x737   : > { %3851 = vmatpush.bf16.msrb.mxu2 %v6534_v44  ;;  %3869 = vmatpush.bf16.msrb.mxu3 %v6790_v55  ;;  %v6658_v50 = vor.u32 %v7589_v41, %v6657_v40  ;;  %v7585_v36 = vld [vmem:[%s8838_s15 + $0x294] sm:$0xf]  ;;  %v6369_v44 = vld [vmem:[%s8838_s15 + $0x50] sm:$0xf]  ;;  %v6406_v55 = vor.u32 %v7521_v51, %v6403_v25  ;;  %v6827_v18 = vld [vmem:[%s8838_s15 + $0x3f8] sm:$0xf0] }
 0x738   : > { %v7517_v31 = vld [vmem:[%s8838_s15 + $0x6c] sm:$0xf0]  ;;  %v6662_v0 = vor.u32 %v7585_v36, %v6659_v52  ;;  %v7513_v1 = vld [vmem:[%s8838_s15 + $0x54] sm:$0xf]  ;;  %v6537_v3 = vld [vmem:[%s8838_s15 + $0x198] sm:$0xf] }
 0x739   : > { %v6625_v28 = vld [vmem:[%s8838_s15 + $0x250] sm:$0xf]  ;;  %v6371_v42 = vld [vmem:[%s8838_s15 + $0x70] sm:$0xf0]  ;;  %v6370_v59 = vor.u32 %v7517_v31, %v6369_v44  ;;  %v7558_v34 = vld [vmem:[%s8838_s15 + $0x1b4] sm:$0xf0] }
 0x73a   : > { %3816 = vmatpush.bf16.msrb.mxu0 %v6498_v57  ;;  %3834 = vmatpush.bf16.msrb.mxu1 %v6754_v56  ;;  %v7581_v61 = vld [vmem:[%s8838_s15 + $0x26c] sm:$0xf0]  ;;  %v7577_v6 = vld [vmem:[%s8838_s15 + $0x254] sm:$0xf]  ;;  %v6793_v35 = vld [vmem:[%s8838_s15 + $0x398] sm:$0xf] }
 0x73b   : > { %3852 = vmatpush.bf16.msrb.mxu2 %v6502_v58  ;;  %3870 = vmatpush.bf16.msrb.mxu3 %v6758_v14  ;;  %v6626_v7 = vor.u32 %v7581_v61, %v6625_v28  ;;  %v6627_v9 = vld [vmem:[%s8838_s15 + $0x270] sm:$0xf0]  ;;  %v6337_v54 = vld [vmem:[%s8838_s15 + $0x10] sm:$0xf]  ;;  %v6374_v58 = vor.u32 %v7513_v1, %v6371_v42  ;;  %v7622_v27 = vld [vmem:[%s8838_s15 + $0x3b4] sm:$0xf0] }
 0x73c   : > { %v7509_v57 = vld [vmem:[%s8838_s15 + $0x2c] sm:$0xf0]  ;;  %v6630_v14 = vor.u32 %v7577_v6, %v6627_v9  ;;  %v7505_v37 = vld [vmem:[%s8838_s15 + $0x14] sm:$0xf]  ;;  %v7554_v39 = vld [vmem:[%s8838_s15 + $0x19c] sm:$0xf] }
 0x73d   : > { %v6593_v56 = vld [vmem:[%s8838_s15 + $0x210] sm:$0xf]  ;;  %v6338_v15 = vor.u32 %v7509_v57, %v6337_v54  ;;  %v6339_v60 = vld [vmem:[%s8838_s15 + $0x30] sm:$0xf0]  ;;  %v6539_v40 = vld [vmem:[%s8838_s15 + $0x1b8] sm:$0xf0] }
 0x73e   : > { %3817 = vmatpush.bf16.msrb.mxu0 %v6466_v19  ;;  %3835 = vmatpush.bf16.msrb.mxu1 %v6722_v46  ;;  %v7573_v11 = vld [vmem:[%s8838_s15 + $0x22c] sm:$0xf0]  ;;  %v7569_v16 = vld [vmem:[%s8838_s15 + $0x214] sm:$0xf]  ;;  %v6342_v19 = vor.u32 %v7505_v37, %v6339_v60  ;;  %v7618_v41 = vld [vmem:[%s8838_s15 + $0x39c] sm:$0xf] }
 0x73f   : > { %3853 = vmatpush.bf16.msrb.mxu2 %v6470_v13  ;;  %3871 = vmatpush.bf16.msrb.mxu3 %v6726_v30  ;;  %v6594_v63 = vor.u32 %v7573_v11, %v6593_v56  ;;  %v6595_v17 = vld [vmem:[%s8838_s15 + $0x230] sm:$0xf0]  ;;  %v6570_v13 = vor.u32 %v7566_v47, %v6569_v20  ;;  %v7630_v30 = vld [vmem:[%s8838_s15 + $0x3f4] sm:$0xf0]  ;;  %v7546_v31 = vld [vmem:[%s8838_s15 + $0x15c] sm:$0xf] }
 0x740   : > { %3683 = vmatmul.bf16.gmra.mxu0 %v9672_v29  ;;  %3701 = vmatmul.bf16.gmra.mxu1 %v9674_v10  ;;  %v6598_v46 = vor.u32 %v7569_v16, %v6595_v17  ;;  %v6826_v48 = vor.u32 %v7630_v30, %v6825_v24  ;;  %v6505_v51 = vld [vmem:[%s8838_s15 + $0x158] sm:$0xf]  ;;  %v6507_v28 = vld [vmem:[%s8838_s15 + $0x178] sm:$0xf0] }
 0x741   : > { %3719 = vmatmul.bf16.gmra.mxu2 %v9672_v29  ;;  %3737 = vmatmul.bf16.gmra.mxu3 %v9674_v10  ;;  %v7550_v25 = vld [vmem:[%s8838_s15 + $0x174] sm:$0xf0]  ;;  %v7610_v61 = vld [vmem:[%s8838_s15 + $0x35c] sm:$0xf] }
 0x742   : > { %3818 = vmatpush.bf16.msrb.mxu0 %v6434_v4  ;;  %3836 = vmatpush.bf16.msrb.mxu1 %v6690_v21  ;;  %v6574_v4 = vor.u32 %v7562_v32, %v6571_v26  ;;  %v6830_v21 = vor.u32 %v7626_v33, %v6827_v18  ;;  %v6761_v52 = vld [vmem:[%s8838_s15 + $0x358] sm:$0xf]  ;;  %v7538_v57 = vld [vmem:[%s8838_s15 + $0x11c] sm:$0xf] }
 0x743   : > { %3854 = vmatpush.bf16.msrb.mxu2 %v6438_v38  ;;  %3872 = vmatpush.bf16.msrb.mxu3 %v6694_v62  ;;  %v6538_v38 = vor.u32 %v7558_v34, %v6537_v3  ;;  %v6794_v62 = vor.u32 %v7622_v27, %v6793_v35  ;;  %v7614_v44 = vld [vmem:[%s8838_s15 + $0x374] sm:$0xf0]  ;;  %v6731_v37 = vld [vmem:[%s8838_s15 + $0x338] sm:$0xf0] }
 0x744   : > { %v6762_v1 = vor.u32 %v7614_v44, %v6761_v52  ;;  %v6473_v42 = vld [vmem:[%s8838_s15 + $0x118] sm:$0xf]  ;;  %v7530_v20 = vld [vmem:[%s8838_s15 + $0xdc] sm:$0xf] }
 0x745   : > { %v7542_v6 = vld [vmem:[%s8838_s15 + $0x134] sm:$0xf0]  ;;  %v6443_v47 = vld [vmem:[%s8838_s15 + $0xf8] sm:$0xf0] }
 0x746   : > { %3819 = vmatpush.bf16.msrb.mxu0 %v6402_v49  ;;  %3837 = vmatpush.bf16.msrb.mxu1 %v6658_v50  ;;  %v6542_v49 = vor.u32 %v7554_v39, %v6539_v40  ;;  %v6795_v50 = vld [vmem:[%s8838_s15 + $0x3b8] sm:$0xf0]  ;;  %v6729_v9 = vld [vmem:[%s8838_s15 + $0x318] sm:$0xf]  ;;  %v6474_v56 = vor.u32 %v7542_v6, %v6473_v42  ;;  %v6446_v26 = vor.u32 %v7530_v20, %v6443_v47  ;;  %v6945_v20 = vld [vmem:[%s8840_s20 + $0xe0] sm:$0xf] }
 0x747   : > { %3855 = vmatpush.bf16.msrb.mxu2 %v6406_v55  ;;  %3873 = vmatpush.bf16.msrb.mxu3 %v6662_v0  ;;  %v6798_v36 = vor.u32 %v7618_v41, %v6795_v50  ;;  %v6763_v55 = vld [vmem:[%s8838_s15 + $0x378] sm:$0xf0]  ;;  %v6506_v0 = vor.u32 %v7550_v25, %v6505_v51  ;;  %v7606_v54 = vld [vmem:[%s8838_s15 + $0x334] sm:$0xf0]  ;;  %v7660_v47 = vld [vmem:[%s8840_s20 + $0xe4] sm:$0xf0] }
 0x748   : > { %v6730_v11 = vor.u32 %v7606_v54, %v6729_v9  ;;  %v6441_v60 = vld [vmem:[%s8838_s15 + $0xd8] sm:$0xf]  ;;  %v6699_v30 = vld [vmem:[%s8838_s15 + $0x2f8] sm:$0xf0] }
 0x749   : > { %v7534_v16 = vld [vmem:[%s8838_s15 + $0xf4] sm:$0xf0]  ;;  %v7522_v34 = vld [vmem:[%s8838_s15 + $0x9c] sm:$0xf] }
 0x74a   : > { %3820 = vmatpush.bf16.msrb.mxu0 %v6370_v59  ;;  %3838 = vmatpush.bf16.msrb.mxu1 %v6626_v7  ;;  %v6510_v59 = vor.u32 %v7546_v31, %v6507_v28  ;;  %v6766_v7 = vor.u32 %v7610_v61, %v6763_v55  ;;  %v6697_v17 = vld [vmem:[%s8838_s15 + $0x2d8] sm:$0xf]  ;;  %v6411_v35 = vld [vmem:[%s8838_s15 + $0xb8] sm:$0xf0] }
 0x74b   : > { %3856 = vmatpush.bf16.msrb.mxu2 %v6374_v58  ;;  %3874 = vmatpush.bf16.msrb.mxu3 %v6630_v14  ;;  %v6475_v58 = vld [vmem:[%s8838_s15 + $0x138] sm:$0xf0]  ;;  %v6409_v32 = vld [vmem:[%s8838_s15 + $0x98] sm:$0xf] }
 0x74c   : > { %v7602_v14 = vld [vmem:[%s8838_s15 + $0x31c] sm:$0xf]  ;;  %v6665_v33 = vld [vmem:[%s8838_s15 + $0x298] sm:$0xf] }
 0x74d   : > { %v7590_v18 = vld [vmem:[%s8838_s15 + $0x2b4] sm:$0xf0]  ;;  %v7586_v27 = vld [vmem:[%s8838_s15 + $0x29c] sm:$0xf] }
 0x74e   : > { %3821 = vmatpush.bf16.msrb.mxu0 %v6338_v15  ;;  %3839 = vmatpush.bf16.msrb.mxu1 %v6594_v63  ;;  %v6478_v15 = vor.u32 %v7538_v57, %v6475_v58  ;;  %v6734_v63 = vor.u32 %v7602_v14, %v6731_v37  ;;  %v7518_v39 = vld [vmem:[%s8838_s15 + $0x74] sm:$0xf0]  ;;  %v7514_v51 = vld [vmem:[%s8838_s15 + $0x5c] sm:$0xf]  ;;  %v6889_v58 = vld [vmem:[%s8840_s20 + $0x70] sm:$0xf] }
 0x74f   : > { %3857 = vmatpush.bf16.msrb.mxu2 %v6342_v19  ;;  %3875 = vmatpush.bf16.msrb.mxu3 %v6598_v46  ;;  %v6442_v19 = vor.u32 %v7534_v16, %v6441_v60  ;;  %v7598_v46 = vld [vmem:[%s8838_s15 + $0x2f4] sm:$0xf0]  ;;  %v6379_v25 = vld [vmem:[%s8838_s15 + $0x78] sm:$0xf0]  ;;  %v6953_v16 = vld [vmem:[%s8840_s20 + $0xf0] sm:$0xf] }
 0x750   : > { %3750 = vmatmul.bf16.vlgmr.msra.gmra.mxu0 %v9625_v22  ;;  %3768 = vmatmul.bf16.vlgmr.msra.gmra.mxu1 %v9627_v23  ;;  %v6698_v24 = vor.u32 %v7598_v46, %v6697_v17  ;;  %v6633_v40 = vld [vmem:[%s8838_s15 + $0x258] sm:$0xf]  ;;  %v7578_v44 = vld [vmem:[%s8838_s15 + $0x25c] sm:$0xf] }
 0x751   : > { %3786 = vmatmul.bf16.vlgmr.msra.gmra.mxu2 %v9625_v22  ;;  %3804 = vmatmul.bf16.vlgmr.msra.gmra.mxu3 %v9627_v23  ;;  %v7582_v41 = vld [vmem:[%s8838_s15 + $0x274] sm:$0xf0]  ;;  %v6635_v31 = vld [vmem:[%s8838_s15 + $0x278] sm:$0xf0] }
 0x752   : > { %3886 = vmatpush.bf16.msra.mxu0 %v6570_v13  ;;  %3904 = vmatpush.bf16.msra.mxu1 %v6826_v48  ;;  %v7594_v13 = vld [vmem:[%s8838_s15 + $0x2dc] sm:$0xf]  ;;  %v6634_v52 = vor.u32 %v7582_v41, %v6633_v40  ;;  %v6345_v28 = vld [vmem:[%s8838_s15 + $0x18] sm:$0xf]  ;;  %v6638_v42 = vor.u32 %v7578_v44, %v6635_v31 }
 0x753   : > { %3922 = vmatpush.bf16.msra.mxu2 %v6574_v4  ;;  %3940 = vmatpush.bf16.msra.mxu3 %v6830_v21  ;;  %v6702_v48 = vor.u32 %v7594_v13, %v6699_v30  ;;  %v7526_v4 = vld [vmem:[%s8838_s15 + $0xb4] sm:$0xf0]  ;;  %v6666_v21 = vor.u32 %v7590_v18, %v6665_v33  ;;  %v6347_v9 = vld [vmem:[%s8838_s15 + $0x38] sm:$0xf0]  ;;  %v6865_v13 = vld [vmem:[%s8840_s20 + $0x40] sm:$0xf] }
 0x754   : > { %v6410_v3 = vor.u32 %v7526_v4, %v6409_v32  ;;  %v7510_v61 = vld [vmem:[%s8838_s15 + $0x34] sm:$0xf0]  ;;  %v7570_v54 = vld [vmem:[%s8838_s15 + $0x21c] sm:$0xf]  ;;  %v7640_v30 = vld [vmem:[%s8840_s20 + $0x44] sm:$0xf0] }
 0x755   : > { %v6601_v55 = vld [vmem:[%s8838_s15 + $0x218] sm:$0xf]  ;;  %v6603_v57 = vld [vmem:[%s8838_s15 + $0x238] sm:$0xf0]  ;;  %v6866_v32 = vor.u32 %v7640_v30, %v6865_v13  ;;  %v6857_v33 = vld [vmem:[%s8840_s20 + $0x30] sm:$0xf] }
 0x756   : > { %3887 = vmatpush.bf16.msra.mxu0 %v6538_v38  ;;  %3905 = vmatpush.bf16.msra.mxu1 %v6794_v62  ;;  %v6667_v38 = vld [vmem:[%s8838_s15 + $0x2b8] sm:$0xf0]  ;;  %v6377_v62 = vld [vmem:[%s8838_s15 + $0x58] sm:$0xf]  ;;  %v7081_v30 = vld [vmem:[%s8840_s20 + $0x1f0] sm:$0xf] }
 0x757   : > { %3923 = vmatpush.bf16.msra.mxu2 %v6542_v49  ;;  %3941 = vmatpush.bf16.msra.mxu3 %v6798_v36  ;;  %v6414_v49 = vor.u32 %v7522_v34, %v6411_v35  ;;  %v6670_v50 = vor.u32 %v7586_v27, %v6667_v38  ;;  %v6378_v36 = vor.u32 %v7518_v39, %v6377_v62  ;;  %v7646_v14 = vld [vmem:[%s8840_s20 + $0x74] sm:$0xf0]  ;;  %v7656_v34 = vld [vmem:[%s8840_s20 + $0xc4] sm:$0xf0]  ;;  %v6849_v27 = vld [vmem:[%s8840_s20 + $0x20] sm:$0xf] }
 0x758   : > { %v6890_v37 = vor.u32 %v7646_v14, %v6889_v58  ;;  %v7662_v17 = vld [vmem:[%s8840_s20 + $0xf4] sm:$0xf0]  ;;  %v9821_v38 = vld [vmem:[%s8873_s2] sm:$0xff]  ;;  %v6921_v62 = vld [vmem:[%s8840_s20 + $0xb0] sm:$0xf] }
 0x759   : > { %v7642_v46 = vld [vmem:[%s8840_s20 + $0x54] sm:$0xf0]  ;;  %v9826_v41 = vperm.slane %v9821_v38, 0 }
 0x75a   : > { %3888 = vmatpush.bf16.msra.mxu0 %v6506_v0  ;;  %3906 = vmatpush.bf16.msra.mxu1 %v6762_v1  ;;  %v7574_v0 = vld [vmem:[%s8838_s15 + $0x234] sm:$0xf0]  ;;  %v6382_v1 = vor.u32 %v7514_v51, %v6379_v25  ;;  %v6913_v25 = vld [vmem:[%s8840_s20 + $0xa0] sm:$0xf] }
 0x75b   : > { %3924 = vmatpush.bf16.msra.mxu2 %v6510_v59  ;;  %3942 = vmatpush.bf16.msra.mxu3 %v6766_v7  ;;  %v7506_v59 = vld [vmem:[%s8838_s15 + $0x1c] sm:$0xf]  ;;  %v6346_v7 = vor.u32 %v7510_v61, %v6345_v28  ;;  %v6602_v6 = vor.u32 %v7574_v0, %v6601_v55  ;;  %v7638_v18 = vld [vmem:[%s8840_s20 + $0x34] sm:$0xf0]  ;;  %v6833_v61 = vld [vmem:[%s8840_s20] sm:$0xf] }
 0x75c   : > { %v7654_v39 = vld [vmem:[%s8840_s20 + $0xb4] sm:$0xf0]  ;;  %v7632_v55 = vld [vmem:[%s8840_s20 + $0x4] sm:$0xf0] }
 0x75d   : > { %v6922_v40 = vor.u32 %v7654_v39, %v6921_v62  ;;  %v6834_v0 = vor.u32 %v7632_v55, %v6833_v61  ;;  %v7692_v62 = vld [vmem:[%s8840_s20 + $0x1e4] sm:$0xf0] }
 0x75e   : > { %3889 = vmatpush.bf16.msra.mxu0 %v6474_v56  ;;  %3907 = vmatpush.bf16.msra.mxu1 %v6730_v11  ;;  %v6350_v56 = vor.u32 %v7506_v59, %v6347_v9  ;;  %v6606_v11 = vor.u32 %v7570_v54, %v6603_v57  ;;  %v7650_v59 = vld [vmem:[%s8840_s20 + $0x94] sm:$0xf0]  ;;  %v7017_v54 = vld [vmem:[%s8840_s20 + $0x170] sm:$0xf] }
 0x75f   : > { %3925 = vmatpush.bf16.msra.mxu2 %v6478_v15  ;;  %3943 = vmatpush.bf16.msra.mxu3 %v6734_v63  ;;  %v6881_v15 = vld [vmem:[%s8840_s20 + $0x60] sm:$0xf]  ;;  %v7644_v63 = vld [vmem:[%s8840_s20 + $0x64] sm:$0xf0]  ;;  %v7678_v57 = vld [vmem:[%s8840_s20 + $0x174] sm:$0xf0] }
 0x760   : > { %3755 = vmatmul.bf16.gmra.mxu0 %v9672_v29  ;;  %3773 = vmatmul.bf16.gmra.mxu1 %v9674_v10  ;;  %v6882_v60 = vor.u32 %v7644_v63, %v6881_v15  ;;  %v7648_v15 = vld [vmem:[%s8840_s20 + $0x84] sm:$0xf0] }
 0x761   : > { %3791 = vmatmul.bf16.gmra.mxu2 %v9672_v29  ;;  %3809 = vmatmul.bf16.gmra.mxu3 %v9674_v10 }
 0x762   : > { %3890 = vmatpush.bf16.msra.mxu0 %v6442_v19  ;;  %3908 = vmatpush.bf16.msra.mxu1 %v6698_v24  ;;  %v6954_v19 = vor.u32 %v7662_v17, %v6953_v16  ;;  %v6946_v24 = vor.u32 %v7660_v47, %v6945_v20 }
 0x763   : > { %3926 = vmatpush.bf16.msra.mxu2 %v6446_v26  ;;  %3944 = vmatpush.bf16.msra.mxu3 %v6702_v48  ;;  %v6937_v26 = vld [vmem:[%s8840_s20 + $0xd0] sm:$0xf]  ;;  %v7658_v48 = vld [vmem:[%s8840_s20 + $0xd4] sm:$0xf0] }
 0x764   : > { %v6938_v4 = vor.u32 %v7658_v48, %v6937_v26 }
 0x766   : > { %3891 = vmatpush.bf16.msra.mxu0 %v6410_v3  ;;  %3909 = vmatpush.bf16.msra.mxu1 %v6666_v21  ;;  %v6858_v3 = vor.u32 %v7638_v18, %v6857_v33  ;;  %v6929_v21 = vld [vmem:[%s8840_s20 + $0xc0] sm:$0xf]  ;;  %v7001_v18 = vld [vmem:[%s8840_s20 + $0x150] sm:$0xf] }
 0x767   : > { %3927 = vmatpush.bf16.msra.mxu2 %v6414_v49  ;;  %3945 = vmatpush.bf16.msra.mxu3 %v6670_v50  ;;  %v6930_v35 = vor.u32 %v7656_v34, %v6929_v21  ;;  %v6841_v49 = vld [vmem:[%s8840_s20 + $0x10] sm:$0xf]  ;;  %v7634_v50 = vld [vmem:[%s8840_s20 + $0x14] sm:$0xf0] }
 0x768   : > { %v6842_v51 = vor.u32 %v7634_v50, %v6841_v49 }
 0x76a   : > { %3892 = vmatpush.bf16.msra.mxu0 %v6378_v36  ;;  %3910 = vmatpush.bf16.msra.mxu1 %v6634_v52  ;;  %v7652_v36 = vld [vmem:[%s8840_s20 + $0xa4] sm:$0xf0] }
 0x76b   : > { %3928 = vmatpush.bf16.msra.mxu2 %v6382_v1  ;;  %3946 = vmatpush.bf16.msra.mxu3 %v6638_v42  ;;  %v6914_v31 = vor.u32 %v7652_v36, %v6913_v25  ;;  %v6905_v42 = vld [vmem:[%s8840_s20 + $0x90] sm:$0xf] }
 0x76e   : > { %3893 = vmatpush.bf16.msra.mxu0 %v6346_v7  ;;  %3911 = vmatpush.bf16.msra.mxu1 %v6602_v6  ;;  %v9840_v7 = vperm.slane %v9821_v38, 1  ;;  %v6906_v6 = vor.u32 %v7650_v59, %v6905_v42  ;;  %v7065_v42 = vld [vmem:[%s8840_s20 + $0x1d0] sm:$0xf]  ;;  %v7690_v59 = vld [vmem:[%s8840_s20 + $0x1d4] sm:$0xf0] }
 0x76f   : > { %3929 = vmatpush.bf16.msra.mxu2 %v6350_v56  ;;  %3947 = vmatpush.bf16.msra.mxu3 %v6606_v11  ;;  %v7018_v56 = vor.u32 %v7678_v57, %v7017_v54 }
 0x770   : > { %3822 = vmatmul.bf16.vlgmr.msrb.gmra.mxu0 %v9625_v22  ;;  %3840 = vmatmul.bf16.vlgmr.msrb.gmra.mxu1 %v9627_v23 }
 0x771   : > { %3858 = vmatmul.bf16.vlgmr.msrb.gmra.mxu2 %v9625_v22  ;;  %3876 = vmatmul.bf16.vlgmr.msrb.gmra.mxu3 %v9627_v23 }
 0x772   : > { %4964 = vmatpush.bf16.msrb.mxu0 %v6890_v37  ;;  %4982 = vmatpush.bf16.msrb.mxu1 %v6954_v19  ;;  %v6897_v37 = vld [vmem:[%s8840_s20 + $0x80] sm:$0xf] }
 0x773   : > { %5000 = vmatpush.bf16.msrb.mxu2 %v7018_v56  ;;  %v6898_v17 = vor.u32 %v7648_v15, %v6897_v37  ;;  %v6985_v56 = vld [vmem:[%s8840_s20 + $0x130] sm:$0xf] }
 0x776   : > { %4965 = vmatpush.bf16.msrb.mxu0 %v6882_v60  ;;  %4983 = vmatpush.bf16.msrb.mxu1 %v6946_v24 }
 0x77a   : > { %4984 = vmatpush.bf16.msrb.mxu1 %v6938_v4 }
 0x77e   : > { %4985 = vmatpush.bf16.msrb.mxu1 %v6930_v35 }
 0x780   : > { %3827 = vmatmul.bf16.gmra.mxu0 %v9672_v29  ;;  %3845 = vmatmul.bf16.gmra.mxu1 %v9674_v10 }
 0x781   : > { %3863 = vmatmul.bf16.gmra.mxu2 %v9672_v29  ;;  %3881 = vmatmul.bf16.gmra.mxu3 %v9674_v10 }
 0x782   : > { %4986 = vmatpush.bf16.msrb.mxu1 %v6922_v40 }
 0x786   : > { %4987 = vmatpush.bf16.msrb.mxu1 %v6914_v31 }
 0x78a   : > { %4988 = vmatpush.bf16.msrb.mxu1 %v6906_v6 }
 0x78e   : > { %4989 = vmatpush.bf16.msrb.mxu1 %v6898_v17  ;;  %v7688_v17 = vld [vmem:[%s8840_s20 + $0x1c4] sm:$0xf0] }
 0x790   : > { %3894 = vmatmul.bf16.vlgmr.msra.gmra.mxu0 %v9625_v22  ;;  %3912 = vmatmul.bf16.vlgmr.msra.gmra.mxu1 %v9627_v23 }
 0x791   : > { %3930 = vmatmul.bf16.vlgmr.msra.gmra.mxu2 %v9625_v22  ;;  %3948 = vmatmul.bf16.vlgmr.msra.gmra.mxu3 %v9627_v23  ;;  %v6873_v22 = vld [vmem:[%s8840_s20 + $0x50] sm:$0xf] }
 0x792   : > { %v6874_v23 = vor.u32 %v7642_v46, %v6873_v22  ;;  %v7009_v46 = vld [vmem:[%s8840_s20 + $0x160] sm:$0xf] }
 0x794   : > { %4966 = vmatpush.bf16.msrb.mxu0 %v6874_v23  ;;  %v7676_v23 = vld [vmem:[%s8840_s20 + $0x164] sm:$0xf0] }
 0x795   : > { %v7010_v47 = vor.u32 %v7676_v23, %v7009_v46 }
 0x797   : > { %5001 = vmatpush.bf16.msrb.mxu2 %v7010_v47 }
 0x798   : > { %4967 = vmatpush.bf16.msrb.mxu0 %v6866_v32  ;;  %v7694_v32 = vld [vmem:[%s8840_s20 + $0x1f4] sm:$0xf0] }
 0x799   : > { %v7082_v48 = vor.u32 %v7694_v32, %v7081_v30  ;;  %v6977_v30 = vld [vmem:[%s8840_s20 + $0x120] sm:$0xf]  ;;  %v7668_v32 = vld [vmem:[%s8840_s20 + $0x124] sm:$0xf0] }
 0x79b   : > { %5018 = vmatpush.bf16.msrb.mxu3 %v7082_v48 }
 0x79c   : > { %4968 = vmatpush.bf16.msrb.mxu0 %v6858_v3  ;;  %v7674_v3 = vld [vmem:[%s8840_s20 + $0x154] sm:$0xf0] }
 0x79d   : > { %v7002_v34 = vor.u32 %v7674_v3, %v7001_v18  ;;  %v7049_v3 = vld [vmem:[%s8840_s20 + $0x1b0] sm:$0xf] }
 0x79f   : > { %5002 = vmatpush.bf16.msrb.mxu2 %v7002_v34 }
 0x7a0   : > { %3899 = vmatmul.bf16.gmra.mxu0 %v9672_v29  ;;  %3917 = vmatmul.bf16.gmra.mxu1 %v9674_v10 }
 0x7a1   : > { %3935 = vmatmul.bf16.gmra.mxu2 %v9672_v29  ;;  %3953 = vmatmul.bf16.gmra.mxu3 %v9674_v10  ;;  %v7636_v29 = vld [vmem:[%s8840_s20 + $0x24] sm:$0xf0] }
 0x7a2   : > { %v6850_v10 = vor.u32 %v7636_v29, %v6849_v27 }
 0x7a4   : > { %4969 = vmatpush.bf16.msrb.mxu0 %v6850_v10  ;;  %v7073_v10 = vld [vmem:[%s8840_s20 + $0x1e0] sm:$0xf] }
 0x7a8   : > { %4970 = vmatpush.bf16.msrb.mxu0 %v6842_v51  ;;  %v7074_v51 = vor.u32 %v7692_v62, %v7073_v10  ;;  %v9904_v10 = vperm.slane %v9821_v38, 2  ;;  %v6969_v62 = vld [vmem:[%s8840_s20 + $0x110] sm:$0xf] }
 0x7aa   : > { %5019 = vmatpush.bf16.msrb.mxu3 %v7074_v51  ;;  %v7666_v51 = vld [vmem:[%s8840_s20 + $0x114] sm:$0xf0] }
 0x7ac   : > { %4971 = vmatpush.bf16.msrb.mxu0 %v6834_v0 }
 0x7ad   : > { %v3679_v52 = vpop.f32.mrf.mxu0  ;;  %v3697_v44 = vpop.f32.mrf.mxu1 }
 0x7ae   : > { %v3680_v28 = vadd.f32 %v3679_v52, %v9826_v41  ;;  %v6993_v52 = vld [vmem:[%s8840_s20 + $0x140] sm:$0xf] }
 0x7b0   : > { %v9835_v1 = vadd.f32 %v3697_v44, %v3680_v28  ;;  %v7672_v44 = vld [vmem:[%s8840_s20 + $0x144] sm:$0xf0] }
 0x7b1   : > { %v6994_v61 = vor.u32 %v7672_v44, %v6993_v52  ;;  %v6970_v52 = vor.u32 %v7666_v51, %v6969_v62  ;;  %v7041_v44 = vld [vmem:[%s8840_s20 + $0x1a0] sm:$0xf] }
 0x7b2   : > { %v3958_v9 = vmul.f32 %v9835_v1, %v9835_v1 }
 0x7b3   : > { %5003 = vmatpush.bf16.msrb.mxu2 %v6994_v61 }
 0x7b4   : > { %v3982_v11 = vmul.f32 %v3958_v9, %v9835_v1  ;;  %v3715_v58 = vpop.f32.mrf.mxu2  ;;  %v3733_v14 = vpop.f32.mrf.mxu3  ;;  %v7066_v9 = vor.u32 %v7690_v59, %v7065_v42 }
 0x7b5   : > { %v3716_v63 = vadd.f32 %v3715_v58, %v9840_v7  ;;  %v3681_v60 = vpop.f32.mrf.mxu0  ;;  %v3699_v16 = vpop.f32.mrf.mxu1 }
 0x7b6   : > { %v4006_v19 = vmul.f32 0.044715, %v3982_v11  ;;  %v3682_v22 = vadd.f32 %v3681_v60, %v9826_v41  ;;  %v7670_v11 = vld [vmem:[%s8840_s20 + $0x134] sm:$0xf0]  ;;  %5020 = vmatpush.bf16.msrb.mxu3 %v7066_v9 }
 0x7b7   : > { %v9853_v20 = vadd.f32 %v3733_v14, %v3716_v63  ;;  %v6986_v14 = vor.u32 %v7670_v11, %v6985_v56 }
 0x7b8   : > { %v4030_v24 = vadd.f32 %v4006_v19, %v9835_v1  ;;  %v9856_v13 = vadd.f32 %v3699_v16, %v3682_v22  ;;  %v7057_v16 = vld [vmem:[%s8840_s20 + $0x1c0] sm:$0xf] }
 0x7b9   : > { %v3959_v26 = vmul.f32 %v9853_v20, %v9853_v20  ;;  %5004 = vmatpush.bf16.msrb.mxu2 %v6986_v14  ;;  %v7058_v47 = vor.u32 %v7688_v17, %v7057_v16 }
 0x7ba   : > { %v4054_v4 = vmul.f32 0.7978846, %v4030_v24  ;;  %v3966_v33 = vmul.f32 %v9856_v13, %v9856_v13 }
 0x7bb   : > { %v3983_v21 = vmul.f32 %v3959_v26, %v9853_v20  ;;  %5021 = vmatpush.bf16.msrb.mxu3 %v7058_v47  ;;  %v7145_v47 = vld [vmem:[%s8840_s20 + $0x270] sm:$0xf] }
 0x7bc   : > { %v3990_v35 = vmul.f32 %v3966_v33, %v9856_v13  ;;  %v3717_v27 = vpop.f32.mrf.mxu2  ;;  %v3735_v29 = vpop.f32.mrf.mxu3  ;;  %7956 = vtanh.f32 %v4054_v4  ;;  %v6978_v33 = vor.u32 %v7668_v32, %v6977_v30 }
 0x7bd   : > { %v4007_v39 = vmul.f32 0.044715, %v3983_v21  ;;  %v3718_v40 = vadd.f32 %v3717_v27, %v9840_v7  ;;  %v3684_v49 = vpop.f32.mrf.mxu0  ;;  %v3702_v50 = vpop.f32.mrf.mxu1 }
 0x7be   : > { %v4014_v25 = vmul.f32 0.044715, %v3990_v35  ;;  %v3685_v36 = vadd.f32 %v3684_v49, %v9826_v41  ;;  %5005 = vmatpush.bf16.msrb.mxu2 %v6978_v33 }
 0x7bf   : > { %v4031_v31 = vadd.f32 %v4007_v39, %v9853_v20  ;;  %v9875_v28 = vadd.f32 %v3735_v29, %v3718_v40 }
 0x7c0   : > { %v4038_v55 = vadd.f32 %v4014_v25, %v9856_v13  ;;  %v9878_v0 = vadd.f32 %v3702_v50, %v3685_v36 }
 0x7c1   : > { %v4055_v6 = vmul.f32 0.7978846, %v4031_v31  ;;  %v3967_v41 = vmul.f32 %v9875_v28, %v9875_v28  ;;  %v7684_v31 = vld [vmem:[%s8840_s20 + $0x1a4] sm:$0xf0] }
 0x7c2   : > { %v4062_v54 = vmul.f32 0.7978846, %v4038_v55  ;;  %v3974_v57 = vmul.f32 %v9878_v0, %v9878_v0  ;;  %v7957_v37 = vpop.eup %7956  ;;  %5006 = vmatpush.bf16.msrb.mxu2 %v6970_v52 }
 0x7c3   : > { %v3991_v58 = vmul.f32 %v3967_v41, %v9875_v28  ;;  %v4102_v26 = vadd.f32 1.0, %v7957_v37 }
 0x7c4   : > { %7958 = vtanh.f32 %v4062_v54  ;;  %v3998_v15 = vmul.f32 %v3974_v57, %v9878_v0  ;;  %v3720_v63 = vpop.f32.mrf.mxu2  ;;  %v3738_v60 = vpop.f32.mrf.mxu3  ;;  %v6961_v54 = vld [vmem:[%s8840_s20 + $0x100] sm:$0xf]  ;;  %v7664_v57 = vld [vmem:[%s8840_s20 + $0x104] sm:$0xf0] }
 0x7c5   : > { %7960 = vtanh.f32 %v4055_v6  ;;  %v4015_v19 = vmul.f32 0.044715, %v3991_v58  ;;  %v3721_v22 = vadd.f32 %v3720_v63, %v9840_v7  ;;  %v3686_v46 = vpop.f32.mrf.mxu0  ;;  %v3704_v23 = vpop.f32.mrf.mxu1  ;;  %v7686_v7 = vld [vmem:[%s8840_s20 + $0x1b4] sm:$0xf0]  ;;  %v4126_v40 = vmul.f32 0.5, %v4102_v26 }
 0x7c6   : > { %v4022_v24 = vmul.f32 0.044715, %v3998_v15  ;;  %v7050_v35 = vor.u32 %v7686_v7, %v7049_v3  ;;  %v7042_v6 = vor.u32 %v7684_v31, %v7041_v44  ;;  %v6962_v14 = vor.u32 %v7664_v57, %v6961_v54  ;;  %v7033_v15 = vld [vmem:[%s8840_s20 + $0x190] sm:$0xf]  ;;  %v7682_v63 = vld [vmem:[%s8840_s20 + $0x194] sm:$0xf0] }
 0x7c7   : > { %v4039_v48 = vadd.f32 %v4015_v19, %v9875_v28  ;;  %v9896_v4 = vadd.f32 %v3738_v60, %v3721_v22  ;;  %v4150_v56 = vmul.f32 %v4126_v40, %v9835_v1  ;;  %v9924_v19 = vperm.slane %v9821_v38, 3  ;;  %v7680_v3 = vld [vmem:[%s8840_s20 + $0x184] sm:$0xf0]  ;;  %v7726_v31 = vld [vmem:[%s8840_s20 + $0x2f4] sm:$0xf0] }
 0x7c8   : > { %v4046_v18 = vadd.f32 %v4022_v24, %v9878_v0  ;;  %5022 = vmatpush.bf16.msrb.mxu3 %v7050_v35  ;;  %v7034_v1 = vor.u32 %v7682_v63, %v7033_v15  ;;  %5007 = vmatpush.bf16.msrb.mxu2 %v6962_v14  ;;  %v7710_v24 = vld [vmem:[%s8840_s20 + $0x274] sm:$0xf0]  ;;  %v7201_v15 = vld [vmem:[%s8840_s20 + $0x2e0] sm:$0xf]  ;;  %v7724_v63 = vld [vmem:[%s8840_s20 + $0x2e4] sm:$0xf0] }
 0x7c9   : > { %v4063_v21 = vmul.f32 0.7978846, %v4039_v48  ;;  %v3975_v34 = vmul.f32 %v9896_v4, %v9896_v4  ;;  %v7146_v30 = vor.u32 %v7710_v24, %v7145_v47  ;;  %v7706_v54 = vld [vmem:[%s8840_s20 + $0x254] sm:$0xf0]  ;;  %v7121_v24 = vld [vmem:[%s8840_s20 + $0x240] sm:$0xf] }
 0x7ca   : > { %v7959_v27 = vpop.eup %7958  ;;  %v4070_v29 = vmul.f32 0.7978846, %v4046_v18  ;;  %v7025_v18 = vld [vmem:[%s8840_s20 + $0x180] sm:$0xf] }
 0x7cb   : > { %v7961_v39 = vpop.eup %7960  ;;  %v4110_v49 = vadd.f32 1.0, %v7959_v27  ;;  %7962 = vtanh.f32 %v4063_v21  ;;  %v3999_v50 = vmul.f32 %v3975_v34, %v9896_v4  ;;  %5036 = vmatpush.bf16.msra.mxu0 %v7146_v30  ;;  %v7026_v27 = vor.u32 %v7680_v3, %v7025_v18  ;;  %v7704_v30 = vld [vmem:[%s8840_s20 + $0x244] sm:$0xf0]  ;;  %v7193_v3 = vld [vmem:[%s8840_s20 + $0x2d0] sm:$0xf] }
 0x7cc   : > { %v3722_v25 = vpop.f32.mrf.mxu2  ;;  %v3740_v36 = vpop.f32.mrf.mxu3  ;;  %7964 = vtanh.f32 %v4070_v29  ;;  %v4103_v41 = vadd.f32 1.0, %v7961_v39  ;;  %5023 = vmatpush.bf16.msrb.mxu3 %v7042_v6 }
 0x7cd   : > { %v4134_v61 = vmul.f32 0.5, %v4110_v49  ;;  %v4023_v55 = vmul.f32 0.044715, %v3999_v50  ;;  %v3751_v42 = vpop.f32.mrf.mxu0  ;;  %v3769_v59 = vpop.f32.mrf.mxu1  ;;  %v7137_v49 = vld [vmem:[%s8840_s20 + $0x260] sm:$0xf] }
 0x7ce   : > { %v3752_v9 = vadd.f32 %v3751_v42, %v9904_v10  ;;  %v4127_v22 = vmul.f32 0.5, %v4103_v41  ;;  %v7708_v50 = vld [vmem:[%s8840_s20 + $0x264] sm:$0xf0]  ;;  %v7129_v41 = vld [vmem:[%s8840_s20 + $0x250] sm:$0xf] }
 0x7cf   : > { %v4158_v11 = vmul.f32 %v4134_v61, %v9856_v13  ;;  %v4047_v58 = vadd.f32 %v4023_v55, %v9896_v4  ;;  %v7138_v25 = vor.u32 %v7708_v50, %v7137_v49  ;;  %v7130_v14 = vor.u32 %v7706_v54, %v7129_v41  ;;  %v7105_v54 = vld [vmem:[%s8840_s20 + $0x220] sm:$0xf] }
 0x7d0   : > { %v9917_v37 = vadd.f32 %v3769_v59, %v3752_v9  ;;  %5024 = vmatpush.bf16.msrb.mxu3 %v7034_v1  ;;  %v4151_v29 = vmul.f32 %v4127_v22, %v9853_v20  ;;  %v7209_v20 = vld [vmem:[%s8840_s20 + $0x2f0] sm:$0xf] }
 0x7d1   : > { %v7963_v60 = vpop.eup %7962  ;;  %v9921_v16 = vpack.c.bf16 %v4158_v11, %v4150_v56  ;;  %v4071_v17 = vmul.f32 0.7978846, %v4047_v58  ;;  %5037 = vmatpush.bf16.msra.mxu0 %v7138_v25  ;;  %v7210_v42 = vor.u32 %v7726_v31, %v7209_v20 }
 0x7d2   : > { %v7965_v13 = vpop.eup %7964  ;;  %v4111_v46 = vadd.f32 1.0, %v7963_v60  ;;  %v3960_v23 = vmul.f32 %v9917_v37, %v9917_v37 }
 0x7d3   : > { %4972 = vmatmul.bf16.vlgmr.msrb.gmra.mxu0 %v9921_v16  ;;  %7966 = vtanh.f32 %v4071_v17  ;;  %v4118_v35 = vadd.f32 1.0, %v7965_v13  ;;  %5054 = vmatpush.bf16.msra.mxu1 %v7210_v42 }
 0x7d4   : > { %v4135_v32 = vmul.f32 0.5, %v4111_v46  ;;  %v3984_v26 = vmul.f32 %v3960_v23, %v9917_v37  ;;  %v3787_v48 = vpop.f32.mrf.mxu2  ;;  %v3805_v33 = vpop.f32.mrf.mxu3  ;;  %5025 = vmatpush.bf16.msrb.mxu3 %v7026_v27  ;;  %v7202_v46 = vor.u32 %v7724_v63, %v7201_v15  ;;  %v7718_v63 = vld [vmem:[%s8840_s20 + $0x2b4] sm:$0xf0] }
 0x7d5   : > { %v3788_v7 = vadd.f32 %v3787_v48, %v9924_v19  ;;  %v3753_v21 = vpop.f32.mrf.mxu0  ;;  %v3771_v34 = vpop.f32.mrf.mxu1  ;;  %v4142_v55 = vmul.f32 0.5, %v4118_v35  ;;  %5038 = vmatpush.bf16.msra.mxu0 %v7130_v14  ;;  %v7122_v48 = vor.u32 %v7704_v30, %v7121_v24 }
 0x7d6   : > { %v4159_v62 = vmul.f32 %v4135_v32, %v9875_v28  ;;  %v4008_v39 = vmul.f32 0.044715, %v3984_v26  ;;  %v3754_v40 = vadd.f32 %v3753_v21, %v9904_v10 }
 0x7d7   : > { %v9940_v51 = vadd.f32 %v3805_v33, %v3788_v7  ;;  %v4166_v22 = vmul.f32 %v4142_v55, %v9878_v0  ;;  %5055 = vmatpush.bf16.msra.mxu1 %v7202_v46  ;;  %v7722_v7 = vld [vmem:[%s8840_s20 + $0x2d4] sm:$0xf0]  ;;  %v10002_v46 = vperm.slane %v9821_v38, 4 }
 0x7d8   : > { %v9942_v36 = vpack.c.bf16 %v4159_v62, %v4151_v29  ;;  %v4032_v52 = vadd.f32 %v4008_v39, %v9917_v37  ;;  %v9945_v44 = vadd.f32 %v3771_v34, %v3754_v40  ;;  %v7194_v35 = vor.u32 %v7722_v7, %v7193_v3  ;;  %v7113_v62 = vld [vmem:[%s8840_s20 + $0x230] sm:$0xf]  ;;  %v7702_v39 = vld [vmem:[%s8840_s20 + $0x234] sm:$0xf0]  ;;  %v7169_v7 = vld [vmem:[%s8840_s20 + $0x2a0] sm:$0xf] }
 0x7d9   : > { %v7967_v28 = vpop.eup %7966  ;;  %v3961_v61 = vmul.f32 %v9940_v51, %v9940_v51  ;;  %v9975_v34 = vpack.c.bf16 %v4166_v22, %v4166_v22  ;;  %5039 = vmatpush.bf16.msra.mxu0 %v7122_v48  ;;  %v7114_v49 = vor.u32 %v7702_v39, %v7113_v62  ;;  %v7698_v48 = vld [vmem:[%s8840_s20 + $0x214] sm:$0xf0] }
 0x7da   : > { %v4056_v59 = vmul.f32 0.7978846, %v4032_v52  ;;  %v3968_v6 = vmul.f32 %v9945_v44, %v9945_v44  ;;  %4990 = vmatmul.bf16.vlgmr.msrb.gmra.mxu1 %v9942_v36  ;;  %v4119_v58 = vadd.f32 1.0, %v7967_v28  ;;  %v7185_v28 = vld [vmem:[%s8840_s20 + $0x2c0] sm:$0xf] }
 0x7db   : > { %v3985_v9 = vmul.f32 %v3961_v61, %v9940_v51  ;;  %5056 = vmatpush.bf16.msra.mxu1 %v7194_v35  ;;  %v7720_v61 = vld [vmem:[%s8840_s20 + $0x2c4] sm:$0xf0] }
 0x7dc   : > { %v3992_v57 = vmul.f32 %v3968_v6, %v9945_v44  ;;  %v3789_v56 = vpop.f32.mrf.mxu2  ;;  %v3807_v11 = vpop.f32.mrf.mxu3  ;;  %7968 = vtanh.f32 %v4056_v59  ;;  %v4143_v18 = vmul.f32 0.5, %v4119_v58  ;;  %v7186_v41 = vor.u32 %v7720_v61, %v7185_v28  ;;  %v7161_v61 = vld [vmem:[%s8840_s20 + $0x290] sm:$0xf] }
 0x7dd   : > { %v4009_v60 = vmul.f32 0.044715, %v3985_v9  ;;  %v3790_v17 = vadd.f32 %v3789_v56, %v9924_v19  ;;  %v3756_v1 = vpop.f32.mrf.mxu0  ;;  %v3774_v13 = vpop.f32.mrf.mxu1  ;;  %5040 = vmatpush.bf16.msra.mxu0 %v7114_v49  ;;  %v7089_v49 = vld [vmem:[%s8840_s20 + $0x200] sm:$0xf] }
 0x7de   : > { %v4016_v23 = vmul.f32 0.044715, %v3992_v57  ;;  %v3757_v47 = vadd.f32 %v3756_v1, %v9904_v10  ;;  %v4167_v31 = vmul.f32 %v4143_v18, %v9896_v4  ;;  %v7700_v57 = vld [vmem:[%s8840_s20 + $0x224] sm:$0xf0] }
 0x7df   : > { %v4033_v32 = vadd.f32 %v4009_v60, %v9940_v51  ;;  %v9966_v26 = vadd.f32 %v3807_v11, %v3790_v17  ;;  %5057 = vmatpush.bf16.msra.mxu1 %v7186_v41  ;;  %v7106_v58 = vor.u32 %v7700_v57, %v7105_v54 }
 0x7e0   : > { %v4040_v33 = vadd.f32 %v4016_v23, %v9945_v44  ;;  %v9969_v0 = vadd.f32 %v3774_v13, %v3757_v47  ;;  %v9994_v15 = vpack.c.bf16 %v4167_v31, %v4167_v31  ;;  %v7097_v23 = vld [vmem:[%s8840_s20 + $0x210] sm:$0xf] }
 0x7e1   : > { %v4057_v21 = vmul.f32 0.7978846, %v4033_v32  ;;  %v3969_v10 = vmul.f32 %v9966_v26, %v9966_v26  ;;  %5041 = vmatpush.bf16.msra.mxu0 %v7106_v58  ;;  %v7098_v3 = vor.u32 %v7698_v48, %v7097_v23  ;;  %v7153_v23 = vld [vmem:[%s8840_s20 + $0x280] sm:$0xf] }
 0x7e2   : > { %v4064_v27 = vmul.f32 0.7978846, %v4040_v33  ;;  %v3976_v29 = vmul.f32 %v9969_v0, %v9969_v0  ;;  %v7969_v50 = vpop.eup %7968 }
 0x7e3   : > { %v3993_v40 = vmul.f32 %v3969_v10, %v9966_v26  ;;  %4977 = vmatmul.bf16.gmra.mxu0 %v9975_v34  ;;  %v4104_v56 = vadd.f32 1.0, %v7969_v50  ;;  %v7696_v50 = vld [vmem:[%s8840_s20 + $0x204] sm:$0xf0] }
 0x7e4   : > { %7970 = vtanh.f32 %v4064_v27  ;;  %v4000_v25 = vmul.f32 %v3976_v29, %v9969_v0  ;;  %v3792_v52 = vpop.f32.mrf.mxu2  ;;  %v3810_v20 = vpop.f32.mrf.mxu3  ;;  %v7090_v31 = vor.u32 %v7696_v50, %v7089_v49  ;;  %v7337_v50 = vld [vmem:[%s8840_s20 + $0x3f0] sm:$0xf] }
 0x7e5   : > { %7972 = vtanh.f32 %v4057_v21  ;;  %v4017_v55 = vmul.f32 0.044715, %v3993_v40  ;;  %v3793_v42 = vadd.f32 %v3792_v52, %v9924_v19  ;;  %v3758_v59 = vpop.f32.mrf.mxu0  ;;  %v3776_v6 = vpop.f32.mrf.mxu1  ;;  %v7177_v19 = vld [vmem:[%s8840_s20 + $0x2b0] sm:$0xf]  ;;  %v4128_v24 = vmul.f32 0.5, %v4104_v56  ;;  %5042 = vmatpush.bf16.msra.mxu0 %v7098_v3 }
 0x7e6   : > { %v4024_v9 = vmul.f32 0.044715, %v4000_v25  ;;  %v7178_v1 = vor.u32 %v7718_v63, %v7177_v19  ;;  %v7716_v21 = vld [vmem:[%s8840_s20 + $0x2a4] sm:$0xf0]  ;;  %v7273_v56 = vld [vmem:[%s8840_s20 + $0x370] sm:$0xf] }
 0x7e7   : > { %v4041_v11 = vadd.f32 %v4017_v55, %v9966_v26  ;;  %v9991_v4 = vadd.f32 %v3810_v20, %v3793_v42  ;;  %v7170_v62 = vor.u32 %v7716_v21, %v7169_v7  ;;  %v4152_v25 = vmul.f32 %v4128_v24, %v9917_v37  ;;  %v7714_v55 = vld [vmem:[%s8840_s20 + $0x294] sm:$0xf0]  ;;  %v7645_v19 = vld [vmem:[%s8840_s20 + $0x74] sm:$0xf]  ;;  %v6891_v63 = vld [vmem:[%s8840_s20 + $0x78] sm:$0xf0] }
 0x7e8   : > { %v4048_v14 = vadd.f32 %v4024_v9, %v9969_v0  ;;  %5058 = vmatpush.bf16.msra.mxu1 %v7178_v1  ;;  %v10022_v37 = vperm.slane %v9821_v38, 5  ;;  %v7265_v21 = vld [vmem:[%s8840_s20 + $0x360] sm:$0xf] }
 0x7e9   : > { %v4065_v60 = vmul.f32 0.7978846, %v4041_v11  ;;  %v3977_v17 = vmul.f32 %v9991_v4, %v9991_v4  ;;  %5043 = vmatpush.bf16.msra.mxu0 %v7090_v31  ;;  %v7742_v11 = vld [vmem:[%s8840_s20 + $0x374] sm:$0xf0] }
 0x7ea   : > { %v7971_v13 = vpop.eup %7970  ;;  %v4072_v22 = vmul.f32 0.7978846, %v4048_v14  ;;  %4995 = vmatmul.bf16.gmra.mxu1 %v9994_v15  ;;  %v7274_v14 = vor.u32 %v7742_v11, %v7273_v56  ;;  %v7641_v56 = vld [vmem:[%s8840_s20 + $0x54] sm:$0xf]  ;;  %v6875_v11 = vld [vmem:[%s8840_s20 + $0x58] sm:$0xf0] }
 0x7eb   : > { %v7973_v47 = vpop.eup %7972  ;;  %v4112_v30 = vadd.f32 1.0, %v7971_v13  ;;  %7974 = vtanh.f32 %v4065_v60  ;;  %v4001_v32 = vmul.f32 %v3977_v17, %v9991_v4 }
 0x7ec   : > { %v3794_v33 = vpop.f32.mrf.mxu2  ;;  %v3812_v18 = vpop.f32.mrf.mxu3  ;;  %7976 = vtanh.f32 %v4072_v22  ;;  %v4105_v39 = vadd.f32 1.0, %v7973_v47  ;;  %5059 = vmatpush.bf16.msra.mxu1 %v7170_v62  ;;  %v6894_v22 = vor.u32 %v7645_v19, %v6891_v63  ;;  %v7712_v47 = vld [vmem:[%s8840_s20 + $0x284] sm:$0xf0]  ;;  %5072 = vmatpush.bf16.msra.mxu2 %v7274_v14  ;;  %v7643_v62 = vld [vmem:[%s8840_s20 + $0x64] sm:$0xf] }
 0x7ed   : > { %v4136_v10 = vmul.f32 0.5, %v4112_v30  ;;  %v4025_v35 = vmul.f32 0.044715, %v4001_v32  ;;  %v3823_v27 = vpop.f32.mrf.mxu0  ;;  %v3841_v29 = vpop.f32.mrf.mxu1  ;;  %v7154_v48 = vor.u32 %v7712_v47, %v7153_v23 }
 0x7ee   : > { %v3824_v40 = vadd.f32 %v3823_v27, %v10002_v46  ;;  %v4129_v9 = vmul.f32 0.5, %v4105_v39  ;;  %5108 = vmatpush.bf16.msrb.mxu0 %v6894_v22  ;;  %v6883_v39 = vld [vmem:[%s8840_s20 + $0x68] sm:$0xf0] }
 0x7ef   : > { %v4160_v52 = vmul.f32 %v4136_v10, %v9945_v44  ;;  %v4049_v20 = vadd.f32 %v4025_v35, %v9991_v4  ;;  %v7162_v44 = vor.u32 %v7714_v55, %v7161_v61  ;;  %v7740_v10 = vld [vmem:[%s8840_s20 + $0x364] sm:$0xf0]  ;;  %v6886_v49 = vor.u32 %v7643_v62, %v6883_v39  ;;  %v6955_v55 = vld [vmem:[%s8840_s20 + $0xf8] sm:$0xf0]  ;;  %v7639_v62 = vld [vmem:[%s8840_s20 + $0x44] sm:$0xf] }
 0x7f0   : > { %v10015_v28 = vadd.f32 %v3841_v29, %v3824_v40  ;;  %v4153_v33 = vmul.f32 %v4129_v9, %v9940_v51  ;;  %v7266_v29 = vor.u32 %v7740_v10, %v7265_v21  ;;  %v7257_v9 = vld [vmem:[%s8840_s20 + $0x350] sm:$0xf]  ;;  %v6867_v39 = vld [vmem:[%s8840_s20 + $0x48] sm:$0xf0] }
 0x7f1   : > { %v7975_v42 = vpop.eup %7974  ;;  %v10019_v59 = vpack.c.bf16 %v4160_v52, %v4152_v25  ;;  %v4073_v6 = vmul.f32 0.7978846, %v4049_v20  ;;  %5060 = vmatpush.bf16.msra.mxu1 %v7162_v44  ;;  %v7758_v25 = vld [vmem:[%s8840_s20 + $0x3f4] sm:$0xf0]  ;;  %v7661_v52 = vld [vmem:[%s8840_s20 + $0xf4] sm:$0xf] }
 0x7f2   : > { %v7977_v41 = vpop.eup %7976  ;;  %v4113_v54 = vadd.f32 1.0, %v7975_v42  ;;  %v3962_v57 = vmul.f32 %v10015_v28, %v10015_v28  ;;  %5073 = vmatpush.bf16.msra.mxu2 %v7266_v29  ;;  %v7338_v61 = vor.u32 %v7758_v25, %v7337_v50  ;;  %5109 = vmatpush.bf16.msrb.mxu0 %v6886_v49  ;;  %v6870_v49 = vor.u32 %v7639_v62, %v6867_v39  ;;  %v7321_v50 = vld [vmem:[%s8840_s20 + $0x3d0] sm:$0xf]  ;;  %v7754_v25 = vld [vmem:[%s8840_s20 + $0x3d4] sm:$0xf0] }
 0x7f3   : > { %5008 = vmatmul.bf16.vlgmr.msrb.gmra.mxu2 %v10019_v59  ;;  %v4120_v58 = vadd.f32 1.0, %v7977_v41  ;;  %7978 = vtanh.f32 %v4073_v6  ;;  %v6958_v41 = vor.u32 %v7661_v52, %v6955_v55  ;;  %v7657_v52 = vld [vmem:[%s8840_s20 + $0xd4] sm:$0xf]  ;;  %v7322_v55 = vor.u32 %v7754_v25, %v7321_v50  ;;  %v6851_v62 = vld [vmem:[%s8840_s20 + $0x28] sm:$0xf0] }
 0x7f4   : > { %v4137_v60 = vmul.f32 0.5, %v4113_v54  ;;  %v3986_v17 = vmul.f32 %v3962_v57, %v10015_v28  ;;  %v3859_v1 = vpop.f32.mrf.mxu2  ;;  %v3877_v13 = vpop.f32.mrf.mxu3  ;;  %5090 = vmatpush.bf16.msra.mxu3 %v7338_v61  ;;  %v7738_v57 = vld [vmem:[%s8840_s20 + $0x354] sm:$0xf0]  ;;  %v7305_v50 = vld [vmem:[%s8840_s20 + $0x3b0] sm:$0xf] }
 0x7f5   : > { %v3860_v24 = vadd.f32 %v3859_v1, %v10022_v37  ;;  %v3825_v30 = vpop.f32.mrf.mxu0  ;;  %v3843_v32 = vpop.f32.mrf.mxu1  ;;  %v4144_v27 = vmul.f32 0.5, %v4120_v58  ;;  %5061 = vmatpush.bf16.msra.mxu1 %v7154_v48  ;;  %v7756_v1 = vld [vmem:[%s8840_s20 + $0x3e4] sm:$0xf0]  ;;  %v6947_v48 = vld [vmem:[%s8840_s20 + $0xe8] sm:$0xf0] }
 0x7f6   : > { %v4161_v18 = vmul.f32 %v4137_v60, %v9966_v26  ;;  %v4010_v3 = vmul.f32 0.044715, %v3986_v17  ;;  %v3826_v7 = vadd.f32 %v3825_v30, %v10002_v46  ;;  %v7258_v60 = vor.u32 %v7738_v57, %v7257_v9  ;;  %v7329_v17 = vld [vmem:[%s8840_s20 + $0x3e0] sm:$0xf]  ;;  %v7241_v9 = vld [vmem:[%s8840_s20 + $0x330] sm:$0xf] }
 0x7f7   : > { %v10040_v35 = vadd.f32 %v3877_v13, %v3860_v24  ;;  %v4168_v63 = vmul.f32 %v4144_v27, %v9969_v0  ;;  %v6878_v24 = vor.u32 %v7641_v56, %v6875_v11  ;;  %v7330_v30 = vor.u32 %v7756_v1, %v7329_v17  ;;  %v7637_v11 = vld [vmem:[%s8840_s20 + $0x34] sm:$0xf]  ;;  %v7750_v25 = vld [vmem:[%s8840_s20 + $0x3b4] sm:$0xf0] }
 0x7f8   : > { %v10044_v51 = vpack.c.bf16 %v4161_v18, %v4153_v33  ;;  %v4034_v26 = vadd.f32 %v4010_v3, %v10015_v28  ;;  %v10047_v40 = vadd.f32 %v3843_v32, %v3826_v7  ;;  %v7659_v32 = vld [vmem:[%s8840_s20 + $0xe4] sm:$0xf]  ;;  %5074 = vmatpush.bf16.msra.mxu2 %v7258_v60  ;;  %v7249_v3 = vld [vmem:[%s8840_s20 + $0x340] sm:$0xf]  ;;  %v7736_v7 = vld [vmem:[%s8840_s20 + $0x344] sm:$0xf0] }
 0x7f9   : > { %v7979_v20 = vpop.eup %7978  ;;  %v3963_v31 = vmul.f32 %v10040_v35, %v10040_v35  ;;  %5126 = vmatpush.bf16.msrb.mxu1 %v6958_v41  ;;  %v6950_v18 = vor.u32 %v7659_v32, %v6947_v48  ;;  %5110 = vmatpush.bf16.msrb.mxu0 %v6878_v24  ;;  %v7250_v29 = vor.u32 %v7736_v7, %v7249_v3  ;;  %v7732_v3 = vld [vmem:[%s8840_s20 + $0x324] sm:$0xf0] }
 0x7fa   : > { %v4058_v42 = vmul.f32 0.7978846, %v4034_v26  ;;  %v3970_v6 = vmul.f32 %v10047_v40, %v10047_v40  ;;  %5026 = vmatmul.bf16.vlgmr.msrb.gmra.mxu3 %v10044_v51  ;;  %v4121_v44 = vadd.f32 1.0, %v7979_v20  ;;  %v10086_v61 = vpack.c.bf16 %v4168_v63, %v4168_v63 }
 0x7fb   : > { %v3987_v54 = vmul.f32 %v3963_v31, %v10040_v35  ;;  %5091 = vmatpush.bf16.msra.mxu3 %v7330_v30 }
 0x7fc   : > { %v3994_v58 = vmul.f32 %v3970_v6, %v10047_v40  ;;  %v3861_v14 = vpop.f32.mrf.mxu2  ;;  %v3879_v19 = vpop.f32.mrf.mxu3  ;;  %7980 = vtanh.f32 %v4058_v42  ;;  %v4145_v27 = vmul.f32 0.5, %v4121_v44  ;;  %v6939_v42 = vld [vmem:[%s8840_s20 + $0xd8] sm:$0xf0]  ;;  %5075 = vmatpush.bf16.msra.mxu2 %v7250_v29  ;;  %v7635_v29 = vld [vmem:[%s8840_s20 + $0x24] sm:$0xf] }
 0x7fd   : > { %v4011_v13 = vmul.f32 0.044715, %v3987_v54  ;;  %v3862_v22 = vadd.f32 %v3861_v14, %v10022_v37  ;;  %v3828_v23 = vpop.f32.mrf.mxu0  ;;  %v3846_v47 = vpop.f32.mrf.mxu1  ;;  %5127 = vmatpush.bf16.msrb.mxu1 %v6950_v18  ;;  %v6942_v41 = vor.u32 %v7657_v52, %v6939_v42  ;;  %v7734_v54 = vld [vmem:[%s8840_s20 + $0x334] sm:$0xf0]  ;;  %5111 = vmatpush.bf16.msrb.mxu0 %v6870_v49  ;;  %v7233_v18 = vld [vmem:[%s8840_s20 + $0x320] sm:$0xf]  ;;  %v6854_v49 = vor.u32 %v7635_v29, %v6851_v62 }
 0x7fe   : > { %v4018_v33 = vmul.f32 0.044715, %v3994_v58  ;;  %v3829_v0 = vadd.f32 %v3828_v23, %v10002_v46  ;;  %v7242_v56 = vor.u32 %v7734_v54, %v7241_v9  ;;  %v6859_v58 = vld [vmem:[%s8840_s20 + $0x38] sm:$0xf0]  ;;  %v4169_v17 = vmul.f32 %v4145_v27, %v9991_v4  ;;  %v7655_v23 = vld [vmem:[%s8840_s20 + $0xc4] sm:$0xf] }
 0x7ff   : > { %v4035_v21 = vadd.f32 %v4011_v13, %v10040_v35  ;;  %v10074_v10 = vadd.f32 %v3879_v19, %v3862_v22  ;;  %5092 = vmatpush.bf16.msra.mxu3 %v7322_v55  ;;  %v6862_v1 = vor.u32 %v7637_v11, %v6859_v58  ;;  %v7313_v13 = vld [vmem:[%s8840_s20 + $0x3c0] sm:$0xf]  ;;  %v7752_v22 = vld [vmem:[%s8840_s20 + $0x3c4] sm:$0xf0]  ;;  %v7653_v52 = vld [vmem:[%s8840_s20 + $0xb4] sm:$0xf]  ;;  %v7306_v42 = vor.u32 %v7750_v25, %v7305_v50 }
 0x800   : > { %v4042_v46 = vadd.f32 %v4018_v33, %v10047_v40  ;;  %v10079_v26 = vadd.f32 %v3846_v47, %v3829_v0  ;;  %v7314_v48 = vor.u32 %v7752_v22, %v7313_v13  ;;  %v6931_v33 = vld [vmem:[%s8840_s20 + $0xc8] sm:$0xf0]  ;;  %5076 = vmatpush.bf16.msra.mxu2 %v7242_v56  ;;  %v10122_v9 = vperm.slane %v9821_v38, 6  ;;  %v6843_v13 = vld [vmem:[%s8840_s20 + $0x18] sm:$0xf0] }
 0x801   : > { %v4059_v20 = vmul.f32 0.7978846, %v4035_v21  ;;  %v3971_v31 = vmul.f32 %v10074_v10, %v10074_v10  ;;  %5128 = vmatpush.bf16.msrb.mxu1 %v6942_v41  ;;  %v6934_v4 = vor.u32 %v7655_v23, %v6931_v33  ;;  %5112 = vmatpush.bf16.msrb.mxu0 %v6862_v1  ;;  %v7297_v22 = vld [vmem:[%s8840_s20 + $0x3a0] sm:$0xf]  ;;  %v7728_v62 = vld [vmem:[%s8840_s20 + $0x304] sm:$0xf0] }
 0x802   : > { %v4066_v6 = vmul.f32 0.7978846, %v4042_v46  ;;  %v3978_v44 = vmul.f32 %v10079_v26, %v10079_v26  ;;  %v7981_v14 = vpop.eup %7980  ;;  %v10112_v46 = vpack.c.bf16 %v4169_v17, %v4169_v17  ;;  %v10129_v17 = vperm.slane %v9821_v38, 7  ;;  %v7748_v38 = vld [vmem:[%s8840_s20 + $0x3a4] sm:$0xf0] }
 0x803   : > { %7982 = vtanh.f32 %v4059_v20  ;;  %v3995_v57 = vmul.f32 %v3971_v31, %v10074_v10  ;;  %5013 = vmatmul.bf16.gmra.mxu2 %v10086_v61  ;;  %v4106_v7 = vadd.f32 1.0, %v7981_v14  ;;  %5093 = vmatpush.bf16.msra.mxu3 %v7314_v48  ;;  %v7730_v14 = vld [vmem:[%s8840_s20 + $0x314] sm:$0xf0] }
 0x804   : > { %7984 = vtanh.f32 %v4066_v6  ;;  %v4002_v19 = vmul.f32 %v3978_v44, %v10079_v26  ;;  %v3864_v63 = vpop.f32.mrf.mxu2  ;;  %v3882_v60 = vpop.f32.mrf.mxu3  ;;  %v6923_v6 = vld [vmem:[%s8840_s20 + $0xb8] sm:$0xf0] }
 0x805   : > { %v4019_v47 = vmul.f32 0.044715, %v3995_v57  ;;  %v3865_v24 = vadd.f32 %v3864_v63, %v10022_v37  ;;  %v3830_v30 = vpop.f32.mrf.mxu0  ;;  %v3848_v32 = vpop.f32.mrf.mxu1  ;;  %v7234_v37 = vor.u32 %v7732_v3, %v7233_v18  ;;  %5129 = vmatpush.bf16.msrb.mxu1 %v6934_v4  ;;  %v6926_v54 = vor.u32 %v7653_v52, %v6923_v6  ;;  %v7225_v57 = vld [vmem:[%s8840_s20 + $0x310] sm:$0xf]  ;;  %5113 = vmatpush.bf16.msrb.mxu0 %v6854_v49  ;;  %v7651_v4 = vld [vmem:[%s8840_s20 + $0xa4] sm:$0xf] }
 0x806   : > { %v4026_v0 = vmul.f32 0.044715, %v4002_v19  ;;  %v4130_v56 = vmul.f32 0.5, %v4106_v7  ;;  %v7633_v19 = vld [vmem:[%s8840_s20 + $0x14] sm:$0xf]  ;;  %v7226_v1 = vor.u32 %v7730_v14, %v7225_v57 }
 0x807   : > { %v4043_v21 = vadd.f32 %v4019_v47, %v10074_v10  ;;  %v10107_v27 = vadd.f32 %v3882_v60, %v3865_v24  ;;  %5077 = vmatpush.bf16.msra.mxu2 %v7234_v37  ;;  %5094 = vmatpush.bf16.msra.mxu3 %v7306_v42  ;;  %v6846_v48 = vor.u32 %v7633_v19, %v6843_v13  ;;  %v6915_v18 = vld [vmem:[%s8840_s20 + $0xa8] sm:$0xf0]  ;;  %v7217_v3 = vld [vmem:[%s8840_s20 + $0x300] sm:$0xf]  ;;  %v7019_v14 = vld [vmem:[%s8840_s20 + $0x178] sm:$0xf0] }
 0x808   : > { %v4050_v39 = vadd.f32 %v4026_v0, %v10079_v26  ;;  %v7298_v0 = vor.u32 %v7748_v38, %v7297_v22  ;;  %v4154_v7 = vmul.f32 %v4130_v56, %v10015_v28  ;;  %v6918_v29 = vor.u32 %v7651_v4, %v6915_v18  ;;  %v6835_v49 = vld [vmem:[%s8840_s20 + $0x8] sm:$0xf0]  ;;  %v7649_v28 = vld [vmem:[%s8840_s20 + $0x94] sm:$0xf]  ;;  %v7647_v18 = vld [vmem:[%s8840_s20 + $0x84] sm:$0xf] }
 0x809   : > { %v7983_v20 = vpop.eup %7982  ;;  %v4067_v31 = vmul.f32 0.7978846, %v4043_v21  ;;  %v3979_v55 = vmul.f32 %v10107_v27, %v10107_v27  ;;  %5130 = vmatpush.bf16.msrb.mxu1 %v6926_v54  ;;  %5114 = vmatpush.bf16.msrb.mxu0 %v6846_v48  ;;  %v7218_v25 = vor.u32 %v7728_v62, %v7217_v3  ;;  %v6899_v3 = vld [vmem:[%s8840_s20 + $0x88] sm:$0xf0] }
 0x80a   : > { %v7985_v44 = vpop.eup %7984  ;;  %v4074_v41 = vmul.f32 0.7978846, %v4050_v39  ;;  %5031 = vmatmul.bf16.gmra.mxu3 %v10112_v46  ;;  %v4107_v23 = vadd.f32 1.0, %v7983_v20  ;;  %v7631_v39 = vld [vmem:[%s8840_s20 + $0x4] sm:$0xf] }
 0x80b   : > { %v4114_v11 = vadd.f32 1.0, %v7985_v44  ;;  %7986 = vtanh.f32 %v4067_v31  ;;  %v4003_v58 = vmul.f32 %v3979_v55, %v10107_v27  ;;  %5078 = vmatpush.bf16.msra.mxu2 %v7226_v1  ;;  %5095 = vmatpush.bf16.msra.mxu3 %v7298_v0  ;;  %v6838_v52 = vor.u32 %v7631_v39, %v6835_v49  ;;  %v7289_v20 = vld [vmem:[%s8840_s20 + $0x390] sm:$0xf]  ;;  %v7746_v31 = vld [vmem:[%s8840_s20 + $0x394] sm:$0xf0] }
 0x80c   : > { %v3866_v63 = vpop.f32.mrf.mxu2  ;;  %v3884_v60 = vpop.f32.mrf.mxu3  ;;  %7988 = vtanh.f32 %v4074_v41  ;;  %v7290_v44 = vor.u32 %v7746_v31, %v7289_v20  ;;  %v6907_v41 = vld [vmem:[%s8840_s20 + $0x98] sm:$0xf0]  ;;  %v7011_v62 = vld [vmem:[%s8840_s20 + $0x168] sm:$0xf0] }
 0x80d   : > { %v4138_v47 = vmul.f32 0.5, %v4114_v11  ;;  %v4027_v24 = vmul.f32 0.044715, %v4003_v58  ;;  %v3895_v30 = vpop.f32.mrf.mxu0  ;;  %v3913_v32 = vpop.f32.mrf.mxu1  ;;  %5131 = vmatpush.bf16.msrb.mxu1 %v6918_v29  ;;  %v6910_v11 = vor.u32 %v7649_v28, %v6907_v41  ;;  %v7677_v58 = vld [vmem:[%s8840_s20 + $0x174] sm:$0xf]  ;;  %5115 = vmatpush.bf16.msrb.mxu0 %v6838_v52 }
 0x80e   : > { %v3896_v33 = vadd.f32 %v3895_v30, %v10122_v9  ;;  %v7022_v63 = vor.u32 %v7677_v58, %v7019_v14  ;;  %v7709_v60 = vld [vmem:[%s8840_s20 + $0x274] sm:$0xf]  ;;  %v7147_v1 = vld [vmem:[%s8840_s20 + $0x278] sm:$0xf0]  ;;  %v7281_v30 = vld [vmem:[%s8840_s20 + $0x380] sm:$0xf] }
 0x80f   : > { %v4162_v21 = vmul.f32 %v4138_v47, %v10047_v40  ;;  %v4051_v37 = vadd.f32 %v4027_v24, %v10107_v27  ;;  %v4131_v40 = vmul.f32 0.5, %v4107_v23  ;;  %5079 = vmatpush.bf16.msra.mxu2 %v7218_v25  ;;  %5096 = vmatpush.bf16.msra.mxu3 %v7290_v44  ;;  %v7150_v24 = vor.u32 %v7709_v60, %v7147_v1  ;;  %v7675_v29 = vld [vmem:[%s8840_s20 + $0x164] sm:$0xf]  ;;  %v7139_v20 = vld [vmem:[%s8840_s20 + $0x268] sm:$0xf0] }
 0x810   : > { %v10144_v50 = vadd.f32 %v3913_v32, %v3896_v33  ;;  %v7744_v32 = vld [vmem:[%s8840_s20 + $0x384] sm:$0xf0]  ;;  %v7014_v25 = vor.u32 %v7675_v29, %v7011_v62  ;;  %v7707_v52 = vld [vmem:[%s8840_s20 + $0x264] sm:$0xf]  ;;  %v7725_v44 = vld [vmem:[%s8840_s20 + $0x2f4] sm:$0xf] }
 0x811   : > { %v7987_v55 = vpop.eup %7986  ;;  %v10149_v42 = vpack.c.bf16 %v4162_v21, %v4154_v7  ;;  %v4075_v6 = vmul.f32 0.7978846, %v4051_v37  ;;  %v4155_v48 = vmul.f32 %v4131_v40, %v10040_v35  ;;  %5132 = vmatpush.bf16.msrb.mxu1 %v6910_v11  ;;  %v7282_v4 = vor.u32 %v7744_v32, %v7281_v30  ;;  %v7693_v40 = vld [vmem:[%s8840_s20 + $0x1f4] sm:$0xf]  ;;  %v7003_v1 = vld [vmem:[%s8840_s20 + $0x158] sm:$0xf0] }
 0x812   : > { %v7989_v54 = vpop.eup %7988  ;;  %v4115_v57 = vadd.f32 1.0, %v7987_v55  ;;  %v3964_v56 = vmul.f32 %v10144_v50, %v10144_v50  ;;  %v6902_v35 = vor.u32 %v7647_v18, %v6899_v3  ;;  %v7142_v55 = vor.u32 %v7707_v52, %v7139_v20 }
 0x813   : > { %5044 = vmatmul.bf16.vlgmr.msra.gmra.mxu0 %v10149_v42  ;;  %v4122_v19 = vadd.f32 1.0, %v7989_v54  ;;  %7990 = vtanh.f32 %v4075_v6  ;;  %5144 = vmatpush.bf16.msrb.mxu2 %v7022_v63  ;;  %v7083_v6 = vld [vmem:[%s8840_s20 + $0x1f8] sm:$0xf0]  ;;  %v7673_v63 = vld [vmem:[%s8840_s20 + $0x154] sm:$0xf] }
 0x814   : > { %v4139_v13 = vmul.f32 0.5, %v4115_v57  ;;  %v3988_v22 = vmul.f32 %v3964_v56, %v10144_v50  ;;  %v3931_v23 = vpop.f32.mrf.mxu2  ;;  %v3949_v47 = vpop.f32.mrf.mxu3  ;;  %5180 = vmatpush.bf16.msra.mxu0 %v7150_v24  ;;  %5097 = vmatpush.bf16.msra.mxu3 %v7282_v4  ;;  %v7086_v57 = vor.u32 %v7693_v40, %v7083_v6  ;;  %v7211_v56 = vld [vmem:[%s8840_s20 + $0x2f8] sm:$0xf0]  ;;  %v7123_v40 = vld [vmem:[%s8840_s20 + $0x248] sm:$0xf0] }
 0x815   : > { %v3932_v38 = vadd.f32 %v3931_v23, %v10129_v17  ;;  %v3897_v33 = vpop.f32.mrf.mxu0  ;;  %v3915_v0 = vpop.f32.mrf.mxu1  ;;  %v4146_v49 = vmul.f32 0.5, %v4122_v19  ;;  %5133 = vmatpush.bf16.msrb.mxu1 %v6902_v35  ;;  %v7214_v19 = vor.u32 %v7725_v44, %v7211_v56  ;;  %v7203_v35 = vld [vmem:[%s8840_s20 + $0x2e8] sm:$0xf0]  ;;  %v7689_v6 = vld [vmem:[%s8840_s20 + $0x1d4] sm:$0xf] }
 0x816   : > { %v4163_v7 = vmul.f32 %v4139_v13, %v10074_v10  ;;  %v4012_v21 = vmul.f32 0.044715, %v3988_v22  ;;  %v3898_v37 = vadd.f32 %v3897_v33, %v10122_v9  ;;  %v7705_v13 = vld [vmem:[%s8840_s20 + $0x254] sm:$0xf]  ;;  %v7131_v22 = vld [vmem:[%s8840_s20 + $0x258] sm:$0xf0] }
 0x817   : > { %v10170_v39 = vadd.f32 %v3949_v47, %v3932_v38  ;;  %5145 = vmatpush.bf16.msrb.mxu2 %v7014_v25  ;;  %v4170_v30 = vmul.f32 %v4146_v49, %v10079_v26  ;;  %v7691_v38 = vld [vmem:[%s8840_s20 + $0x1e4] sm:$0xf]  ;;  %v7075_v33 = vld [vmem:[%s8840_s20 + $0x1e8] sm:$0xf0]  ;;  %v7721_v56 = vld [vmem:[%s8840_s20 + $0x2d4] sm:$0xf] }
 0x818   : > { %v10174_v31 = vpack.c.bf16 %v4163_v7, %v4155_v48  ;;  %v4036_v10 = vadd.f32 %v4012_v21, %v10144_v50  ;;  %v10177_v28 = vadd.f32 %v3915_v0, %v3898_v37  ;;  %5181 = vmatpush.bf16.msra.mxu0 %v7142_v55  ;;  %5162 = vmatpush.bf16.msrb.mxu3 %v7086_v57  ;;  %v7723_v37 = vld [vmem:[%s8840_s20 + $0x2e4] sm:$0xf]  ;;  %v6995_v25 = vld [vmem:[%s8840_s20 + $0x148] sm:$0xf0]  ;;  %v7067_v57 = vld [vmem:[%s8840_s20 + $0x1d8] sm:$0xf0] }
 0x819   : > { %v7991_v41 = vpop.eup %7990  ;;  %v3965_v54 = vmul.f32 %v10170_v39, %v10170_v39  ;;  %v7006_v48 = vor.u32 %v7673_v63, %v7003_v1  ;;  %v7134_v7 = vor.u32 %v7705_v13, %v7131_v22  ;;  %v7078_v21 = vor.u32 %v7691_v38, %v7075_v33  ;;  %v7671_v49 = vld [vmem:[%s8840_s20 + $0x144] sm:$0xf]  ;;  %v7669_v13 = vld [vmem:[%s8840_s20 + $0x134] sm:$0xf]  ;;  %v6987_v22 = vld [vmem:[%s8840_s20 + $0x138] sm:$0xf0] }
 0x81a   : > { %v4060_v11 = vmul.f32 0.7978846, %v4036_v10  ;;  %v3972_v58 = vmul.f32 %v10177_v28, %v10177_v28  ;;  %5062 = vmatmul.bf16.vlgmr.msra.gmra.mxu1 %v10174_v31  ;;  %v4123_v14 = vadd.f32 1.0, %v7991_v41  ;;  %v7206_v62 = vor.u32 %v7723_v37, %v7203_v35  ;;  %v7703_v55 = vld [vmem:[%s8840_s20 + $0x244] sm:$0xf] }
 0x81b   : > { %v3989_v60 = vmul.f32 %v3965_v54, %v10170_v39  ;;  %5198 = vmatpush.bf16.msra.mxu1 %v7214_v19  ;;  %5146 = vmatpush.bf16.msrb.mxu2 %v7006_v48  ;;  %v6998_v10 = vor.u32 %v7671_v49, %v6995_v25  ;;  %v10212_v41 = vpack.c.bf16 %v4170_v30, %v4170_v30  ;;  %v7115_v30 = vld [vmem:[%s8840_s20 + $0x238] sm:$0xf0]  ;;  %v7187_v49 = vld [vmem:[%s8840_s20 + $0x2c8] sm:$0xf0] }
 0x81c   : > { %v3996_v23 = vmul.f32 %v3972_v58, %v10177_v28  ;;  %v3933_v47 = vpop.f32.mrf.mxu2  ;;  %v3951_v24 = vpop.f32.mrf.mxu3  ;;  %v4147_v32 = vmul.f32 0.5, %v4123_v14  ;;  %7992 = vtanh.f32 %v4060_v11  ;;  %5182 = vmatpush.bf16.msra.mxu0 %v7134_v7  ;;  %5163 = vmatpush.bf16.msrb.mxu3 %v7078_v21  ;;  %v7126_v54 = vor.u32 %v7703_v55, %v7123_v40  ;;  %v7195_v11 = vld [vmem:[%s8840_s20 + $0x2d8] sm:$0xf0]  ;;  %v7059_v7 = vld [vmem:[%s8840_s20 + $0x1c8] sm:$0xf0] }
 0x81d   : > { %v4013_v0 = vmul.f32 0.044715, %v3989_v60  ;;  %v3934_v4 = vadd.f32 %v3933_v47, %v10129_v17  ;;  %v3900_v18 = vpop.f32.mrf.mxu0  ;;  %v3918_v3 = vpop.f32.mrf.mxu1  ;;  %v7070_v19 = vor.u32 %v7689_v6, %v7067_v57  ;;  %v7198_v63 = vor.u32 %v7721_v56, %v7195_v11  ;;  %v7719_v21 = vld [vmem:[%s8840_s20 + $0x2c4] sm:$0xf]  ;;  %v7685_v11 = vld [vmem:[%s8840_s20 + $0x1b4] sm:$0xf] }
 0x81e   : > { %v4020_v26 = vmul.f32 0.044715, %v3996_v23  ;;  %v3901_v29 = vadd.f32 %v3900_v18, %v10122_v9  ;;  %v6990_v47 = vor.u32 %v7669_v13, %v6987_v22  ;;  %v7699_v6 = vld [vmem:[%s8840_s20 + $0x224] sm:$0xf] }
 0x81f   : > { %v4037_v52 = vadd.f32 %v4013_v0, %v10170_v39  ;;  %v10204_v20 = vadd.f32 %v3951_v24, %v3934_v4  ;;  %5199 = vmatpush.bf16.msra.mxu1 %v7206_v62  ;;  %5147 = vmatpush.bf16.msrb.mxu2 %v6998_v10  ;;  %v7701_v24 = vld [vmem:[%s8840_s20 + $0x234] sm:$0xf]  ;;  %v4171_v4 = vmul.f32 %v4147_v32, %v10107_v27  ;;  %v7667_v32 = vld [vmem:[%s8840_s20 + $0x124] sm:$0xf] }
 0x820   : > { %v4044_v9 = vadd.f32 %v4020_v26, %v10177_v28  ;;  %v10210_v44 = vadd.f32 %v3918_v3, %v3901_v29  ;;  %5164 = vmatpush.bf16.msrb.mxu3 %v7070_v19  ;;  %5183 = vmatpush.bf16.msra.mxu0 %v7126_v54  ;;  %v7118_v18 = vor.u32 %v7701_v24, %v7115_v30  ;;  %v7687_v3 = vld [vmem:[%s8840_s20 + $0x1c4] sm:$0xf] }
 0x821   : > { %v4061_v58 = vmul.f32 0.7978846, %v4037_v52  ;;  %v3973_v14 = vmul.f32 %v10204_v20, %v10204_v20  ;;  %v7062_v62 = vor.u32 %v7687_v3, %v7059_v7  ;;  %v7190_v27 = vor.u32 %v7719_v21, %v7187_v49  ;;  %v6979_v52 = vld [vmem:[%s8840_s20 + $0x128] sm:$0xf0]  ;;  %v7099_v7 = vld [vmem:[%s8840_s20 + $0x218] sm:$0xf0] }
 0x822   : > { %v4068_v60 = vmul.f32 0.7978846, %v4044_v9  ;;  %v3980_v1 = vmul.f32 %v10210_v44, %v10210_v44  ;;  %v7993_v48 = vpop.eup %7992  ;;  %v7107_v9 = vld [vmem:[%s8840_s20 + $0x228] sm:$0xf0]  ;;  %v10242_v57 = vpack.c.bf16 %v4171_v4, %v4171_v4  ;;  %v7683_v21 = vld [vmem:[%s8840_s20 + $0x1a4] sm:$0xf] }
 0x823   : > { %v3997_v23 = vmul.f32 %v3973_v14, %v10204_v20  ;;  %5049 = vmatmul.bf16.gmra.mxu0 %v10212_v41  ;;  %5200 = vmatpush.bf16.msra.mxu1 %v7198_v63  ;;  %v4108_v10 = vadd.f32 1.0, %v7993_v48  ;;  %v7110_v56 = vor.u32 %v7699_v6, %v7107_v9  ;;  %v7717_v14 = vld [vmem:[%s8840_s20 + $0x2b4] sm:$0xf]  ;;  %v6963_v6 = vld [vmem:[%s8840_s20 + $0x108] sm:$0xf0] }
 0x824   : > { %7994 = vtanh.f32 %v4068_v60  ;;  %v4004_v38 = vmul.f32 %v3980_v1, %v10210_v44  ;;  %v3936_v33 = vpop.f32.mrf.mxu2  ;;  %v3954_v0 = vpop.f32.mrf.mxu3  ;;  %5148 = vmatpush.bf16.msrb.mxu2 %v6990_v47  ;;  %5165 = vmatpush.bf16.msrb.mxu3 %v7062_v62  ;;  %v7179_v1 = vld [vmem:[%s8840_s20 + $0x2b8] sm:$0xf0]  ;;  %v7665_v47 = vld [vmem:[%s8840_s20 + $0x114] sm:$0xf] }
 0x825   : > { %7996 = vtanh.f32 %v4061_v58  ;;  %v4021_v37 = vmul.f32 0.044715, %v3997_v23  ;;  %v3937_v35 = vadd.f32 %v3936_v33, %v10129_v17  ;;  %v3902_v26 = vpop.f32.mrf.mxu0  ;;  %v3920_v29 = vpop.f32.mrf.mxu1  ;;  %v6982_v17 = vor.u32 %v7667_v32, %v6979_v52  ;;  %5184 = vmatpush.bf16.msra.mxu0 %v7118_v18  ;;  %v7051_v58 = vld [vmem:[%s8840_s20 + $0x1b8] sm:$0xf0] }
 0x826   : > { %v4028_v25 = vmul.f32 0.044715, %v4004_v38  ;;  %v7054_v60 = vor.u32 %v7685_v11, %v7051_v58  ;;  %v7182_v23 = vor.u32 %v7717_v14, %v7179_v1  ;;  %v4132_v30 = vmul.f32 0.5, %v4108_v10  ;;  %v6971_v33 = vld [vmem:[%s8840_s20 + $0x118] sm:$0xf0] }
 0x827   : > { %v4045_v55 = vadd.f32 %v4021_v37, %v10204_v20  ;;  %v10237_v40 = vadd.f32 %v3954_v0, %v3937_v35  ;;  %5201 = vmatpush.bf16.msra.mxu1 %v7190_v27  ;;  %v7697_v0 = vld [vmem:[%s8840_s20 + $0x214] sm:$0xf]  ;;  %v6974_v3 = vor.u32 %v7665_v47, %v6971_v33  ;;  %v7043_v29 = vld [vmem:[%s8840_s20 + $0x1a8] sm:$0xf0]  ;;  %v7679_v33 = vld [vmem:[%s8840_s20 + $0x184] sm:$0xf] }
 0x828   : > { %v4052_v54 = vadd.f32 %v4028_v25, %v10210_v44  ;;  %5149 = vmatpush.bf16.msrb.mxu2 %v6982_v17  ;;  %5166 = vmatpush.bf16.msrb.mxu3 %v7054_v60  ;;  %v7102_v26 = vor.u32 %v7697_v0, %v7099_v7  ;;  %v7046_v49 = vor.u32 %v7683_v21, %v7043_v29  ;;  %v7715_v25 = vld [vmem:[%s8840_s20 + $0x2a4] sm:$0xf]  ;;  %v7171_v27 = vld [vmem:[%s8840_s20 + $0x2a8] sm:$0xf0]  ;;  %v7681_v11 = vld [vmem:[%s8840_s20 + $0x194] sm:$0xf] }
 0x829   : > { %v4069_v19 = vmul.f32 0.7978846, %v4045_v55  ;;  %v3981_v63 = vmul.f32 %v10237_v40, %v10237_v40  ;;  %5185 = vmatpush.bf16.msra.mxu0 %v7110_v56  ;;  %v4156_v32 = vmul.f32 %v4132_v30, %v10144_v50  ;;  %v7174_v55 = vor.u32 %v7715_v25, %v7171_v27  ;;  %v7663_v17 = vld [vmem:[%s8840_s20 + $0x104] sm:$0xf]  ;;  %v7091_v56 = vld [vmem:[%s8840_s20 + $0x208] sm:$0xf0] }
 0x82a   : > { %v7995_v13 = vpop.eup %7994  ;;  %v4076_v22 = vmul.f32 0.7978846, %v4052_v54  ;;  %5067 = vmatmul.bf16.gmra.mxu1 %v10242_v57  ;;  %v6966_v9 = vor.u32 %v7663_v17, %v6963_v6  ;;  %v7695_v54 = vld [vmem:[%s8840_s20 + $0x204] sm:$0xf]  ;;  %v7741_v47 = vld [vmem:[%s8840_s20 + $0x374] sm:$0xf] }
 0x82b   : > { %v7997_v24 = vpop.eup %7996  ;;  %v4116_v48 = vadd.f32 1.0, %v7995_v13  ;;  %7998 = vtanh.f32 %v4069_v19  ;;  %v4005_v38 = vmul.f32 %v3981_v63, %v10237_v40  ;;  %5202 = vmatpush.bf16.msra.mxu1 %v7182_v23  ;;  %v7035_v19 = vld [vmem:[%s8840_s20 + $0x198] sm:$0xf0]  ;;  %v7713_v63 = vld [vmem:[%s8840_s20 + $0x294] sm:$0xf] }
 0x82c   : > { %v3938_v4 = vpop.f32.mrf.mxu2  ;;  %v3956_v18 = vpop.f32.mrf.mxu3  ;;  %8000 = vtanh.f32 %v4076_v22  ;;  %v4109_v62 = vadd.f32 1.0, %v7997_v24  ;;  %5150 = vmatpush.bf16.msrb.mxu2 %v6974_v3  ;;  %5167 = vmatpush.bf16.msrb.mxu3 %v7046_v49  ;;  %v7038_v22 = vor.u32 %v7681_v11, %v7035_v19  ;;  %v7163_v23 = vld [vmem:[%s8840_s20 + $0x298] sm:$0xf0]  ;;  %v7027_v0 = vld [vmem:[%s8840_s20 + $0x188] sm:$0xf0] }
 0x82d   : > { %v4140_v37 = vmul.f32 0.5, %v4116_v48  ;;  %v4029_v35 = vmul.f32 0.044715, %v4005_v38  ;;  %5186 = vmatpush.bf16.msra.mxu0 %v7102_v26  ;;  %v7166_v24 = vor.u32 %v7713_v63, %v7163_v23  ;;  %v7275_v30 = vld [vmem:[%s8840_s20 + $0x378] sm:$0xf0]  ;;  %v7030_v18 = vor.u32 %v7679_v33, %v7027_v0 }
 0x82e   : > { %v4133_v1 = vmul.f32 0.5, %v4109_v62  ;;  %v7278_v38 = vor.u32 %v7741_v47, %v7275_v30  ;;  %v7711_v3 = vld [vmem:[%s8840_s20 + $0x284] sm:$0xf]  ;;  %v7155_v7 = vld [vmem:[%s8840_s20 + $0x288] sm:$0xf0] }
 0x82f   : > { %v4164_v52 = vmul.f32 %v4140_v37, %v10177_v28  ;;  %v4053_v10 = vadd.f32 %v4029_v35, %v10237_v40  ;;  %5203 = vmatpush.bf16.msra.mxu1 %v7174_v55  ;;  %v7094_v28 = vor.u32 %v7695_v54, %v7091_v56  ;;  %v7158_v37 = vor.u32 %v7711_v3, %v7155_v7  ;;  %v7739_v35 = vld [vmem:[%s8840_s20 + $0x364] sm:$0xf]  ;;  %v7267_v26 = vld [vmem:[%s8840_s20 + $0x368] sm:$0xf0]  ;;  %v7757_v49 = vld [vmem:[%s8840_s20 + $0x3f4] sm:$0xf] }
 0x830   : > { %5151 = vmatpush.bf16.msrb.mxu2 %v6966_v9  ;;  %5168 = vmatpush.bf16.msrb.mxu3 %v7038_v22  ;;  %v7270_v29 = vor.u32 %v7739_v35, %v7267_v26  ;;  %v7339_v25 = vld [vmem:[%s8840_s20 + $0x3f8] sm:$0xf0]  ;;  %v7755_v17 = vld [vmem:[%s8840_s20 + $0x3e4] sm:$0xf]  ;;  %v7331_v6 = vld [vmem:[%s8840_s20 + $0x3e8] sm:$0xf0] }
 0x831   : > { %v7999_v58 = vpop.eup %7998  ;;  %v10268_v14 = vpack.c.bf16 %v4164_v52, %v4156_v32  ;;  %v4077_v50 = vmul.f32 0.7978846, %v4053_v10  ;;  %5187 = vmatpush.bf16.msra.mxu0 %v7094_v28  ;;  %v7259_v52 = vld [vmem:[%s8840_s20 + $0x358] sm:$0xf0]  ;;  %v7334_v54 = vor.u32 %v7755_v17, %v7331_v6  ;;  %v7735_v56 = vld [vmem:[%s8840_s20 + $0x344] sm:$0xf] }
 0x832   : > { %v8001_v60 = vpop.eup %8000  ;;  %v4117_v13 = vadd.f32 1.0, %v7999_v58  ;;  %v7251_v11 = vld [vmem:[%s8840_s20 + $0x348] sm:$0xf0]  ;;  %v7323_v28 = vld [vmem:[%s8840_s20 + $0x3d8] sm:$0xf0] }
 0x833   : > { %5080 = vmatmul.bf16.vlgmr.msra.gmra.mxu2 %v10268_v14  ;;  %5116 = vmatmul.bf16.vlgmr.msrb.gmra.mxu0 %v9921_v16  ;;  %8002 = vtanh.f32 %v4077_v50  ;;  %v4124_v4 = vadd.f32 1.0, %v8001_v60  ;;  %v4157_v16 = vmul.f32 %v4133_v1, %v10170_v39  ;;  %v7342_v39 = vor.u32 %v7757_v49, %v7339_v25  ;;  %v7753_v50 = vld [vmem:[%s8840_s20 + $0x3d4] sm:$0xf]  ;;  %v7243_v1 = vld [vmem:[%s8840_s20 + $0x338] sm:$0xf0] }
 0x834   : > { %v4141_v48 = vmul.f32 0.5, %v4117_v13  ;;  %5204 = vmatpush.bf16.msra.mxu1 %v7166_v24  ;;  %5216 = vmatpush.bf16.msra.mxu2 %v7278_v38  ;;  %v7254_v58 = vor.u32 %v7735_v56, %v7251_v11  ;;  %v7326_v63 = vor.u32 %v7753_v50, %v7323_v28  ;;  %v7733_v60 = vld [vmem:[%s8840_s20 + $0x334] sm:$0xf]  ;;  %v7751_v22 = vld [vmem:[%s8840_s20 + $0x3c4] sm:$0xf] }
 0x835   : > { %5169 = vmatpush.bf16.msrb.mxu3 %v7030_v18  ;;  %v4148_v32 = vmul.f32 0.5, %v4124_v4  ;;  %v7246_v13 = vor.u32 %v7733_v60, %v7243_v1  ;;  %v7315_v23 = vld [vmem:[%s8840_s20 + $0x3c8] sm:$0xf0]  ;;  %v7731_v24 = vld [vmem:[%s8840_s20 + $0x324] sm:$0xf] }
 0x836   : > { %v4165_v21 = vmul.f32 %v4141_v48, %v10204_v20  ;;  %v7737_v20 = vld [vmem:[%s8840_s20 + $0x354] sm:$0xf]  ;;  %v7318_v47 = vor.u32 %v7751_v22, %v7315_v23  ;;  %v7235_v30 = vld [vmem:[%s8840_s20 + $0x328] sm:$0xf0]  ;;  %v7307_v38 = vld [vmem:[%s8840_s20 + $0x3b8] sm:$0xf0] }
 0x837   : > { %v7262_v10 = vor.u32 %v7737_v20, %v7259_v52  ;;  %v4172_v9 = vmul.f32 %v4148_v32, %v10210_v44  ;;  %v7729_v0 = vld [vmem:[%s8840_s20 + $0x314] sm:$0xf]  ;;  %v7227_v4 = vld [vmem:[%s8840_s20 + $0x318] sm:$0xf0]  ;;  %v7747_v3 = vld [vmem:[%s8840_s20 + $0x3a4] sm:$0xf] }
 0x838   : > { %v10285_v62 = vpack.c.bf16 %v4165_v21, %v4157_v16  ;;  %5205 = vmatpush.bf16.msra.mxu1 %v7158_v37  ;;  %5217 = vmatpush.bf16.msra.mxu2 %v7270_v29  ;;  %v7230_v18 = vor.u32 %v7729_v0, %v7227_v4  ;;  %v7299_v7 = vld [vmem:[%s8840_s20 + $0x3a8] sm:$0xf0]  ;;  %v7727_v21 = vld [vmem:[%s8840_s20 + $0x304] sm:$0xf]  ;;  %v10325_v35 = vld [vmem:[%s1068_s26] sm:$0x3] }
 0x839   : > { %v8003_v27 = vpop.eup %8002  ;;  %v10300_v19 = vpack.c.bf16 %v4172_v9, %v4172_v9  ;;  %v7302_v16 = vor.u32 %v7747_v3, %v7299_v7  ;;  %v7219_v37 = vld [vmem:[%s8840_s20 + $0x308] sm:$0xf0]  ;;  %v7745_v26 = vld [vmem:[%s8840_s20 + $0x394] sm:$0xf]  ;;  %v7743_v32 = vld [vmem:[%s8840_s20 + $0x384] sm:$0xf] }
 0x83a   : > { %5098 = vmatmul.bf16.vlgmr.msra.gmra.mxu3 %v10285_v62  ;;  %5134 = vmatmul.bf16.vlgmr.msrb.gmra.mxu1 %v9942_v36  ;;  %v4125_v55 = vadd.f32 1.0, %v8003_v27  ;;  %v7222_v49 = vor.u32 %v7727_v21, %v7219_v37  ;;  %v4320_v27 = vperm.slane %v10325_v35, 0 }
 0x83b   : > { %5234 = vmatpush.bf16.msra.mxu3 %v7342_v39  ;;  %v7283_v39 = vld [vmem:[%s8840_s20 + $0x388] sm:$0xf0] }
 0x83c   : > { %5218 = vmatpush.bf16.msra.mxu2 %v7262_v10  ;;  %v4149_v36 = vmul.f32 0.5, %v4125_v55  ;;  %v7286_v20 = vor.u32 %v7743_v32, %v7283_v39 }
 0x83e   : > { %v4173_v44 = vmul.f32 %v4149_v36, %v10237_v40  ;;  %v7749_v40 = vld [vmem:[%s8840_s20 + $0x3b4] sm:$0xf] }
 0x83f   : > { %5235 = vmatpush.bf16.msra.mxu3 %v7334_v54  ;;  %v7310_v33 = vor.u32 %v7749_v40, %v7307_v38 }
 0x840   : > { %5219 = vmatpush.bf16.msra.mxu2 %v7254_v58  ;;  %v4189_v48 = vpack.c.bf16 %v4173_v44, %v4173_v44 }
 0x843   : > { %5085 = vmatmul.bf16.gmra.mxu2 %v10300_v19  ;;  %5121 = vmatmul.bf16.gmra.mxu0 %v9975_v34  ;;  %v7238_v34 = vor.u32 %v7731_v24, %v7235_v30 }
 0x844   : > { %5236 = vmatpush.bf16.msra.mxu3 %v7326_v63  ;;  %5220 = vmatpush.bf16.msra.mxu2 %v7246_v13 }
 0x848   : > { %5237 = vmatpush.bf16.msra.mxu3 %v7318_v47  ;;  %5221 = vmatpush.bf16.msra.mxu2 %v7238_v34 }
 0x84a   : > { %5103 = vmatmul.bf16.gmra.mxu3 %v4189_v48  ;;  %5139 = vmatmul.bf16.gmra.mxu1 %v9994_v15  ;;  %v7291_v15 = vld [vmem:[%s8840_s20 + $0x398] sm:$0xf0]  ;;  %s10507_s20 = sld [smem:[#allocation31_spill]] }
 0x84b   : > { %v7294_v25 = vor.u32 %v7745_v26, %v7291_v15 }
 0x84c   : > { %5238 = vmatpush.bf16.msra.mxu3 %v7310_v33  ;;  %5222 = vmatpush.bf16.msra.mxu2 %v7230_v18 }
 0x850   : > { %v4973_v29 = vpop.f32.mrf.mxu0  ;;  %5239 = vmatpush.bf16.msra.mxu3 %v7302_v16  ;;  %5223 = vmatpush.bf16.msra.mxu2 %v7222_v49  ;;  %p7343_p1 = scmp.ne.s32.totalorder %s10507_s20, 1 }
 0x851   : > { %v4974_v52 = vadd.f32 %v4973_v29, %v4320_v27  ;;  %s10508_s18 = sld [smem:[#allocation55_spill]] (!%p7343_p1) }
 0x853   : > { %5152 = vmatmul.bf16.vlgmr.msrb.gmra.mxu2 %v10019_v59  ;;  %5188 = vmatmul.bf16.vlgmr.msra.gmra.mxu0 %v10149_v42 }
 0x854   : > { %5240 = vmatpush.bf16.msra.mxu3 %v7294_v25 }
 0x857   : > { %v4991_v10 = vpop.f32.mrf.mxu1 }
 0x858   : > { %v4992_v55 = vadd.f32 %v4991_v10, %v4974_v52  ;;  %v4975_v17 = vpop.f32.mrf.mxu0  ;;  %5241 = vmatpush.bf16.msra.mxu3 %v7286_v20 }
 0x859   : > { %v4976_v6 = vadd.f32 %v4975_v17, %v4320_v27 }
 0x85a   : > { %5170 = vmatmul.bf16.vlgmr.msrb.gmra.mxu3 %v10044_v51  ;;  %5206 = vmatmul.bf16.vlgmr.msra.gmra.mxu1 %v10174_v31 }
 0x85f   : > { %v4993_v9 = vpop.f32.mrf.mxu1 }
 0x860   : > { %v4994_v54 = vadd.f32 %v4993_v9, %v4976_v6  ;;  %v4978_v59 = vpop.f32.mrf.mxu0 }
 0x861   : > { %v4979_v42 = vadd.f32 %v4978_v59, %v4320_v27 }
 0x863   : > { %5157 = vmatmul.bf16.gmra.mxu2 %v10086_v61  ;;  %5193 = vmatmul.bf16.gmra.mxu0 %v10212_v41 }
 0x867   : > { %v4996_v56 = vpop.f32.mrf.mxu1 }
 0x868   : > { %v4997_v11 = vadd.f32 %v4996_v56, %v4979_v42  ;;  %v4980_v36 = vpop.f32.mrf.mxu0 }
 0x86a   : > { %5175 = vmatmul.bf16.gmra.mxu3 %v10112_v46  ;;  %5211 = vmatmul.bf16.gmra.mxu1 %v10242_v57 }
 0x86f   : > { %v4998_v58 = vpop.f32.mrf.mxu1 }
 0x873   : > { %5224 = vmatmul.bf16.vlgmr.msra.gmra.mxu2 %v10268_v14 }
 0x876   : > { %v5009_v51 = vpop.f32.mrf.mxu2 }
 0x87a   : > { %5242 = vmatmul.bf16.vlgmr.msra.gmra.mxu3 %v10285_v62  ;;  %v5010_v62 = vadd.f32 %v5009_v51, %v4992_v55 }
 0x87d   : > { %v5027_v31 = vpop.f32.mrf.mxu3 }
 0x87e   : > { %v5011_v50 = vpop.f32.mrf.mxu2  ;;  %v5028_v24 = vadd.f32 %v5027_v31, %v5010_v62 }
 0x883   : > { %5229 = vmatmul.bf16.gmra.mxu2 %v10300_v19 }
 0x885   : > { %v5029_v61 = vpop.f32.mrf.mxu3 }
 0x886   : > { %v5014_v41 = vpop.f32.mrf.mxu2 }
 0x887   : > { %v5015_v15 = vadd.f32 %v5014_v41, %v4997_v11 }
 0x88a   : > { %5247 = vmatmul.bf16.gmra.mxu3 %v4189_v48  ;;  %v5012_v48 = vadd.f32 %v5011_v50, %v4994_v54 }
 0x88c   : > { %v5030_v4 = vadd.f32 %v5029_v61, %v5012_v48 }
 0x88d   : > { %v5032_v28 = vpop.f32.mrf.mxu3 }
 0x88e   : > { %v5016_v63 = vpop.f32.mrf.mxu2  ;;  %v5033_v25 = vadd.f32 %v5032_v28, %v5015_v15 }
 0x88f   : > { %v4321_v63 = vperm.slane %v10325_v35, 1 }
 0x890   : > { %v5045_v60 = vpop.f32.mrf.mxu0 }
 0x891   : > { %v5046_v19 = vadd.f32 %v5045_v60, %v5028_v24 }
 0x895   : > { %v5034_v1 = vpop.f32.mrf.mxu3 }
 0x897   : > { %v5063_v46 = vpop.f32.mrf.mxu1 }
 0x898   : > { %v5047_v44 = vpop.f32.mrf.mxu0  ;;  %v5064_v38 = vadd.f32 %v5063_v46, %v5046_v19 }
 0x899   : > { %v5048_v16 = vadd.f32 %v5047_v44, %v5030_v4 }
 0x89f   : > { %v5065_v57 = vpop.f32.mrf.mxu1 }
 0x8a0   : > { %v5050_v13 = vpop.f32.mrf.mxu0  ;;  %v5066_v26 = vadd.f32 %v5065_v57, %v5048_v16 }
 0x8a1   : > { %v5051_v20 = vadd.f32 %v5050_v13, %v5033_v25 }
 0x8a7   : > { %v5068_v22 = vpop.f32.mrf.mxu1 }
 0x8a8   : > { %v5052_v14 = vpop.f32.mrf.mxu0  ;;  %v5069_v55 = vadd.f32 %v5068_v22, %v5051_v20 }
 0x8af   : > { %v5070_v23 = vpop.f32.mrf.mxu1 }
 0x8b0   : > { %v5117_v47 = vpop.f32.mrf.mxu0 }
 0x8b1   : > { %v5118_v1 = vadd.f32 %v5117_v47, %v4321_v63 }
 0x8b6   : > { %v5081_v30 = vpop.f32.mrf.mxu2 }
 0x8b7   : > { %v5135_v34 = vpop.f32.mrf.mxu1  ;;  %v5082_v33 = vadd.f32 %v5081_v30, %v5064_v38 }
 0x8b8   : > { %v5119_v40 = vpop.f32.mrf.mxu0  ;;  %v5136_v46 = vadd.f32 %v5135_v34, %v5118_v1 }
 0x8b9   : > { %v5120_v14 = vadd.f32 %v5119_v40, %v4321_v63 }
 0x8bd   : > { %v5099_v0 = vpop.f32.mrf.mxu3 }
 0x8be   : > { %v5100_v18 = vadd.f32 %v5099_v0, %v5082_v33  ;;  %v5083_v3 = vpop.f32.mrf.mxu2 }
 0x8bf   : > { %v5137_v7 = vpop.f32.mrf.mxu1  ;;  %v5084_v29 = vadd.f32 %v5083_v3, %v5066_v26 }
 0x8c0   : > { %v10344_v21 = vadd.f32 %v5100_v18, %v9374_v53  ;;  %v5122_v37 = vpop.f32.mrf.mxu0  ;;  %v5138_v62 = vadd.f32 %v5137_v7, %v5120_v14 }
 0x8c1   : > { %v5123_v33 = vadd.f32 %v5122_v37, %v4321_v63 }
 0x8c2   : > { %5258 = vst [vmem:[#allocation2 + $0x28] sm:$0xff] %v10344_v21 }
 0x8c5   : > { %v5101_v49 = vpop.f32.mrf.mxu3 }
 0x8c6   : > { %v5102_v27 = vadd.f32 %v5101_v49, %v5084_v29  ;;  %v5086_v32 = vpop.f32.mrf.mxu2 }
 0x8c7   : > { %v5140_v39 = vpop.f32.mrf.mxu1  ;;  %v5087_v53 = vadd.f32 %v5086_v32, %v5069_v55 }
 0x8c8   : > { %v10348_v52 = vadd.f32 %v5102_v27, %v9380_v2  ;;  %v5124_v10 = vpop.f32.mrf.mxu0  ;;  %v5141_v35 = vadd.f32 %v5140_v39, %v5123_v33 }
 0x8ca   : > { %5260 = vst [vmem:[#allocation2 + $0x8] sm:$0xff] %v10348_v52 }
 0x8cd   : > { %v5104_v17 = vpop.f32.mrf.mxu3 }
 0x8ce   : > { %v5105_v6 = vadd.f32 %v5104_v17, %v5087_v53  ;;  %v5088_v9 = vpop.f32.mrf.mxu2 }
 0x8cf   : > { %v5142_v54 = vpop.f32.mrf.mxu1 }
 0x8d0   : > { %v10352_v59 = vadd.f32 %v5105_v6, %v9386_v45  ;;  %v5189_v42 = vpop.f32.mrf.mxu0 }
 0x8d2   : > { %5262 = vst [vmem:[#allocation2 + $0x18] sm:$0xff] %v10352_v59 }
 0x8d5   : > { %v5106_v56 = vpop.f32.mrf.mxu3 }
 0x8d6   : > { %v5153_v11 = vpop.f32.mrf.mxu2 }
 0x8d7   : > { %v5207_v36 = vpop.f32.mrf.mxu1  ;;  %v5154_v13 = vadd.f32 %v5153_v11, %v5136_v46 }
 0x8d8   : > { %v5191_v2 = vpop.f32.mrf.mxu0 }
 0x8dd   : > { %v5171_v58 = vpop.f32.mrf.mxu3 }
 0x8de   : > { %v5155_v51 = vpop.f32.mrf.mxu2  ;;  %v5172_v22 = vadd.f32 %v5171_v58, %v5154_v13 }
 0x8df   : > { %v5209_v31 = vpop.f32.mrf.mxu1  ;;  %v5156_v19 = vadd.f32 %v5155_v51, %v5138_v62 }
 0x8e0   : > { %v5194_v50 = vpop.f32.mrf.mxu0  ;;  %v5190_v24 = vadd.f32 %v5189_v42, %v5172_v22 }
 0x8e2   : > { %v5208_v48 = vadd.f32 %v5207_v36, %v5190_v24 }
 0x8e5   : > { %v5173_v61 = vpop.f32.mrf.mxu3 }
 0x8e6   : > { %v5158_v41 = vpop.f32.mrf.mxu2  ;;  %v5174_v38 = vadd.f32 %v5173_v61, %v5156_v19 }
 0x8e7   : > { %v5212_v28 = vpop.f32.mrf.mxu1  ;;  %v5159_v34 = vadd.f32 %v5158_v41, %v5141_v35 }
 0x8e8   : > { %v5196_v60 = vpop.f32.mrf.mxu0  ;;  %v5192_v18 = vadd.f32 %v5191_v2, %v5174_v38 }
 0x8ea   : > { %v5210_v40 = vadd.f32 %v5209_v31, %v5192_v18 }
 0x8ed   : > { %v5176_v45 = vpop.f32.mrf.mxu3 }
 0x8ee   : > { %v5160_v44 = vpop.f32.mrf.mxu2  ;;  %v5177_v26 = vadd.f32 %v5176_v45, %v5159_v34 }
 0x8ef   : > { %v5214_v57 = vpop.f32.mrf.mxu1 }
 0x8f0   : > { %v5195_v29 = vadd.f32 %v5194_v50, %v5177_v26 }
 0x8f2   : > { %v5213_v37 = vadd.f32 %v5212_v28, %v5195_v29 }
 0x8f5   : > { %v5178_v23 = vpop.f32.mrf.mxu3 }
 0x8f6   : > { %v5225_v30 = vpop.f32.mrf.mxu2 }
 0x8f7   : > { %v5226_v0 = vadd.f32 %v5225_v30, %v5208_v48 }
 0x8fd   : > { %v5243_v4 = vpop.f32.mrf.mxu3 }
 0x8fe   : > { %v5244_v47 = vadd.f32 %v5243_v4, %v5226_v0  ;;  %v5227_v3 = vpop.f32.mrf.mxu2 }
 0x8ff   : > { %v5228_v15 = vadd.f32 %v5227_v3, %v5210_v40 }
 0x900   : > { %v5253_v16 = vadd.f32 %v5244_v47, %v9376_v12 }
 0x902   : > { %5259 = vst [vmem:[#allocation2 + $0x10] sm:$0xff] %v5253_v16 }
 0x905   : > { %v5245_v7 = vpop.f32.mrf.mxu3 }
 0x906   : > { %v5246_v49 = vadd.f32 %v5245_v7, %v5228_v15  ;;  %v5230_v25 = vpop.f32.mrf.mxu2 }
 0x907   : > { %v5231_v32 = vadd.f32 %v5230_v25, %v5213_v37 }
 0x908   : > { %v5255_v27 = vadd.f32 %v5246_v49, %v9382_v8 }
 0x90a   : > { %5261 = vst [vmem:[#allocation2] sm:$0xff] %v5255_v27 }
 0x90d   : > { %v5248_v39 = vpop.f32.mrf.mxu3 }
 0x90e   : > { %v5249_v20 = vadd.f32 %v5248_v39, %v5231_v32  ;;  %v5232_v10 = vpop.f32.mrf.mxu2 }
 0x910   : > { %v5257_v55 = vadd.f32 %v5249_v20, %v9388_v5 }
 0x911   : > { %5267 = sbr.rel (%p7343_p1) target bundleno = 2614 (0xa36), region = 164 }
 0x912   : > { %5263 = vst [vmem:[#allocation2 + $0x20] sm:$0xff] %v5257_v55 }
 0x915   : > { %v5250_v12 = vpop.f32.mrf.mxu3 }
 0x916   : > { %v5270_v53 = vadd.f32 %v5253_v16, %v10344_v21  ;;  %v5276_v17 = vadd.f32 %v5257_v55, %v10352_v59  ;;  %v5273_v8 = vadd.f32 %v5255_v27, %v10348_v52  ;;  %v5268_v19 = vld [vmem:[%s10508_s18] sm:$0x3]  ;;  %v5269_v0 = vld [vmem:[#allocation20] sm:$0x3] }
 0x917   : > { %v5346_v18 = vperm.slane %v5268_v19, 0  ;;  %v5347_v47 = vperm.slane %v5268_v19, 1  ;;  %v5357_v26 = vperm.slane %v5269_v0, 0  ;;  %v5358_v40 = vperm.slane %v5269_v0, 1 }
 0x918   : > { %5271 = vadd.xlane.f32.xlu0 %v5270_v53  ;;  %5277 = vadd.xlane.f32.xlu1 %v5276_v17 }
 0x920   : > { %5274 = vadd.xlane.f32.xlu0 %v5273_v8 }
 0x98b   : > { %v5272_v6 = vpop.xlane.xlu0 %5271  ;;  %v5278_v11 = vpop.xlane.xlu1 %5277 }
 0x98c   : > { %v5279_v9 = vmul.f32 %v5272_v6, %v8899_v43  ;;  %v5281_v51 = vmul.f32 %v5278_v11, %v8899_v43 }
 0x98e   : > { %v5282_v54 = vsub.f32 %v10344_v21, %v5279_v9  ;;  %v5283_v5 = vsub.f32 %v5253_v16, %v5279_v9  ;;  %v10369_v61 = vsub.f32 %v10352_v59, %v5281_v51  ;;  %v10371_v41 = vsub.f32 %v5257_v55, %v5281_v51 }
 0x990   : > { %v5288_v42 = vmul.f32 %v5282_v54, %v5282_v54  ;;  %v5289_v56 = vmul.f32 %v5283_v5, %v5283_v5  ;;  %v5292_v60 = vmul.f32 %v10369_v61, %v10369_v61  ;;  %v5293_v1 = vmul.f32 %v10371_v41, %v10371_v41 }
 0x992   : > { %v5294_v36 = vadd.f32 %v5289_v56, %v5288_v42  ;;  %v5300_v45 = vadd.f32 %v5293_v1, %v5292_v60 }
 0x993   : > { %v5275_v2 = vpop.xlane.xlu0 %5274 }
 0x994   : > { %v5280_v58 = vmul.f32 %v5275_v2, %v8899_v43  ;;  %5295 = vadd.xlane.f32.xlu1 %v5294_v36 }
 0x996   : > { %v5284_v31 = vsub.f32 %v10348_v52, %v5280_v58  ;;  %v5285_v50 = vsub.f32 %v5255_v27, %v5280_v58 }
 0x998   : > { %v5290_v21 = vmul.f32 %v5284_v31, %v5284_v31  ;;  %v5291_v28 = vmul.f32 %v5285_v50, %v5285_v50 }
 0x99a   : > { %v5297_v63 = vadd.f32 %v5291_v28, %v5290_v21 }
 0x99c   : > { %5298 = vadd.xlane.f32.xlu2 %v5297_v63 }
 0x9a4   : > { %5301 = vadd.xlane.f32.xlu2 %v5300_v45 }
 0xa07   : > { %v5296_v46 = vpop.xlane.xlu1 %5295 }
 0xa08   : > { %v5303_v52 = vmul.f32 %v5296_v46, %v8899_v43 }
 0xa0a   : > { %v5306_v44 = vadd.f32 1e-06, %v5303_v52 }
 0xa0c   : > { %8010 = vrsqrt.f32 %v5306_v44  ;;  %vm5315_vm7 = vweird.f32 %v5306_v44 }
 0xa0f   : > { %v5299_v59 = vpop.xlane.xlu2 %5298 }
 0xa10   : > { %v5304_v57 = vmul.f32 %v5299_v59, %v8899_v43 }
 0xa12   : > { %v8011_v13 = vpop.eup %8010  ;;  %v5307_v22 = vadd.f32 1e-06, %v5304_v57 }
 0xa13   : > { %v5310_v14 = vmul.f32 %v8011_v13, %v5306_v44  ;;  %vm5316_vm6 = vweird.f32 %v8011_v13 }
 0xa14   : > { %8012 = vrsqrt.f32 %v5307_v22  ;;  %vm5317_vm8 = vmor %vm5315_vm7, %vm5316_vm6  ;;  %vm5325_vm10 = vweird.f32 %v5307_v22 }
 0xa15   : > { %v5311_v23 = vmul.f32 %v8011_v13, %v5310_v14 }
 0xa17   : > { %v5312_v62 = vmul.f32 0.5, %v5311_v23  ;;  %v5302_v24 = vpop.xlane.xlu2 %5301 }
 0xa18   : > { %v5305_v30 = vmul.f32 %v5302_v24, %v8899_v43 }
 0xa19   : > { %v5313_v38 = vsub.f32 1.5, %v5312_v62 }
 0xa1a   : > { %v8013_v48 = vpop.eup %8012  ;;  %v5308_v33 = vadd.f32 1e-06, %v5305_v30 }
 0xa1b   : > { %v5314_v4 = vmul.f32 %v8011_v13, %v5313_v38  ;;  %v5320_v35 = vmul.f32 %v8013_v48, %v5307_v22  ;;  %vm5326_vm9 = vweird.f32 %v8013_v48 }
 0xa1c   : > { %8014 = vrsqrt.f32 %v5308_v33  ;;  %vm5327_vm11 = vmor %vm5325_vm10, %vm5326_vm9  ;;  %vm5335_vm13 = vweird.f32 %v5308_v33 }
 0xa1d   : > { %v5318_v3 = vsel %vm5317_vm8, %v8011_v13, %v5314_v4  ;;  %v5321_v34 = vmul.f32 %v8013_v48, %v5320_v35 }
 0xa1e   : > { %v5339_v16 = vmul.f32 %v5318_v3, %v5282_v54  ;;  %v5340_v43 = vmul.f32 %v5318_v3, %v5283_v5 }
 0xa1f   : > { %v5322_v15 = vmul.f32 0.5, %v5321_v34 }
 0xa20   : > { %v5350_v7 = vmul.f32 %v5346_v18, %v5339_v16  ;;  %v5351_v29 = vmul.f32 %v5347_v47, %v5340_v43 }
 0xa21   : > { %v5323_v49 = vsub.f32 1.5, %v5322_v15 }
 0xa22   : > { %v8015_v25 = vpop.eup %8014  ;;  %v5361_v27 = vadd.f32 %v5357_v26, %v5350_v7  ;;  %v5362_v37 = vadd.f32 %v5358_v40, %v5351_v29 }
 0xa23   : > { %v5324_v32 = vmul.f32 %v8013_v48, %v5323_v49  ;;  %v5330_v39 = vmul.f32 %v8015_v25, %v5308_v33  ;;  %vm5336_vm12 = vweird.f32 %v8015_v25 }
 0xa24   : > { %5367 = vst [vmem:[#allocation21] sm:$0xff] %v5361_v27  ;;  %vm5337_vm14 = vmor %vm5335_vm13, %vm5336_vm12 }
 0xa25   : > { %5368 = vst [vmem:[#allocation21 + $0x8] sm:$0xff] %v5362_v37  ;;  %v5328_v20 = vsel %vm5327_vm11, %v8013_v48, %v5324_v32  ;;  %v5331_v10 = vmul.f32 %v8015_v25, %v5330_v39 }
 0xa26   : > { %v5341_v55 = vmul.f32 %v5328_v20, %v5284_v31  ;;  %v5342_v12 = vmul.f32 %v5328_v20, %v5285_v50 }
 0xa27   : > { %v5332_v53 = vmul.f32 0.5, %v5331_v10 }
 0xa28   : > { %v5352_v17 = vmul.f32 %v5346_v18, %v5341_v55  ;;  %v5353_v8 = vmul.f32 %v5347_v47, %v5342_v12 }
 0xa29   : > { %v5333_v6 = vsub.f32 1.5, %v5332_v53 }
 0xa2a   : > { %v5363_v9 = vadd.f32 %v5357_v26, %v5352_v17  ;;  %v5364_v54 = vadd.f32 %v5358_v40, %v5353_v8 }
 0xa2b   : > { %v5334_v5 = vmul.f32 %v8015_v25, %v5333_v6 }
 0xa2c   : > { %5369 = vst [vmem:[#allocation21 + $0x10] sm:$0xff] %v5363_v9 }
 0xa2d   : > { %5370 = vst [vmem:[#allocation21 + $0x18] sm:$0xff] %v5364_v54  ;;  %v5338_v42 = vsel %vm5337_vm14, %v8015_v25, %v5334_v5 }
 0xa2e   : > { %v5343_v56 = vmul.f32 %v5338_v42, %v10369_v61  ;;  %v5344_v11 = vmul.f32 %v5338_v42, %v10371_v41 }
 0xa30   : > { %v5354_v36 = vmul.f32 %v5346_v18, %v5343_v56  ;;  %v5355_v2 = vmul.f32 %v5347_v47, %v5344_v11 }
 0xa32   : > { %v5365_v58 = vadd.f32 %v5357_v26, %v5354_v36  ;;  %v5366_v51 = vadd.f32 %v5358_v40, %v5355_v2 }
 0xa34   : > { %5371 = vst [vmem:[#allocation21 + $0x20] sm:$0xff] %v5365_v58 }
 0xa35   : > { %5372 = vst [vmem:[#allocation21 + $0x28] sm:$0xff] %v5366_v51 }
 0xa36 PF: > { %s10509_s14 = sld [smem:[#allocation31_spill]]  ;;  %s8481_s9 = smov [#allocation21]  }
 0xa37   : > { %s5378_s24 = sshll.u32 %s8481_s9, 4  ;;  %s10510_s28 = sld [smem:[#allocation56_spill]]  ;;  %s5379_s24 = int_to_ptr.vmem [resolvable:$true] %s5378_s24 }
 0xa38   : > { %s8482_s6 = smov 256   ;;  %s8483_s0 = smov 16  }
 0xa3c   : > { %p7860_p3 = scmp.eq.s32.totalorder %s10509_s14, 1 }
 0xa3d   : > { %s5380_s3 = sshll.u32 %s10510_s28, 4  ;;  %s5381_s3 = int_to_ptr.hbm [resolvable:$true] %s5380_s3 }
 0xa3e   : > { %7804 = dma.vmem_to_hbm [thread:$0]  (%p7860_p3), %s5379_s24, 768, %s5381_s3, [#allocation6], %s8482_s6, %s8482_s6, %s8483_s0  }
 0xa3f   : > { %8445 = dma.done.wait (%p7860_p3), [#allocation6], 768  }
 0xa40   : > { %8447 = vsyncadd (%p7860_p3), [#allocation6], 4294966528 }
 0xa41 PF: > { %s10511_s30 = sld [smem:[#allocation32_spill]] }
 0xa42   : > { %s10512_s3 = sld [smem:[#allocation29_spill]] }
 0xa43   : > { %s10513_s28 = sld [smem:[#allocation30_spill]] }
 0xa44   : > { %s10514_s29 = sld [smem:[#allocation33_spill]] }
 0xa47   : > { %p34_p12 = scmp.ge.s32.totalorder %s10511_s30, 4  }
 0xa49   :  { %36 = sbr.rel (!%p34_p12) target bundleno = 29 (0x1d), region = 245 }
 0xa4e   :  { %5397 = vsyncpa [#allocation5], 1 }
 0xa4f   :  { %5399 = vsyncpa [#allocation5 + $0x1], 1 }
 0xa50   :  { %5400 = vsyncpa [#allocation8], 1 }
 0xa51   :  { %5401 = vsyncpa [#allocation11], 1 }
 0xa52   :  { %5402 = vsyncpa [#allocation14], 1 }
 0xa53   :  { %5403 = vsyncpa [#allocation6], 1 }
 0xa54   :  { %5405 = vsyncpa [#allocation6 + $0x1], 1 }

</bundles_post_ra>
